<compile_context>
chip_gen: v7x
topology: tpu7x:2x2x1
jax: 0.10.0
libtpu: 0.0.40
codegen_flags: <defaults>
</compile_context>

<pallas_src>
import functools

import jax
import jax.numpy as jnp
from jax.experimental import pallas as pl
from jax.experimental.pallas import tpu as pltpu


def _round_up(x, m):
    return (x + m - 1) // m * m


# Scoped-VMEM limit safe on v5e/v6e/v7x; the worst-case live footprint here is
# only ~2.5 MiB (conv2 patch tile double-buffered + resident weights + f32 acc).
_VMEM_LIMIT = 32 * 1024 * 1024


# ----------------------- Pallas kernels -----------------------

def _conv_pool_kernel(p_ref, w_ref, b_ref, o_ref, *, owe, ph, pw, cout):
    """Fused conv (im2col matmul) + bias + ReLU + MaxPool2d(3, stride=2).

    p_ref: (1, OH*2*owe, Kp) bf16 patches for one image; row
           (h*2 + par)*owe + u is the patch of conv output (h, 2*u + par).
    w_ref: (Kp, 128) bf16.   b_ref: (1, 128) f32.
    o_ref: (1, ph, pw, cout) bf16 pooled output (only real channels stored).
    """
    # Whole-image conv as a single MXU matmul, f32 accumulation.
    acc = jnp.dot(p_ref[0], w_ref[...], preferred_element_type=jnp.float32)
    acc = jnp.maximum(acc + b_ref[...], 0.0)
    # 3x3/stride-2 max pool.  Column parity is baked into the row order, so
    # only contiguous sublane slices are needed; the row (H) axis is handled
    # with a short unrolled loop (static outer-dim indices).
    for i in range(ph):                              # pooled output row
        taps = []
        for di in range(3):                          # 3-tap window over conv rows
            base = (2 * i + di) * 2 * owe
            ye = acc[base:base + pw + 1]             # conv outputs at even columns
            yo = acc[base + owe:base + owe + pw]     # conv outputs at odd columns
            taps.append(jnp.maximum(jnp.maximum(ye[0:pw], ye[1:pw + 1]), yo))
        row = jnp.maximum(jnp.maximum(taps[0], taps[1]), taps[2])
        o_ref[0, i] = row[:, :cout].astype(o_ref.dtype)


def _fc_fused_kernel(x_ref, w1_ref, b1_ref, w2_ref, b2_ref, w3_ref, b3_ref, o_ref):
    # fc1 -> ReLU -> fc2 -> ReLU -> fc3 in one kernel; intermediates never
    # leave VMEM, bf16 matmul operands, f32 accumulation.
    h = jnp.dot(x_ref[...], w1_ref[...], preferred_element_type=jnp.float32)
    h = jnp.maximum(h + b1_ref[...], 0.0).astype(jnp.bfloat16)
    h = jnp.dot(h, w2_ref[...], preferred_element_type=jnp.float32)
    h = jnp.maximum(h + b2_ref[...], 0.0).astype(jnp.bfloat16)
    h = jnp.dot(h, w3_ref[...], preferred_element_type=jnp.float32)
    o_ref[...] = h + b3_ref[...]


# ----------------------- Pallas wrappers -----------------------

def conv_pool(patches, w_p, b_p, *, owe, ph, pw, cout=64):
    """Fused conv+bias+ReLU+maxpool over a parity-ordered patch matrix."""
    B, rows, kp = patches.shape
    n = w_p.shape[1]
    kernel = functools.partial(_conv_pool_kernel, owe=owe, ph=ph, pw=pw, cout=cout)
    return pl.pallas_call(
        kernel,
        out_shape=jax.ShapeDtypeStruct((B, ph, pw, cout), jnp.bfloat16),
        grid=(B,),
        in_specs=[
            pl.BlockSpec((1, rows, kp), lambda b: (b, 0, 0)),
            pl.BlockSpec((kp, n), lambda b: (0, 0)),    # weights stay resident
            pl.BlockSpec((1, n), lambda b: (0, 0)),     # bias stays resident
        ],
        out_specs=pl.BlockSpec((1, ph, pw, cout), lambda b: (b, 0, 0, 0)),
        compiler_params=pltpu.CompilerParams(
            dimension_semantics=("parallel",),
            vmem_limit_bytes=_VMEM_LIMIT,
        ),
    )(patches, w_p, b_p)


def _build_patches(x, k, *, owe, kp):
    """x: (B, H, W, C) bf16 -> (B, OH*2*owe, kp) bf16 im2col patch matrix.

    Row (h*2 + par)*owe + u holds the (kh, kw, c)-flattened kxk patch of conv
    output position (h, 2*u + par); u and K are zero-padded to owe / kp.
    Column parity is baked into the row order so the fused pool kernel needs
    no strided reads.  Built in one XLA materialization at the final layout.
    TODO(synk): move patch extraction into the conv kernel to avoid the
    k*k*C expansion in HBM entirely.
    """
    B, H, W, C = x.shape
    OH, OW = H - k + 1, W - k + 1
    parts = []
    for par in range(2):
        nu = (OW - par + 1) // 2                       # valid columns of this parity
        taps = []
        for kh in range(k):
            for kw in range(k):
                c0 = kw + par
                taps.append(x[:, kh:kh + OH, c0:c0 + 2 * nu - 1:2, :])  # (B,OH,nu,C)
        p = jnp.concatenate(taps, axis=-1)             # (B, OH, nu, k*k*C)
        p = jnp.pad(p, ((0, 0), (0, 0), (0, owe - nu), (0, kp - k * k * C)))
        parts.append(p)
    pp = jnp.stack(parts, axis=2)                      # (B, OH, 2, owe, kp)
    return pp.reshape(B, OH * 2 * owe, kp)


def fc_fused(x, w1, b1, w2, b2, w3, b3, *, row_tile=256):
    """fc1+fc2+fc3 in a single pallas_call, gridded over batch rows."""
    B0, K0 = x.shape
    x = x.astype(jnp.bfloat16)
    Bp = _round_up(B0, 16)
    tm = min(row_tile, Bp)
    # v7x has 2 TensorCores: when there is real work to split, make sure the
    # "parallel" grid has >= 2 steps.
    if Bp // tm < 2 and Bp >= 32:
        tm = _round_up(Bp // 2, 16)
    Bp = _round_up(Bp, tm)
    if Bp != B0:
        x = jnp.pad(x, ((0, Bp - B0), (0, 0)))
    n1, n2, n3 = w1.shape[1], w2.shape[1], w3.shape[1]
    out = pl.pallas_call(
        _fc_fused_kernel,
        out_shape=jax.ShapeDtypeStruct((Bp, n3), jnp.float32),
        grid=(Bp // tm,),
        in_specs=[
            pl.BlockSpec((tm, K0), lambda i: (i, 0)),
            pl.BlockSpec((K0, n1), lambda i: (0, 0)),
            pl.BlockSpec((1, n1), lambda i: (0, 0)),
            pl.BlockSpec((n1, n2), lambda i: (0, 0)),
            pl.BlockSpec((1, n2), lambda i: (0, 0)),
            pl.BlockSpec((n2, n3), lambda i: (0, 0)),
            pl.BlockSpec((1, n3), lambda i: (0, 0)),
        ],
        out_specs=pl.BlockSpec((tm, n3), lambda i: (i, 0)),
        compiler_params=pltpu.CompilerParams(
            dimension_semantics=("parallel",),
            vmem_limit_bytes=_VMEM_LIMIT,
        ),
    )(x, w1, b1, w2, b2, w3, b3)
    return out[:B0]


# ----------------------- Model -----------------------

def init_params(key):
    ks = jax.random.split(key, 10)
    s = 0.05
    return {
        # PyTorch layouts: Conv2d (out_c, in_c, kh, kw); Linear (out, in).
        "conv1_w": jax.random.normal(ks[0], (64, 3, 5, 5), jnp.float32) * s,
        "conv1_b": jax.random.normal(ks[1], (64,), jnp.float32) * s,
        "conv2_w": jax.random.normal(ks[2], (64, 64, 5, 5), jnp.float32) * s,
        "conv2_b": jax.random.normal(ks[3], (64,), jnp.float32) * s,
        "fc1_w": jax.random.normal(ks[4], (384, 64 * 4 * 4), jnp.float32) * s,
        "fc1_b": jax.random.normal(ks[5], (384,), jnp.float32) * s,
        "fc2_w": jax.random.normal(ks[6], (192, 384), jnp.float32) * s,
        "fc2_b": jax.random.normal(ks[7], (192,), jnp.float32) * s,
        "fc3_w": jax.random.normal(ks[8], (10, 192), jnp.float32) * s,
        "fc3_b": jax.random.normal(ks[9], (10,), jnp.float32) * s,
    }


def prepare_params(p):
    """One-time weight preparation (transpose / pad / permute / bf16 cast),
    hoisted out of the jitted forward pass."""

    def conv_w(w):
        oc, ic, kh, kw = w.shape
        wm = jnp.transpose(w, (2, 3, 1, 0)).reshape(kh * kw * ic, oc)   # (kh,kw,c) order
        kpad = _round_up(wm.shape[0], 128)
        npad = _round_up(oc, 128)
        wm = jnp.pad(wm, ((0, kpad - wm.shape[0]), (0, npad - oc)))
        return wm.astype(jnp.bfloat16)

    def vec(b, n):
        return jnp.pad(b, (0, n - b.shape[0])).reshape(1, n).astype(jnp.float32)

    def fc_w(w, row_perm=None):
        out_d, in_d = w.shape
        wt = w.T
        if row_perm is not None:
            wt = wt[row_perm, :]
        kpad = _round_up(in_d, 128)
        npad = _round_up(out_d, 128)
        wt = jnp.pad(wt, ((0, kpad - in_d), (0, npad - out_d)))
        return wt.astype(jnp.bfloat16)

    # fc1 consumes the NHWC (h, w, c) flatten of the (4, 4, 64) pool2 output;
    # permute its input rows from PyTorch's NCHW (c, h, w) flatten order so no
    # runtime transpose is needed.
    h = jnp.arange(4).reshape(4, 1, 1)
    w_ = jnp.arange(4).reshape(1, 4, 1)
    c = jnp.arange(64).reshape(1, 1, 64)
    nchw_index_of_nhwc_row = (c * 16 + h * 4 + w_).reshape(-1)          # (1024,)

    return {
        "conv1_w": conv_w(p["conv1_w"]),                     # (128, 128) bf16
        "conv1_b": vec(p["conv1_b"], 128),
        "conv2_w": conv_w(p["conv2_w"]),                     # (1664, 128) bf16
        "conv2_b": vec(p["conv2_b"], 128),
        "fc1_w": fc_w(p["fc1_w"], nchw_index_of_nhwc_row),   # (1024, 384) bf16
        "fc1_b": vec(p["fc1_b"], 384),
        "fc2_w": fc_w(p["fc2_w"]),                           # (384, 256) bf16
        "fc2_b": vec(p["fc2_b"], 256),
        "fc3_w": fc_w(p["fc3_w"]),                           # (256, 128) bf16
        "fc3_b": vec(p["fc3_b"], 128),
    }


@jax.jit
def cnn_forward(pp, x_nchw):
    # NCHW (PyTorch input convention) -> NHWC; matmul operands in bf16.
    x = jnp.transpose(x_nchw, (0, 2, 3, 1)).astype(jnp.bfloat16)     # (B,32,32,3)
    B = x.shape[0]
    # conv1 (5x5, 3->64) + ReLU + pool fused:  32x32 -> 28x28 -> 13x13
    p1 = _build_patches(x, 5, owe=16, kp=128)                        # (B, 896, 128)
    y1 = conv_pool(p1, pp["conv1_w"], pp["conv1_b"], owe=16, ph=13, pw=13)   # (B,13,13,64)
    # conv2 (5x5, 64->64) + ReLU + pool fused: 13x13 -> 9x9 -> 4x4
    p2 = _build_patches(y1, 5, owe=8, kp=1664)                       # (B, 144, 1664)
    y2 = conv_pool(p2, pp["conv2_w"], pp["conv2_b"], owe=8, ph=4, pw=4)      # (B,4,4,64)
    # NHWC flatten (fc1 weight rows were pre-permuted to match) -> fused FC stack.
    flat = y2.reshape(B, 4 * 4 * 64)
    # TODO(synk): nn.Dropout(p=0.5) treated as identity (inference/eval mode).
    logits = fc_fused(flat, pp["fc1_w"], pp["fc1_b"], pp["fc2_w"], pp["fc2_b"],
                      pp["fc3_w"], pp["fc3_b"])
    return logits[:, :10]


if __name__ == "__main__":
    key = jax.random.PRNGKey(0)
    kparam, kx = jax.random.split(key)
    params = init_params(kparam)
    prepared = prepare_params(params)            # one-time prep, outside jit
    # 32x32x3 input is required by the fc1 dimension (64*4*4); batch kept small.
    x = jax.random.normal(kx, (2, 3, 32, 32), jnp.float32)
    out = jax.block_until_ready(cnn_forward(prepared, x))
    assert out.shape == (2, 10), out.shape
    assert out.dtype == jnp.float32
    print("KERNEL_OK")
</pallas_src>

<mosaic_0001>
module attributes {stable_mosaic.version = 11 : i64} {
  func.func @_conv_pool_kernel(%arg0: i32, %arg1: memref<1x896x128xbf16, #tpu.memory_space<vmem>>, %arg2: memref<128x128xbf16, #tpu.memory_space<vmem>>, %arg3: memref<1x128xf32, #tpu.memory_space<vmem>>, %arg4: memref<1x13x13x64xbf16, #tpu.memory_space<vmem>>) attributes {dimension_semantics = [#tpu.dimension_semantics<parallel>], iteration_bounds = array<i64: 2>, scalar_prefetch = 0 : i64, scratch_operands = 0 : i64, tpu.core_type = #tpu.core_type<tc>, window_params = [{transform_indices = @transform_0, window_bounds = array<i64: 1, 896, 128>}, {pipeline_mode = #tpu.pipeline_mode<synchronous>, transform_indices = @transform_1, window_bounds = array<i64: 128, 128>}, {pipeline_mode = #tpu.pipeline_mode<synchronous>, transform_indices = @transform_2, window_bounds = array<i64: 1, 128>}, {transform_indices = @transform_3, window_bounds = array<i64: 1, 13, 13, 64>}]} {
    %c0 = arith.constant 0 : index
    %c0_0 = arith.constant 0 : index
    %c0_1 = arith.constant 0 : index
    %0 = vector.load %arg1[%c0, %c0_0, %c0_1] : memref<1x896x128xbf16, #tpu.memory_space<vmem>>, vector<1x896x128xbf16>
    %1 = vector.shape_cast %0 : vector<1x896x128xbf16> to vector<896x128xbf16>
    %c0_2 = arith.constant 0 : index
    %c0_3 = arith.constant 0 : index
    %2 = vector.load %arg2[%c0_2, %c0_3] : memref<128x128xbf16, #tpu.memory_space<vmem>>, vector<128x128xbf16>
    %cst = arith.constant dense<0.000000e+00> : vector<896x128xf32>
    %3 = tpu.matmul %1, %2, %cst {dimension_numbers = #tpu.dot_dimension_numbers<[1], [0], [0], [1], [0, 0, 1, 1], [], []>} : vector<896x128xbf16>, vector<128x128xbf16>, vector<896x128xf32> -> vector<896x128xf32>
    %c0_4 = arith.constant 0 : index
    %c0_5 = arith.constant 0 : index
    %4 = vector.load %arg3[%c0_4, %c0_5] : memref<1x128xf32, #tpu.memory_space<vmem>>, vector<1x128xf32>
    %5 = vector.broadcast %4 : vector<1x128xf32> to vector<896x128xf32>
    %6 = arith.addf %3, %5 : vector<896x128xf32>
    %cst_6 = arith.constant 0.000000e+00 : f32
    %7 = vector.broadcast %cst_6 : f32 to vector<896x128xf32>
    %8 = arith.maximumf %6, %7 : vector<896x128xf32>
    %9 = vector.extract_strided_slice %8 {offsets = [0, 0], sizes = [14, 128], strides = [1, 1]} : vector<896x128xf32> to vector<14x128xf32>
    %10 = vector.extract_strided_slice %8 {offsets = [16, 0], sizes = [13, 128], strides = [1, 1]} : vector<896x128xf32> to vector<13x128xf32>
    %11 = vector.extract_strided_slice %9 {offsets = [0, 0], sizes = [13, 128], strides = [1, 1]} : vector<14x128xf32> to vector<13x128xf32>
    %12 = vector.extract_strided_slice %9 {offsets = [1, 0], sizes = [13, 128], strides = [1, 1]} : vector<14x128xf32> to vector<13x128xf32>
    %13 = arith.maximumf %11, %12 : vector<13x128xf32>
    %14 = arith.maximumf %13, %10 : vector<13x128xf32>
    %15 = vector.extract_strided_slice %8 {offsets = [32, 0], sizes = [14, 128], strides = [1, 1]} : vector<896x128xf32> to vector<14x128xf32>
    %16 = vector.extract_strided_slice %8 {offsets = [48, 0], sizes = [13, 128], strides = [1, 1]} : vector<896x128xf32> to vector<13x128xf32>
    %17 = vector.extract_strided_slice %15 {offsets = [0, 0], sizes = [13, 128], strides = [1, 1]} : vector<14x128xf32> to vector<13x128xf32>
    %18 = vector.extract_strided_slice %15 {offsets = [1, 0], sizes = [13, 128], strides = [1, 1]} : vector<14x128xf32> to vector<13x128xf32>
    %19 = arith.maximumf %17, %18 : vector<13x128xf32>
    %20 = arith.maximumf %19, %16 : vector<13x128xf32>
    %21 = vector.extract_strided_slice %8 {offsets = [64, 0], sizes = [14, 128], strides = [1, 1]} : vector<896x128xf32> to vector<14x128xf32>
    %22 = vector.extract_strided_slice %8 {offsets = [80, 0], sizes = [13, 128], strides = [1, 1]} : vector<896x128xf32> to vector<13x128xf32>
    %23 = vector.extract_strided_slice %21 {offsets = [0, 0], sizes = [13, 128], strides = [1, 1]} : vector<14x128xf32> to vector<13x128xf32>
    %24 = vector.extract_strided_slice %21 {offsets = [1, 0], sizes = [13, 128], strides = [1, 1]} : vector<14x128xf32> to vector<13x128xf32>
    %25 = arith.maximumf %23, %24 : vector<13x128xf32>
    %26 = arith.maximumf %25, %22 : vector<13x128xf32>
    %27 = arith.maximumf %14, %20 : vector<13x128xf32>
    %28 = arith.maximumf %27, %26 : vector<13x128xf32>
    %29 = vector.extract_strided_slice %28 {offsets = [0, 0], sizes = [13, 64], strides = [1, 1]} : vector<13x128xf32> to vector<13x64xf32>
    %30 = arith.truncf %29 : vector<13x64xf32> to vector<13x64xbf16>
    %c0_7 = arith.constant 0 : index
    %c0_8 = arith.constant 0 : index
    %c0_9 = arith.constant 0 : index
    %c0_10 = arith.constant 0 : index
    %31 = vector.load %arg4[%c0_7, %c0_8, %c0_9, %c0_10] : memref<1x13x13x64xbf16, #tpu.memory_space<vmem>>, vector<1x1x13x64xbf16>
    %32 = vector.shape_cast %31 : vector<1x1x13x64xbf16> to vector<13x64xbf16>
    %33 = vector.shape_cast %30 : vector<13x64xbf16> to vector<1x1x13x64xbf16>
    tpu.vector_store %arg4[%c0_7, %c0_8, %c0_9, %c0_10], %33 {strides = array<i32>} : memref<1x13x13x64xbf16, #tpu.memory_space<vmem>>, vector<1x1x13x64xbf16>,
    %34 = vector.extract_strided_slice %8 {offsets = [64, 0], sizes = [14, 128], strides = [1, 1]} : vector<896x128xf32> to vector<14x128xf32>
    %35 = vector.extract_strided_slice %8 {offsets = [80, 0], sizes = [13, 128], strides = [1, 1]} : vector<896x128xf32> to vector<13x128xf32>
    %36 = vector.extract_strided_slice %34 {offsets = [0, 0], sizes = [13, 128], strides = [1, 1]} : vector<14x128xf32> to vector<13x128xf32>
    %37 = vector.extract_strided_slice %34 {offsets = [1, 0], sizes = [13, 128], strides = [1, 1]} : vector<14x128xf32> to vector<13x128xf32>
    %38 = arith.maximumf %36, %37 : vector<13x128xf32>
    %39 = arith.maximumf %38, %35 : vector<13x128xf32>
    %40 = vector.extract_strided_slice %8 {offsets = [96, 0], sizes = [14, 128], strides = [1, 1]} : vector<896x128xf32> to vector<14x128xf32>
    %41 = vector.extract_strided_slice %8 {offsets = [112, 0], sizes = [13, 128], strides = [1, 1]} : vector<896x128xf32> to vector<13x128xf32>
    %42 = vector.extract_strided_slice %40 {offsets = [0, 0], sizes = [13, 128], strides = [1, 1]} : vector<14x128xf32> to vector<13x128xf32>
    %43 = vector.extract_strided_slice %40 {offsets = [1, 0], sizes = [13, 128], strides = [1, 1]} : vector<14x128xf32> to vector<13x128xf32>
    %44 = arith.maximumf %42, %43 : vector<13x128xf32>
    %45 = arith.maximumf %44, %41 : vector<13x128xf32>
    %46 = vector.extract_strided_slice %8 {offsets = [128, 0], sizes = [14, 128], strides = [1, 1]} : vector<896x128xf32> to vector<14x128xf32>
    %47 = vector.extract_strided_slice %8 {offsets = [144, 0], sizes = [13, 128], strides = [1, 1]} : vector<896x128xf32> to vector<13x128xf32>
    %48 = vector.extract_strided_slice %46 {offsets = [0, 0], sizes = [13, 128], strides = [1, 1]} : vector<14x128xf32> to vector<13x128xf32>
    %49 = vector.extract_strided_slice %46 {offsets = [1, 0], sizes = [13, 128], strides = [1, 1]} : vector<14x128xf32> to vector<13x128xf32>
    %50 = arith.maximumf %48, %49 : vector<13x128xf32>
    %51 = arith.maximumf %50, %47 : vector<13x128xf32>
    %52 = arith.maximumf %39, %45 : vector<13x128xf32>
    %53 = arith.maximumf %52, %51 : vector<13x128xf32>
    %54 = vector.extract_strided_slice %53 {offsets = [0, 0], sizes = [13, 64], strides = [1, 1]} : vector<13x128xf32> to vector<13x64xf32>
    %55 = arith.truncf %54 : vector<13x64xf32> to vector<13x64xbf16>
    %c0_11 = arith.constant 0 : index
    %c1 = arith.constant 1 : index
    %c0_12 = arith.constant 0 : index
    %c0_13 = arith.constant 0 : index
    %56 = vector.load %arg4[%c0_11, %c1, %c0_12, %c0_13] : memref<1x13x13x64xbf16, #tpu.memory_space<vmem>>, vector<1x1x13x64xbf16>
    %57 = vector.shape_cast %56 : vector<1x1x13x64xbf16> to vector<13x64xbf16>
    %58 = vector.shape_cast %55 : vector<13x64xbf16> to vector<1x1x13x64xbf16>
    tpu.vector_store %arg4[%c0_11, %c1, %c0_12, %c0_13], %58 {strides = array<i32>} : memref<1x13x13x64xbf16, #tpu.memory_space<vmem>>, vector<1x1x13x64xbf16>,
    %59 = vector.extract_strided_slice %8 {offsets = [128, 0], sizes = [14, 128], strides = [1, 1]} : vector<896x128xf32> to vector<14x128xf32>
    %60 = vector.extract_strided_slice %8 {offsets = [144, 0], sizes = [13, 128], strides = [1, 1]} : vector<896x128xf32> to vector<13x128xf32>
    %61 = vector.extract_strided_slice %59 {offsets = [0, 0], sizes = [13, 128], strides = [1, 1]} : vector<14x128xf32> to vector<13x128xf32>
    %62 = vector.extract_strided_slice %59 {offsets = [1, 0], sizes = [13, 128], strides = [1, 1]} : vector<14x128xf32> to vector<13x128xf32>
    %63 = arith.maximumf %61, %62 : vector<13x128xf32>
    %64 = arith.maximumf %63, %60 : vector<13x128xf32>
    %65 = vector.extract_strided_slice %8 {offsets = [160, 0], sizes = [14, 128], strides = [1, 1]} : vector<896x128xf32> to vector<14x128xf32>
    %66 = vector.extract_strided_slice %8 {offsets = [176, 0], sizes = [13, 128], strides = [1, 1]} : vector<896x128xf32> to vector<13x128xf32>
    %67 = vector.extract_strided_slice %65 {offsets = [0, 0], sizes = [13, 128], strides = [1, 1]} : vector<14x128xf32> to vector<13x128xf32>
    %68 = vector.extract_strided_slice %65 {offsets = [1, 0], sizes = [13, 128], strides = [1, 1]} : vector<14x128xf32> to vector<13x128xf32>
    %69 = arith.maximumf %67, %68 : vector<13x128xf32>
    %70 = arith.maximumf %69, %66 : vector<13x128xf32>
    %71 = vector.extract_strided_slice %8 {offsets = [192, 0], sizes = [14, 128], strides = [1, 1]} : vector<896x128xf32> to vector<14x128xf32>
    %72 = vector.extract_strided_slice %8 {offsets = [208, 0], sizes = [13, 128], strides = [1, 1]} : vector<896x128xf32> to vector<13x128xf32>
    %73 = vector.extract_strided_slice %71 {offsets = [0, 0], sizes = [13, 128], strides = [1, 1]} : vector<14x128xf32> to vector<13x128xf32>
    %74 = vector.extract_strided_slice %71 {offsets = [1, 0], sizes = [13, 128], strides = [1, 1]} : vector<14x128xf32> to vector<13x128xf32>
    %75 = arith.maximumf %73, %74 : vector<13x128xf32>
    %76 = arith.maximumf %75, %72 : vector<13x128xf32>
    %77 = arith.maximumf %64, %70 : vector<13x128xf32>
    %78 = arith.maximumf %77, %76 : vector<13x128xf32>
    %79 = vector.extract_strided_slice %78 {offsets = [0, 0], sizes = [13, 64], strides = [1, 1]} : vector<13x128xf32> to vector<13x64xf32>
    %80 = arith.truncf %79 : vector<13x64xf32> to vector<13x64xbf16>
    %c0_14 = arith.constant 0 : index
    %c2 = arith.constant 2 : index
    %c0_15 = arith.constant 0 : index
    %c0_16 = arith.constant 0 : index
    %81 = vector.load %arg4[%c0_14, %c2, %c0_15, %c0_16] : memref<1x13x13x64xbf16, #tpu.memory_space<vmem>>, vector<1x1x13x64xbf16>
    %82 = vector.shape_cast %81 : vector<1x1x13x64xbf16> to vector<13x64xbf16>
    %83 = vector.shape_cast %80 : vector<13x64xbf16> to vector<1x1x13x64xbf16>
    tpu.vector_store %arg4[%c0_14, %c2, %c0_15, %c0_16], %83 {strides = array<i32>} : memref<1x13x13x64xbf16, #tpu.memory_space<vmem>>, vector<1x1x13x64xbf16>,
    %84 = vector.extract_strided_slice %8 {offsets = [192, 0], sizes = [14, 128], strides = [1, 1]} : vector<896x128xf32> to vector<14x128xf32>
    %85 = vector.extract_strided_slice %8 {offsets = [208, 0], sizes = [13, 128], strides = [1, 1]} : vector<896x128xf32> to vector<13x128xf32>
    %86 = vector.extract_strided_slice %84 {offsets = [0, 0], sizes = [13, 128], strides = [1, 1]} : vector<14x128xf32> to vector<13x128xf32>
    %87 = vector.extract_strided_slice %84 {offsets = [1, 0], sizes = [13, 128], strides = [1, 1]} : vector<14x128xf32> to vector<13x128xf32>
    %88 = arith.maximumf %86, %87 : vector<13x128xf32>
    %89 = arith.maximumf %88, %85 : vector<13x128xf32>
    %90 = vector.extract_strided_slice %8 {offsets = [224, 0], sizes = [14, 128], strides = [1, 1]} : vector<896x128xf32> to vector<14x128xf32>
    %91 = vector.extract_strided_slice %8 {offsets = [240, 0], sizes = [13, 128], strides = [1, 1]} : vector<896x128xf32> to vector<13x128xf32>
    %92 = vector.extract_strided_slice %90 {offsets = [0, 0], sizes = [13, 128], strides = [1, 1]} : vector<14x128xf32> to vector<13x128xf32>
    %93 = vector.extract_strided_slice %90 {offsets = [1, 0], sizes = [13, 128], strides = [1, 1]} : vector<14x128xf32> to vector<13x128xf32>
    %94 = arith.maximumf %92, %93 : vector<13x128xf32>
    %95 = arith.maximumf %94, %91 : vector<13x128xf32>
    %96 = vector.extract_strided_slice %8 {offsets = [256, 0], sizes = [14, 128], strides = [1, 1]} : vector<896x128xf32> to vector<14x128xf32>
    %97 = vector.extract_strided_slice %8 {offsets = [272, 0], sizes = [13, 128], strides = [1, 1]} : vector<896x128xf32> to vector<13x128xf32>
    %98 = vector.extract_strided_slice %96 {offsets = [0, 0], sizes = [13, 128], strides = [1, 1]} : vector<14x128xf32> to vector<13x128xf32>
    %99 = vector.extract_strided_slice %96 {offsets = [1, 0], sizes = [13, 128], strides = [1, 1]} : vector<14x128xf32> to vector<13x128xf32>
    %100 = arith.maximumf %98, %99 : vector<13x128xf32>
    %101 = arith.maximumf %100, %97 : vector<13x128xf32>
    %102 = arith.maximumf %89, %95 : vector<13x128xf32>
    %103 = arith.maximumf %102, %101 : vector<13x128xf32>
    %104 = vector.extract_strided_slice %103 {offsets = [0, 0], sizes = [13, 64], strides = [1, 1]} : vector<13x128xf32> to vector<13x64xf32>
    %105 = arith.truncf %104 : vector<13x64xf32> to vector<13x64xbf16>
    %c0_17 = arith.constant 0 : index
    %c3 = arith.constant 3 : index
    %c0_18 = arith.constant 0 : index
    %c0_19 = arith.constant 0 : index
    %106 = vector.load %arg4[%c0_17, %c3, %c0_18, %c0_19] : memref<1x13x13x64xbf16, #tpu.memory_space<vmem>>, vector<1x1x13x64xbf16>
    %107 = vector.shape_cast %106 : vector<1x1x13x64xbf16> to vector<13x64xbf16>
    %108 = vector.shape_cast %105 : vector<13x64xbf16> to vector<1x1x13x64xbf16>
    tpu.vector_store %arg4[%c0_17, %c3, %c0_18, %c0_19], %108 {strides = array<i32>} : memref<1x13x13x64xbf16, #tpu.memory_space<vmem>>, vector<1x1x13x64xbf16>,
    %109 = vector.extract_strided_slice %8 {offsets = [256, 0], sizes = [14, 128], strides = [1, 1]} : vector<896x128xf32> to vector<14x128xf32>
    %110 = vector.extract_strided_slice %8 {offsets = [272, 0], sizes = [13, 128], strides = [1, 1]} : vector<896x128xf32> to vector<13x128xf32>
    %111 = vector.extract_strided_slice %109 {offsets = [0, 0], sizes = [13, 128], strides = [1, 1]} : vector<14x128xf32> to vector<13x128xf32>
    %112 = vector.extract_strided_slice %109 {offsets = [1, 0], sizes = [13, 128], strides = [1, 1]} : vector<14x128xf32> to vector<13x128xf32>
    %113 = arith.maximumf %111, %112 : vector<13x128xf32>
    %114 = arith.maximumf %113, %110 : vector<13x128xf32>
    %115 = vector.extract_strided_slice %8 {offsets = [288, 0], sizes = [14, 128], strides = [1, 1]} : vector<896x128xf32> to vector<14x128xf32>
    %116 = vector.extract_strided_slice %8 {offsets = [304, 0], sizes = [13, 128], strides = [1, 1]} : vector<896x128xf32> to vector<13x128xf32>
    %117 = vector.extract_strided_slice %115 {offsets = [0, 0], sizes = [13, 128], strides = [1, 1]} : vector<14x128xf32> to vector<13x128xf32>
    %118 = vector.extract_strided_slice %115 {offsets = [1, 0], sizes = [13, 128], strides = [1, 1]} : vector<14x128xf32> to vector<13x128xf32>
    %119 = arith.maximumf %117, %118 : vector<13x128xf32>
    %120 = arith.maximumf %119, %116 : vector<13x128xf32>
    %121 = vector.extract_strided_slice %8 {offsets = [320, 0], sizes = [14, 128], strides = [1, 1]} : vector<896x128xf32> to vector<14x128xf32>
    %122 = vector.extract_strided_slice %8 {offsets = [336, 0], sizes = [13, 128], strides = [1, 1]} : vector<896x128xf32> to vector<13x128xf32>
    %123 = vector.extract_strided_slice %121 {offsets = [0, 0], sizes = [13, 128], strides = [1, 1]} : vector<14x128xf32> to vector<13x128xf32>
    %124 = vector.extract_strided_slice %121 {offsets = [1, 0], sizes = [13, 128], strides = [1, 1]} : vector<14x128xf32> to vector<13x128xf32>
    %125 = arith.maximumf %123, %124 : vector<13x128xf32>
    %126 = arith.maximumf %125, %122 : vector<13x128xf32>
    %127 = arith.maximumf %114, %120 : vector<13x128xf32>
    %128 = arith.maximumf %127, %126 : vector<13x128xf32>
    %129 = vector.extract_strided_slice %128 {offsets = [0, 0], sizes = [13, 64], strides = [1, 1]} : vector<13x128xf32> to vector<13x64xf32>
    %130 = arith.truncf %129 : vector<13x64xf32> to vector<13x64xbf16>
    %c0_20 = arith.constant 0 : index
    %c4 = arith.constant 4 : index
    %c0_21 = arith.constant 0 : index
    %c0_22 = arith.constant 0 : index
    %131 = vector.load %arg4[%c0_20, %c4, %c0_21, %c0_22] : memref<1x13x13x64xbf16, #tpu.memory_space<vmem>>, vector<1x1x13x64xbf16>
    %132 = vector.shape_cast %131 : vector<1x1x13x64xbf16> to vector<13x64xbf16>
    %133 = vector.shape_cast %130 : vector<13x64xbf16> to vector<1x1x13x64xbf16>
    tpu.vector_store %arg4[%c0_20, %c4, %c0_21, %c0_22], %133 {strides = array<i32>} : memref<1x13x13x64xbf16, #tpu.memory_space<vmem>>, vector<1x1x13x64xbf16>,
    %134 = vector.extract_strided_slice %8 {offsets = [320, 0], sizes = [14, 128], strides = [1, 1]} : vector<896x128xf32> to vector<14x128xf32>
    %135 = vector.extract_strided_slice %8 {offsets = [336, 0], sizes = [13, 128], strides = [1, 1]} : vector<896x128xf32> to vector<13x128xf32>
    %136 = vector.extract_strided_slice %134 {offsets = [0, 0], sizes = [13, 128], strides = [1, 1]} : vector<14x128xf32> to vector<13x128xf32>
    %137 = vector.extract_strided_slice %134 {offsets = [1, 0], sizes = [13, 128], strides = [1, 1]} : vector<14x128xf32> to vector<13x128xf32>
    %138 = arith.maximumf %136, %137 : vector<13x128xf32>
    %139 = arith.maximumf %138, %135 : vector<13x128xf32>
    %140 = vector.extract_strided_slice %8 {offsets = [352, 0], sizes = [14, 128], strides = [1, 1]} : vector<896x128xf32> to vector<14x128xf32>
    %141 = vector.extract_strided_slice %8 {offsets = [368, 0], sizes = [13, 128], strides = [1, 1]} : vector<896x128xf32> to vector<13x128xf32>
    %142 = vector.extract_strided_slice %140 {offsets = [0, 0], sizes = [13, 128], strides = [1, 1]} : vector<14x128xf32> to vector<13x128xf32>
    %143 = vector.extract_strided_slice %140 {offsets = [1, 0], sizes = [13, 128], strides = [1, 1]} : vector<14x128xf32> to vector<13x128xf32>
    %144 = arith.maximumf %142, %143 : vector<13x128xf32>
    %145 = arith.maximumf %144, %141 : vector<13x128xf32>
    %146 = vector.extract_strided_slice %8 {offsets = [384, 0], sizes = [14, 128], strides = [1, 1]} : vector<896x128xf32> to vector<14x128xf32>
    %147 = vector.extract_strided_slice %8 {offsets = [400, 0], sizes = [13, 128], strides = [1, 1]} : vector<896x128xf32> to vector<13x128xf32>
    %148 = vector.extract_strided_slice %146 {offsets = [0, 0], sizes = [13, 128], strides = [1, 1]} : vector<14x128xf32> to vector<13x128xf32>
    %149 = vector.extract_strided_slice %146 {offsets = [1, 0], sizes = [13, 128], strides = [1, 1]} : vector<14x128xf32> to vector<13x128xf32>
    %150 = arith.maximumf %148, %149 : vector<13x128xf32>
    %151 = arith.maximumf %150, %147 : vector<13x128xf32>
    %152 = arith.maximumf %139, %145 : vector<13x128xf32>
    %153 = arith.maximumf %152, %151 : vector<13x128xf32>
    %154 = vector.extract_strided_slice %153 {offsets = [0, 0], sizes = [13, 64], strides = [1, 1]} : vector<13x128xf32> to vector<13x64xf32>
    %155 = arith.truncf %154 : vector<13x64xf32> to vector<13x64xbf16>
    %c0_23 = arith.constant 0 : index
    %c5 = arith.constant 5 : index
    %c0_24 = arith.constant 0 : index
    %c0_25 = arith.constant 0 : index
    %156 = vector.load %arg4[%c0_23, %c5, %c0_24, %c0_25] : memref<1x13x13x64xbf16, #tpu.memory_space<vmem>>, vector<1x1x13x64xbf16>
    %157 = vector.shape_cast %156 : vector<1x1x13x64xbf16> to vector<13x64xbf16>
    %158 = vector.shape_cast %155 : vector<13x64xbf16> to vector<1x1x13x64xbf16>
    tpu.vector_store %arg4[%c0_23, %c5, %c0_24, %c0_25], %158 {strides = array<i32>} : memref<1x13x13x64xbf16, #tpu.memory_space<vmem>>, vector<1x1x13x64xbf16>,
    %159 = vector.extract_strided_slice %8 {offsets = [384, 0], sizes = [14, 128], strides = [1, 1]} : vector<896x128xf32> to vector<14x128xf32>
    %160 = vector.extract_strided_slice %8 {offsets = [400, 0], sizes = [13, 128], strides = [1, 1]} : vector<896x128xf32> to vector<13x128xf32>
    %161 = vector.extract_strided_slice %159 {offsets = [0, 0], sizes = [13, 128], strides = [1, 1]} : vector<14x128xf32> to vector<13x128xf32>
    %162 = vector.extract_strided_slice %159 {offsets = [1, 0], sizes = [13, 128], strides = [1, 1]} : vector<14x128xf32> to vector<13x128xf32>
    %163 = arith.maximumf %161, %162 : vector<13x128xf32>
    %164 = arith.maximumf %163, %160 : vector<13x128xf32>
    %165 = vector.extract_strided_slice %8 {offsets = [416, 0], sizes = [14, 128], strides = [1, 1]} : vector<896x128xf32> to vector<14x128xf32>
    %166 = vector.extract_strided_slice %8 {offsets = [432, 0], sizes = [13, 128], strides = [1, 1]} : vector<896x128xf32> to vector<13x128xf32>
    %167 = vector.extract_strided_slice %165 {offsets = [0, 0], sizes = [13, 128], strides = [1, 1]} : vector<14x128xf32> to vector<13x128xf32>
    %168 = vector.extract_strided_slice %165 {offsets = [1, 0], sizes = [13, 128], strides = [1, 1]} : vector<14x128xf32> to vector<13x128xf32>
    %169 = arith.maximumf %167, %168 : vector<13x128xf32>
    %170 = arith.maximumf %169, %166 : vector<13x128xf32>
    %171 = vector.extract_strided_slice %8 {offsets = [448, 0], sizes = [14, 128], strides = [1, 1]} : vector<896x128xf32> to vector<14x128xf32>
    %172 = vector.extract_strided_slice %8 {offsets = [464, 0], sizes = [13, 128], strides = [1, 1]} : vector<896x128xf32> to vector<13x128xf32>
    %173 = vector.extract_strided_slice %171 {offsets = [0, 0], sizes = [13, 128], strides = [1, 1]} : vector<14x128xf32> to vector<13x128xf32>
    %174 = vector.extract_strided_slice %171 {offsets = [1, 0], sizes = [13, 128], strides = [1, 1]} : vector<14x128xf32> to vector<13x128xf32>
    %175 = arith.maximumf %173, %174 : vector<13x128xf32>
    %176 = arith.maximumf %175, %172 : vector<13x128xf32>
    %177 = arith.maximumf %164, %170 : vector<13x128xf32>
    %178 = arith.maximumf %177, %176 : vector<13x128xf32>
    %179 = vector.extract_strided_slice %178 {offsets = [0, 0], sizes = [13, 64], strides = [1, 1]} : vector<13x128xf32> to vector<13x64xf32>
    %180 = arith.truncf %179 : vector<13x64xf32> to vector<13x64xbf16>
    %c0_26 = arith.constant 0 : index
    %c6 = arith.constant 6 : index
    %c0_27 = arith.constant 0 : index
    %c0_28 = arith.constant 0 : index
    %181 = vector.load %arg4[%c0_26, %c6, %c0_27, %c0_28] : memref<1x13x13x64xbf16, #tpu.memory_space<vmem>>, vector<1x1x13x64xbf16>
    %182 = vector.shape_cast %181 : vector<1x1x13x64xbf16> to vector<13x64xbf16>
    %183 = vector.shape_cast %180 : vector<13x64xbf16> to vector<1x1x13x64xbf16>
    tpu.vector_store %arg4[%c0_26, %c6, %c0_27, %c0_28], %183 {strides = array<i32>} : memref<1x13x13x64xbf16, #tpu.memory_space<vmem>>, vector<1x1x13x64xbf16>,
    %184 = vector.extract_strided_slice %8 {offsets = [448, 0], sizes = [14, 128], strides = [1, 1]} : vector<896x128xf32> to vector<14x128xf32>
    %185 = vector.extract_strided_slice %8 {offsets = [464, 0], sizes = [13, 128], strides = [1, 1]} : vector<896x128xf32> to vector<13x128xf32>
    %186 = vector.extract_strided_slice %184 {offsets = [0, 0], sizes = [13, 128], strides = [1, 1]} : vector<14x128xf32> to vector<13x128xf32>
    %187 = vector.extract_strided_slice %184 {offsets = [1, 0], sizes = [13, 128], strides = [1, 1]} : vector<14x128xf32> to vector<13x128xf32>
    %188 = arith.maximumf %186, %187 : vector<13x128xf32>
    %189 = arith.maximumf %188, %185 : vector<13x128xf32>
    %190 = vector.extract_strided_slice %8 {offsets = [480, 0], sizes = [14, 128], strides = [1, 1]} : vector<896x128xf32> to vector<14x128xf32>
    %191 = vector.extract_strided_slice %8 {offsets = [496, 0], sizes = [13, 128], strides = [1, 1]} : vector<896x128xf32> to vector<13x128xf32>
    %192 = vector.extract_strided_slice %190 {offsets = [0, 0], sizes = [13, 128], strides = [1, 1]} : vector<14x128xf32> to vector<13x128xf32>
    %193 = vector.extract_strided_slice %190 {offsets = [1, 0], sizes = [13, 128], strides = [1, 1]} : vector<14x128xf32> to vector<13x128xf32>
    %194 = arith.maximumf %192, %193 : vector<13x128xf32>
    %195 = arith.maximumf %194, %191 : vector<13x128xf32>
    %196 = vector.extract_strided_slice %8 {offsets = [512, 0], sizes = [14, 128], strides = [1, 1]} : vector<896x128xf32> to vector<14x128xf32>
    %197 = vector.extract_strided_slice %8 {offsets = [528, 0], sizes = [13, 128], strides = [1, 1]} : vector<896x128xf32> to vector<13x128xf32>
    %198 = vector.extract_strided_slice %196 {offsets = [0, 0], sizes = [13, 128], strides = [1, 1]} : vector<14x128xf32> to vector<13x128xf32>
    %199 = vector.extract_strided_slice %196 {offsets = [1, 0], sizes = [13, 128], strides = [1, 1]} : vector<14x128xf32> to vector<13x128xf32>
    %200 = arith.maximumf %198, %199 : vector<13x128xf32>
    %201 = arith.maximumf %200, %197 : vector<13x128xf32>
    %202 = arith.maximumf %189, %195 : vector<13x128xf32>
    %203 = arith.maximumf %202, %201 : vector<13x128xf32>
    %204 = vector.extract_strided_slice %203 {offsets = [0, 0], sizes = [13, 64], strides = [1, 1]} : vector<13x128xf32> to vector<13x64xf32>
    %205 = arith.truncf %204 : vector<13x64xf32> to vector<13x64xbf16>
    %c0_29 = arith.constant 0 : index
    %c7 = arith.constant 7 : index
    %c0_30 = arith.constant 0 : index
    %c0_31 = arith.constant 0 : index
    %206 = vector.load %arg4[%c0_29, %c7, %c0_30, %c0_31] : memref<1x13x13x64xbf16, #tpu.memory_space<vmem>>, vector<1x1x13x64xbf16>
    %207 = vector.shape_cast %206 : vector<1x1x13x64xbf16> to vector<13x64xbf16>
    %208 = vector.shape_cast %205 : vector<13x64xbf16> to vector<1x1x13x64xbf16>
    tpu.vector_store %arg4[%c0_29, %c7, %c0_30, %c0_31], %208 {strides = array<i32>} : memref<1x13x13x64xbf16, #tpu.memory_space<vmem>>, vector<1x1x13x64xbf16>,
    %209 = vector.extract_strided_slice %8 {offsets = [512, 0], sizes = [14, 128], strides = [1, 1]} : vector<896x128xf32> to vector<14x128xf32>
    %210 = vector.extract_strided_slice %8 {offsets = [528, 0], sizes = [13, 128], strides = [1, 1]} : vector<896x128xf32> to vector<13x128xf32>
    %211 = vector.extract_strided_slice %209 {offsets = [0, 0], sizes = [13, 128], strides = [1, 1]} : vector<14x128xf32> to vector<13x128xf32>
    %212 = vector.extract_strided_slice %209 {offsets = [1, 0], sizes = [13, 128], strides = [1, 1]} : vector<14x128xf32> to vector<13x128xf32>
    %213 = arith.maximumf %211, %212 : vector<13x128xf32>
    %214 = arith.maximumf %213, %210 : vector<13x128xf32>
    %215 = vector.extract_strided_slice %8 {offsets = [544, 0], sizes = [14, 128], strides = [1, 1]} : vector<896x128xf32> to vector<14x128xf32>
    %216 = vector.extract_strided_slice %8 {offsets = [560, 0], sizes = [13, 128], strides = [1, 1]} : vector<896x128xf32> to vector<13x128xf32>
    %217 = vector.extract_strided_slice %215 {offsets = [0, 0], sizes = [13, 128], strides = [1, 1]} : vector<14x128xf32> to vector<13x128xf32>
    %218 = vector.extract_strided_slice %215 {offsets = [1, 0], sizes = [13, 128], strides = [1, 1]} : vector<14x128xf32> to vector<13x128xf32>
    %219 = arith.maximumf %217, %218 : vector<13x128xf32>
    %220 = arith.maximumf %219, %216 : vector<13x128xf32>
    %221 = vector.extract_strided_slice %8 {offsets = [576, 0], sizes = [14, 128], strides = [1, 1]} : vector<896x128xf32> to vector<14x128xf32>
    %222 = vector.extract_strided_slice %8 {offsets = [592, 0], sizes = [13, 128], strides = [1, 1]} : vector<896x128xf32> to vector<13x128xf32>
    %223 = vector.extract_strided_slice %221 {offsets = [0, 0], sizes = [13, 128], strides = [1, 1]} : vector<14x128xf32> to vector<13x128xf32>
    %224 = vector.extract_strided_slice %221 {offsets = [1, 0], sizes = [13, 128], strides = [1, 1]} : vector<14x128xf32> to vector<13x128xf32>
    %225 = arith.maximumf %223, %224 : vector<13x128xf32>
    %226 = arith.maximumf %225, %222 : vector<13x128xf32>
    %227 = arith.maximumf %214, %220 : vector<13x128xf32>
    %228 = arith.maximumf %227, %226 : vector<13x128xf32>
    %229 = vector.extract_strided_slice %228 {offsets = [0, 0], sizes = [13, 64], strides = [1, 1]} : vector<13x128xf32> to vector<13x64xf32>
    %230 = arith.truncf %229 : vector<13x64xf32> to vector<13x64xbf16>
    %c0_32 = arith.constant 0 : index
    %c8 = arith.constant 8 : index
    %c0_33 = arith.constant 0 : index
    %c0_34 = arith.constant 0 : index
    %231 = vector.load %arg4[%c0_32, %c8, %c0_33, %c0_34] : memref<1x13x13x64xbf16, #tpu.memory_space<vmem>>, vector<1x1x13x64xbf16>
    %232 = vector.shape_cast %231 : vector<1x1x13x64xbf16> to vector<13x64xbf16>
    %233 = vector.shape_cast %230 : vector<13x64xbf16> to vector<1x1x13x64xbf16>
    tpu.vector_store %arg4[%c0_32, %c8, %c0_33, %c0_34], %233 {strides = array<i32>} : memref<1x13x13x64xbf16, #tpu.memory_space<vmem>>, vector<1x1x13x64xbf16>,
    %234 = vector.extract_strided_slice %8 {offsets = [576, 0], sizes = [14, 128], strides = [1, 1]} : vector<896x128xf32> to vector<14x128xf32>
    %235 = vector.extract_strided_slice %8 {offsets = [592, 0], sizes = [13, 128], strides = [1, 1]} : vector<896x128xf32> to vector<13x128xf32>
    %236 = vector.extract_strided_slice %234 {offsets = [0, 0], sizes = [13, 128], strides = [1, 1]} : vector<14x128xf32> to vector<13x128xf32>
    %237 = vector.extract_strided_slice %234 {offsets = [1, 0], sizes = [13, 128], strides = [1, 1]} : vector<14x128xf32> to vector<13x128xf32>
    %238 = arith.maximumf %236, %237 : vector<13x128xf32>
    %239 = arith.maximumf %238, %235 : vector<13x128xf32>
    %240 = vector.extract_strided_slice %8 {offsets = [608, 0], sizes = [14, 128], strides = [1, 1]} : vector<896x128xf32> to vector<14x128xf32>
    %241 = vector.extract_strided_slice %8 {offsets = [624, 0], sizes = [13, 128], strides = [1, 1]} : vector<896x128xf32> to vector<13x128xf32>
    %242 = vector.extract_strided_slice %240 {offsets = [0, 0], sizes = [13, 128], strides = [1, 1]} : vector<14x128xf32> to vector<13x128xf32>
    %243 = vector.extract_strided_slice %240 {offsets = [1, 0], sizes = [13, 128], strides = [1, 1]} : vector<14x128xf32> to vector<13x128xf32>
    %244 = arith.maximumf %242, %243 : vector<13x128xf32>
    %245 = arith.maximumf %244, %241 : vector<13x128xf32>
    %246 = vector.extract_strided_slice %8 {offsets = [640, 0], sizes = [14, 128], strides = [1, 1]} : vector<896x128xf32> to vector<14x128xf32>
    %247 = vector.extract_strided_slice %8 {offsets = [656, 0], sizes = [13, 128], strides = [1, 1]} : vector<896x128xf32> to vector<13x128xf32>
    %248 = vector.extract_strided_slice %246 {offsets = [0, 0], sizes = [13, 128], strides = [1, 1]} : vector<14x128xf32> to vector<13x128xf32>
    %249 = vector.extract_strided_slice %246 {offsets = [1, 0], sizes = [13, 128], strides = [1, 1]} : vector<14x128xf32> to vector<13x128xf32>
    %250 = arith.maximumf %248, %249 : vector<13x128xf32>
    %251 = arith.maximumf %250, %247 : vector<13x128xf32>
    %252 = arith.maximumf %239, %245 : vector<13x128xf32>
    %253 = arith.maximumf %252, %251 : vector<13x128xf32>
    %254 = vector.extract_strided_slice %253 {offsets = [0, 0], sizes = [13, 64], strides = [1, 1]} : vector<13x128xf32> to vector<13x64xf32>
    %255 = arith.truncf %254 : vector<13x64xf32> to vector<13x64xbf16>
    %c0_35 = arith.constant 0 : index
    %c9 = arith.constant 9 : index
    %c0_36 = arith.constant 0 : index
    %c0_37 = arith.constant 0 : index
    %256 = vector.load %arg4[%c0_35, %c9, %c0_36, %c0_37] : memref<1x13x13x64xbf16, #tpu.memory_space<vmem>>, vector<1x1x13x64xbf16>
    %257 = vector.shape_cast %256 : vector<1x1x13x64xbf16> to vector<13x64xbf16>
    %258 = vector.shape_cast %255 : vector<13x64xbf16> to vector<1x1x13x64xbf16>
    tpu.vector_store %arg4[%c0_35, %c9, %c0_36, %c0_37], %258 {strides = array<i32>} : memref<1x13x13x64xbf16, #tpu.memory_space<vmem>>, vector<1x1x13x64xbf16>,
    %259 = vector.extract_strided_slice %8 {offsets = [640, 0], sizes = [14, 128], strides = [1, 1]} : vector<896x128xf32> to vector<14x128xf32>
    %260 = vector.extract_strided_slice %8 {offsets = [656, 0], sizes = [13, 128], strides = [1, 1]} : vector<896x128xf32> to vector<13x128xf32>
    %261 = vector.extract_strided_slice %259 {offsets = [0, 0], sizes = [13, 128], strides = [1, 1]} : vector<14x128xf32> to vector<13x128xf32>
    %262 = vector.extract_strided_slice %259 {offsets = [1, 0], sizes = [13, 128], strides = [1, 1]} : vector<14x128xf32> to vector<13x128xf32>
    %263 = arith.maximumf %261, %262 : vector<13x128xf32>
    %264 = arith.maximumf %263, %260 : vector<13x128xf32>
    %265 = vector.extract_strided_slice %8 {offsets = [672, 0], sizes = [14, 128], strides = [1, 1]} : vector<896x128xf32> to vector<14x128xf32>
    %266 = vector.extract_strided_slice %8 {offsets = [688, 0], sizes = [13, 128], strides = [1, 1]} : vector<896x128xf32> to vector<13x128xf32>
    %267 = vector.extract_strided_slice %265 {offsets = [0, 0], sizes = [13, 128], strides = [1, 1]} : vector<14x128xf32> to vector<13x128xf32>
    %268 = vector.extract_strided_slice %265 {offsets = [1, 0], sizes = [13, 128], strides = [1, 1]} : vector<14x128xf32> to vector<13x128xf32>
    %269 = arith.maximumf %267, %268 : vector<13x128xf32>
    %270 = arith.maximumf %269, %266 : vector<13x128xf32>
    %271 = vector.extract_strided_slice %8 {offsets = [704, 0], sizes = [14, 128], strides = [1, 1]} : vector<896x128xf32> to vector<14x128xf32>
    %272 = vector.extract_strided_slice %8 {offsets = [720, 0], sizes = [13, 128], strides = [1, 1]} : vector<896x128xf32> to vector<13x128xf32>
    %273 = vector.extract_strided_slice %271 {offsets = [0, 0], sizes = [13, 128], strides = [1, 1]} : vector<14x128xf32> to vector<13x128xf32>
    %274 = vector.extract_strided_slice %271 {offsets = [1, 0], sizes = [13, 128], strides = [1, 1]} : vector<14x128xf32> to vector<13x128xf32>
    %275 = arith.maximumf %273, %274 : vector<13x128xf32>
    %276 = arith.maximumf %275, %272 : vector<13x128xf32>
    %277 = arith.maximumf %264, %270 : vector<13x128xf32>
    %278 = arith.maximumf %277, %276 : vector<13x128xf32>
    %279 = vector.extract_strided_slice %278 {offsets = [0, 0], sizes = [13, 64], strides = [1, 1]} : vector<13x128xf32> to vector<13x64xf32>
    %280 = arith.truncf %279 : vector<13x64xf32> to vector<13x64xbf16>
    %c0_38 = arith.constant 0 : index
    %c10 = arith.constant 10 : index
    %c0_39 = arith.constant 0 : index
    %c0_40 = arith.constant 0 : index
    %281 = vector.load %arg4[%c0_38, %c10, %c0_39, %c0_40] : memref<1x13x13x64xbf16, #tpu.memory_space<vmem>>, vector<1x1x13x64xbf16>
    %282 = vector.shape_cast %281 : vector<1x1x13x64xbf16> to vector<13x64xbf16>
    %283 = vector.shape_cast %280 : vector<13x64xbf16> to vector<1x1x13x64xbf16>
    tpu.vector_store %arg4[%c0_38, %c10, %c0_39, %c0_40], %283 {strides = array<i32>} : memref<1x13x13x64xbf16, #tpu.memory_space<vmem>>, vector<1x1x13x64xbf16>,
    %284 = vector.extract_strided_slice %8 {offsets = [704, 0], sizes = [14, 128], strides = [1, 1]} : vector<896x128xf32> to vector<14x128xf32>
    %285 = vector.extract_strided_slice %8 {offsets = [720, 0], sizes = [13, 128], strides = [1, 1]} : vector<896x128xf32> to vector<13x128xf32>
    %286 = vector.extract_strided_slice %284 {offsets = [0, 0], sizes = [13, 128], strides = [1, 1]} : vector<14x128xf32> to vector<13x128xf32>
    %287 = vector.extract_strided_slice %284 {offsets = [1, 0], sizes = [13, 128], strides = [1, 1]} : vector<14x128xf32> to vector<13x128xf32>
    %288 = arith.maximumf %286, %287 : vector<13x128xf32>
    %289 = arith.maximumf %288, %285 : vector<13x128xf32>
    %290 = vector.extract_strided_slice %8 {offsets = [736, 0], sizes = [14, 128], strides = [1, 1]} : vector<896x128xf32> to vector<14x128xf32>
    %291 = vector.extract_strided_slice %8 {offsets = [752, 0], sizes = [13, 128], strides = [1, 1]} : vector<896x128xf32> to vector<13x128xf32>
    %292 = vector.extract_strided_slice %290 {offsets = [0, 0], sizes = [13, 128], strides = [1, 1]} : vector<14x128xf32> to vector<13x128xf32>
    %293 = vector.extract_strided_slice %290 {offsets = [1, 0], sizes = [13, 128], strides = [1, 1]} : vector<14x128xf32> to vector<13x128xf32>
    %294 = arith.maximumf %292, %293 : vector<13x128xf32>
    %295 = arith.maximumf %294, %291 : vector<13x128xf32>
    %296 = vector.extract_strided_slice %8 {offsets = [768, 0], sizes = [14, 128], strides = [1, 1]} : vector<896x128xf32> to vector<14x128xf32>
    %297 = vector.extract_strided_slice %8 {offsets = [784, 0], sizes = [13, 128], strides = [1, 1]} : vector<896x128xf32> to vector<13x128xf32>
    %298 = vector.extract_strided_slice %296 {offsets = [0, 0], sizes = [13, 128], strides = [1, 1]} : vector<14x128xf32> to vector<13x128xf32>
    %299 = vector.extract_strided_slice %296 {offsets = [1, 0], sizes = [13, 128], strides = [1, 1]} : vector<14x128xf32> to vector<13x128xf32>
    %300 = arith.maximumf %298, %299 : vector<13x128xf32>
    %301 = arith.maximumf %300, %297 : vector<13x128xf32>
    %302 = arith.maximumf %289, %295 : vector<13x128xf32>
    %303 = arith.maximumf %302, %301 : vector<13x128xf32>
    %304 = vector.extract_strided_slice %303 {offsets = [0, 0], sizes = [13, 64], strides = [1, 1]} : vector<13x128xf32> to vector<13x64xf32>
    %305 = arith.truncf %304 : vector<13x64xf32> to vector<13x64xbf16>
    %c0_41 = arith.constant 0 : index
    %c11 = arith.constant 11 : index
    %c0_42 = arith.constant 0 : index
    %c0_43 = arith.constant 0 : index
    %306 = vector.load %arg4[%c0_41, %c11, %c0_42, %c0_43] : memref<1x13x13x64xbf16, #tpu.memory_space<vmem>>, vector<1x1x13x64xbf16>
    %307 = vector.shape_cast %306 : vector<1x1x13x64xbf16> to vector<13x64xbf16>
    %308 = vector.shape_cast %305 : vector<13x64xbf16> to vector<1x1x13x64xbf16>
    tpu.vector_store %arg4[%c0_41, %c11, %c0_42, %c0_43], %308 {strides = array<i32>} : memref<1x13x13x64xbf16, #tpu.memory_space<vmem>>, vector<1x1x13x64xbf16>,
    %309 = vector.extract_strided_slice %8 {offsets = [768, 0], sizes = [14, 128], strides = [1, 1]} : vector<896x128xf32> to vector<14x128xf32>
    %310 = vector.extract_strided_slice %8 {offsets = [784, 0], sizes = [13, 128], strides = [1, 1]} : vector<896x128xf32> to vector<13x128xf32>
    %311 = vector.extract_strided_slice %309 {offsets = [0, 0], sizes = [13, 128], strides = [1, 1]} : vector<14x128xf32> to vector<13x128xf32>
    %312 = vector.extract_strided_slice %309 {offsets = [1, 0], sizes = [13, 128], strides = [1, 1]} : vector<14x128xf32> to vector<13x128xf32>
    %313 = arith.maximumf %311, %312 : vector<13x128xf32>
    %314 = arith.maximumf %313, %310 : vector<13x128xf32>
    %315 = vector.extract_strided_slice %8 {offsets = [800, 0], sizes = [14, 128], strides = [1, 1]} : vector<896x128xf32> to vector<14x128xf32>
    %316 = vector.extract_strided_slice %8 {offsets = [816, 0], sizes = [13, 128], strides = [1, 1]} : vector<896x128xf32> to vector<13x128xf32>
    %317 = vector.extract_strided_slice %315 {offsets = [0, 0], sizes = [13, 128], strides = [1, 1]} : vector<14x128xf32> to vector<13x128xf32>
    %318 = vector.extract_strided_slice %315 {offsets = [1, 0], sizes = [13, 128], strides = [1, 1]} : vector<14x128xf32> to vector<13x128xf32>
    %319 = arith.maximumf %317, %318 : vector<13x128xf32>
    %320 = arith.maximumf %319, %316 : vector<13x128xf32>
    %321 = vector.extract_strided_slice %8 {offsets = [832, 0], sizes = [14, 128], strides = [1, 1]} : vector<896x128xf32> to vector<14x128xf32>
    %322 = vector.extract_strided_slice %8 {offsets = [848, 0], sizes = [13, 128], strides = [1, 1]} : vector<896x128xf32> to vector<13x128xf32>
    %323 = vector.extract_strided_slice %321 {offsets = [0, 0], sizes = [13, 128], strides = [1, 1]} : vector<14x128xf32> to vector<13x128xf32>
    %324 = vector.extract_strided_slice %321 {offsets = [1, 0], sizes = [13, 128], strides = [1, 1]} : vector<14x128xf32> to vector<13x128xf32>
    %325 = arith.maximumf %323, %324 : vector<13x128xf32>
    %326 = arith.maximumf %325, %322 : vector<13x128xf32>
    %327 = arith.maximumf %314, %320 : vector<13x128xf32>
    %328 = arith.maximumf %327, %326 : vector<13x128xf32>
    %329 = vector.extract_strided_slice %328 {offsets = [0, 0], sizes = [13, 64], strides = [1, 1]} : vector<13x128xf32> to vector<13x64xf32>
    %330 = arith.truncf %329 : vector<13x64xf32> to vector<13x64xbf16>
    %c0_44 = arith.constant 0 : index
    %c12 = arith.constant 12 : index
    %c0_45 = arith.constant 0 : index
    %c0_46 = arith.constant 0 : index
    %331 = vector.load %arg4[%c0_44, %c12, %c0_45, %c0_46] : memref<1x13x13x64xbf16, #tpu.memory_space<vmem>>, vector<1x1x13x64xbf16>
    %332 = vector.shape_cast %331 : vector<1x1x13x64xbf16> to vector<13x64xbf16>
    %333 = vector.shape_cast %330 : vector<13x64xbf16> to vector<1x1x13x64xbf16>
    tpu.vector_store %arg4[%c0_44, %c12, %c0_45, %c0_46], %333 {strides = array<i32>} : memref<1x13x13x64xbf16, #tpu.memory_space<vmem>>, vector<1x1x13x64xbf16>,
    return
  }
  func.func @transform_0(%arg0: i32) -> (i32, i32, i32) {
    %c0_i32 = arith.constant 0 : i32
    %c0_i32_0 = arith.constant 0 : i32
    %c0_i32_1 = arith.constant 0 : i32
    return %arg0, %c0_i32, %c0_i32_0 : i32, i32, i32
  }
  func.func @transform_1(%arg0: i32) -> (i32, i32) {
    %c0_i32 = arith.constant 0 : i32
    %c0_i32_0 = arith.constant 0 : i32
    %c0_i32_1 = arith.constant 0 : i32
    return %c0_i32, %c0_i32_0 : i32, i32
  }
  func.func @transform_2(%arg0: i32) -> (i32, i32) {
    %c0_i32 = arith.constant 0 : i32
    %c0_i32_0 = arith.constant 0 : i32
    %c0_i32_1 = arith.constant 0 : i32
    return %c0_i32, %c0_i32_0 : i32, i32
  }
  func.func @transform_3(%arg0: i32) -> (i32, i32, i32, i32) {
    %c0_i32 = arith.constant 0 : i32
    %c0_i32_0 = arith.constant 0 : i32
    %c0_i32_1 = arith.constant 0 : i32
    %c0_i32_2 = arith.constant 0 : i32
    return %arg0, %c0_i32, %c0_i32_0, %c0_i32_1 : i32, i32, i32, i32
  }
}

module attributes {stable_mosaic.version = 11 : i64} {
  func.func @_conv_pool_kernel(%arg0: i32, %arg1: memref<1x144x1664xbf16, #tpu.memory_space<vmem>>, %arg2: memref<1664x128xbf16, #tpu.memory_space<vmem>>, %arg3: memref<1x128xf32, #tpu.memory_space<vmem>>, %arg4: memref<1x4x4x64xbf16, #tpu.memory_space<vmem>>) attributes {dimension_semantics = [#tpu.dimension_semantics<parallel>], iteration_bounds = array<i64: 2>, scalar_prefetch = 0 : i64, scratch_operands = 0 : i64, tpu.core_type = #tpu.core_type<tc>, window_params = [{transform_indices = @transform_0, window_bounds = array<i64: 1, 144, 1664>}, {pipeline_mode = #tpu.pipeline_mode<synchronous>, transform_indices = @transform_1, window_bounds = array<i64: 1664, 128>}, {pipeline_mode = #tpu.pipeline_mode<synchronous>, transform_indices = @transform_2, window_bounds = array<i64: 1, 128>}, {transform_indices = @transform_3, window_bounds = array<i64: 1, 4, 4, 64>}]} {
    %c0 = arith.constant 0 : index
    %c0_0 = arith.constant 0 : index
    %c0_1 = arith.constant 0 : index
    %0 = vector.load %arg1[%c0, %c0_0, %c0_1] : memref<1x144x1664xbf16, #tpu.memory_space<vmem>>, vector<1x144x1664xbf16>
    %1 = vector.shape_cast %0 : vector<1x144x1664xbf16> to vector<144x1664xbf16>
    %c0_2 = arith.constant 0 : index
    %c0_3 = arith.constant 0 : index
    %2 = vector.load %arg2[%c0_2, %c0_3] : memref<1664x128xbf16, #tpu.memory_space<vmem>>, vector<1664x128xbf16>
    %cst = arith.constant dense<0.000000e+00> : vector<144x128xf32>
    %3 = tpu.matmul %1, %2, %cst {dimension_numbers = #tpu.dot_dimension_numbers<[1], [0], [0], [1], [0, 0, 1, 1], [], []>} : vector<144x1664xbf16>, vector<1664x128xbf16>, vector<144x128xf32> -> vector<144x128xf32>
    %c0_4 = arith.constant 0 : index
    %c0_5 = arith.constant 0 : index
    %4 = vector.load %arg3[%c0_4, %c0_5] : memref<1x128xf32, #tpu.memory_space<vmem>>, vector<1x128xf32>
    %5 = vector.broadcast %4 : vector<1x128xf32> to vector<144x128xf32>
    %6 = arith.addf %3, %5 : vector<144x128xf32>
    %cst_6 = arith.constant 0.000000e+00 : f32
    %7 = vector.broadcast %cst_6 : f32 to vector<144x128xf32>
    %8 = arith.maximumf %6, %7 : vector<144x128xf32>
    %9 = vector.extract_strided_slice %8 {offsets = [0, 0], sizes = [5, 128], strides = [1, 1]} : vector<144x128xf32> to vector<5x128xf32>
    %10 = vector.extract_strided_slice %8 {offsets = [8, 0], sizes = [4, 128], strides = [1, 1]} : vector<144x128xf32> to vector<4x128xf32>
    %11 = vector.extract_strided_slice %9 {offsets = [0, 0], sizes = [4, 128], strides = [1, 1]} : vector<5x128xf32> to vector<4x128xf32>
    %12 = vector.extract_strided_slice %9 {offsets = [1, 0], sizes = [4, 128], strides = [1, 1]} : vector<5x128xf32> to vector<4x128xf32>
    %13 = arith.maximumf %11, %12 : vector<4x128xf32>
    %14 = arith.maximumf %13, %10 : vector<4x128xf32>
    %15 = vector.extract_strided_slice %8 {offsets = [16, 0], sizes = [5, 128], strides = [1, 1]} : vector<144x128xf32> to vector<5x128xf32>
    %16 = vector.extract_strided_slice %8 {offsets = [24, 0], sizes = [4, 128], strides = [1, 1]} : vector<144x128xf32> to vector<4x128xf32>
    %17 = vector.extract_strided_slice %15 {offsets = [0, 0], sizes = [4, 128], strides = [1, 1]} : vector<5x128xf32> to vector<4x128xf32>
    %18 = vector.extract_strided_slice %15 {offsets = [1, 0], sizes = [4, 128], strides = [1, 1]} : vector<5x128xf32> to vector<4x128xf32>
    %19 = arith.maximumf %17, %18 : vector<4x128xf32>
    %20 = arith.maximumf %19, %16 : vector<4x128xf32>
    %21 = vector.extract_strided_slice %8 {offsets = [32, 0], sizes = [5, 128], strides = [1, 1]} : vector<144x128xf32> to vector<5x128xf32>
    %22 = vector.extract_strided_slice %8 {offsets = [40, 0], sizes = [4, 128], strides = [1, 1]} : vector<144x128xf32> to vector<4x128xf32>
    %23 = vector.extract_strided_slice %21 {offsets = [0, 0], sizes = [4, 128], strides = [1, 1]} : vector<5x128xf32> to vector<4x128xf32>
    %24 = vector.extract_strided_slice %21 {offsets = [1, 0], sizes = [4, 128], strides = [1, 1]} : vector<5x128xf32> to vector<4x128xf32>
    %25 = arith.maximumf %23, %24 : vector<4x128xf32>
    %26 = arith.maximumf %25, %22 : vector<4x128xf32>
    %27 = arith.maximumf %14, %20 : vector<4x128xf32>
    %28 = arith.maximumf %27, %26 : vector<4x128xf32>
    %29 = vector.extract_strided_slice %28 {offsets = [0, 0], sizes = [4, 64], strides = [1, 1]} : vector<4x128xf32> to vector<4x64xf32>
    %30 = arith.truncf %29 : vector<4x64xf32> to vector<4x64xbf16>
    %c0_7 = arith.constant 0 : index
    %c0_8 = arith.constant 0 : index
    %c0_9 = arith.constant 0 : index
    %c0_10 = arith.constant 0 : index
    %31 = vector.load %arg4[%c0_7, %c0_8, %c0_9, %c0_10] : memref<1x4x4x64xbf16, #tpu.memory_space<vmem>>, vector<1x1x4x64xbf16>
    %32 = vector.shape_cast %31 : vector<1x1x4x64xbf16> to vector<4x64xbf16>
    %33 = vector.shape_cast %30 : vector<4x64xbf16> to vector<1x1x4x64xbf16>
    tpu.vector_store %arg4[%c0_7, %c0_8, %c0_9, %c0_10], %33 {strides = array<i32>} : memref<1x4x4x64xbf16, #tpu.memory_space<vmem>>, vector<1x1x4x64xbf16>,
    %34 = vector.extract_strided_slice %8 {offsets = [32, 0], sizes = [5, 128], strides = [1, 1]} : vector<144x128xf32> to vector<5x128xf32>
    %35 = vector.extract_strided_slice %8 {offsets = [40, 0], sizes = [4, 128], strides = [1, 1]} : vector<144x128xf32> to vector<4x128xf32>
    %36 = vector.extract_strided_slice %34 {offsets = [0, 0], sizes = [4, 128], strides = [1, 1]} : vector<5x128xf32> to vector<4x128xf32>
    %37 = vector.extract_strided_slice %34 {offsets = [1, 0], sizes = [4, 128], strides = [1, 1]} : vector<5x128xf32> to vector<4x128xf32>
    %38 = arith.maximumf %36, %37 : vector<4x128xf32>
    %39 = arith.maximumf %38, %35 : vector<4x128xf32>
    %40 = vector.extract_strided_slice %8 {offsets = [48, 0], sizes = [5, 128], strides = [1, 1]} : vector<144x128xf32> to vector<5x128xf32>
    %41 = vector.extract_strided_slice %8 {offsets = [56, 0], sizes = [4, 128], strides = [1, 1]} : vector<144x128xf32> to vector<4x128xf32>
    %42 = vector.extract_strided_slice %40 {offsets = [0, 0], sizes = [4, 128], strides = [1, 1]} : vector<5x128xf32> to vector<4x128xf32>
    %43 = vector.extract_strided_slice %40 {offsets = [1, 0], sizes = [4, 128], strides = [1, 1]} : vector<5x128xf32> to vector<4x128xf32>
    %44 = arith.maximumf %42, %43 : vector<4x128xf32>
    %45 = arith.maximumf %44, %41 : vector<4x128xf32>
    %46 = vector.extract_strided_slice %8 {offsets = [64, 0], sizes = [5, 128], strides = [1, 1]} : vector<144x128xf32> to vector<5x128xf32>
    %47 = vector.extract_strided_slice %8 {offsets = [72, 0], sizes = [4, 128], strides = [1, 1]} : vector<144x128xf32> to vector<4x128xf32>
    %48 = vector.extract_strided_slice %46 {offsets = [0, 0], sizes = [4, 128], strides = [1, 1]} : vector<5x128xf32> to vector<4x128xf32>
    %49 = vector.extract_strided_slice %46 {offsets = [1, 0], sizes = [4, 128], strides = [1, 1]} : vector<5x128xf32> to vector<4x128xf32>
    %50 = arith.maximumf %48, %49 : vector<4x128xf32>
    %51 = arith.maximumf %50, %47 : vector<4x128xf32>
    %52 = arith.maximumf %39, %45 : vector<4x128xf32>
    %53 = arith.maximumf %52, %51 : vector<4x128xf32>
    %54 = vector.extract_strided_slice %53 {offsets = [0, 0], sizes = [4, 64], strides = [1, 1]} : vector<4x128xf32> to vector<4x64xf32>
    %55 = arith.truncf %54 : vector<4x64xf32> to vector<4x64xbf16>
    %c0_11 = arith.constant 0 : index
    %c1 = arith.constant 1 : index
    %c0_12 = arith.constant 0 : index
    %c0_13 = arith.constant 0 : index
    %56 = vector.load %arg4[%c0_11, %c1, %c0_12, %c0_13] : memref<1x4x4x64xbf16, #tpu.memory_space<vmem>>, vector<1x1x4x64xbf16>
    %57 = vector.shape_cast %56 : vector<1x1x4x64xbf16> to vector<4x64xbf16>
    %58 = vector.shape_cast %55 : vector<4x64xbf16> to vector<1x1x4x64xbf16>
    tpu.vector_store %arg4[%c0_11, %c1, %c0_12, %c0_13], %58 {strides = array<i32>} : memref<1x4x4x64xbf16, #tpu.memory_space<vmem>>, vector<1x1x4x64xbf16>,
    %59 = vector.extract_strided_slice %8 {offsets = [64, 0], sizes = [5, 128], strides = [1, 1]} : vector<144x128xf32> to vector<5x128xf32>
    %60 = vector.extract_strided_slice %8 {offsets = [72, 0], sizes = [4, 128], strides = [1, 1]} : vector<144x128xf32> to vector<4x128xf32>
    %61 = vector.extract_strided_slice %59 {offsets = [0, 0], sizes = [4, 128], strides = [1, 1]} : vector<5x128xf32> to vector<4x128xf32>
    %62 = vector.extract_strided_slice %59 {offsets = [1, 0], sizes = [4, 128], strides = [1, 1]} : vector<5x128xf32> to vector<4x128xf32>
    %63 = arith.maximumf %61, %62 : vector<4x128xf32>
    %64 = arith.maximumf %63, %60 : vector<4x128xf32>
    %65 = vector.extract_strided_slice %8 {offsets = [80, 0], sizes = [5, 128], strides = [1, 1]} : vector<144x128xf32> to vector<5x128xf32>
    %66 = vector.extract_strided_slice %8 {offsets = [88, 0], sizes = [4, 128], strides = [1, 1]} : vector<144x128xf32> to vector<4x128xf32>
    %67 = vector.extract_strided_slice %65 {offsets = [0, 0], sizes = [4, 128], strides = [1, 1]} : vector<5x128xf32> to vector<4x128xf32>
    %68 = vector.extract_strided_slice %65 {offsets = [1, 0], sizes = [4, 128], strides = [1, 1]} : vector<5x128xf32> to vector<4x128xf32>
    %69 = arith.maximumf %67, %68 : vector<4x128xf32>
    %70 = arith.maximumf %69, %66 : vector<4x128xf32>
    %71 = vector.extract_strided_slice %8 {offsets = [96, 0], sizes = [5, 128], strides = [1, 1]} : vector<144x128xf32> to vector<5x128xf32>
    %72 = vector.extract_strided_slice %8 {offsets = [104, 0], sizes = [4, 128], strides = [1, 1]} : vector<144x128xf32> to vector<4x128xf32>
    %73 = vector.extract_strided_slice %71 {offsets = [0, 0], sizes = [4, 128], strides = [1, 1]} : vector<5x128xf32> to vector<4x128xf32>
    %74 = vector.extract_strided_slice %71 {offsets = [1, 0], sizes = [4, 128], strides = [1, 1]} : vector<5x128xf32> to vector<4x128xf32>
    %75 = arith.maximumf %73, %74 : vector<4x128xf32>
    %76 = arith.maximumf %75, %72 : vector<4x128xf32>
    %77 = arith.maximumf %64, %70 : vector<4x128xf32>
    %78 = arith.maximumf %77, %76 : vector<4x128xf32>
    %79 = vector.extract_strided_slice %78 {offsets = [0, 0], sizes = [4, 64], strides = [1, 1]} : vector<4x128xf32> to vector<4x64xf32>
    %80 = arith.truncf %79 : vector<4x64xf32> to vector<4x64xbf16>
    %c0_14 = arith.constant 0 : index
    %c2 = arith.constant 2 : index
    %c0_15 = arith.constant 0 : index
    %c0_16 = arith.constant 0 : index
    %81 = vector.load %arg4[%c0_14, %c2, %c0_15, %c0_16] : memref<1x4x4x64xbf16, #tpu.memory_space<vmem>>, vector<1x1x4x64xbf16>
    %82 = vector.shape_cast %81 : vector<1x1x4x64xbf16> to vector<4x64xbf16>
    %83 = vector.shape_cast %80 : vector<4x64xbf16> to vector<1x1x4x64xbf16>
    tpu.vector_store %arg4[%c0_14, %c2, %c0_15, %c0_16], %83 {strides = array<i32>} : memref<1x4x4x64xbf16, #tpu.memory_space<vmem>>, vector<1x1x4x64xbf16>,
    %84 = vector.extract_strided_slice %8 {offsets = [96, 0], sizes = [5, 128], strides = [1, 1]} : vector<144x128xf32> to vector<5x128xf32>
    %85 = vector.extract_strided_slice %8 {offsets = [104, 0], sizes = [4, 128], strides = [1, 1]} : vector<144x128xf32> to vector<4x128xf32>
    %86 = vector.extract_strided_slice %84 {offsets = [0, 0], sizes = [4, 128], strides = [1, 1]} : vector<5x128xf32> to vector<4x128xf32>
    %87 = vector.extract_strided_slice %84 {offsets = [1, 0], sizes = [4, 128], strides = [1, 1]} : vector<5x128xf32> to vector<4x128xf32>
    %88 = arith.maximumf %86, %87 : vector<4x128xf32>
    %89 = arith.maximumf %88, %85 : vector<4x128xf32>
    %90 = vector.extract_strided_slice %8 {offsets = [112, 0], sizes = [5, 128], strides = [1, 1]} : vector<144x128xf32> to vector<5x128xf32>
    %91 = vector.extract_strided_slice %8 {offsets = [120, 0], sizes = [4, 128], strides = [1, 1]} : vector<144x128xf32> to vector<4x128xf32>
    %92 = vector.extract_strided_slice %90 {offsets = [0, 0], sizes = [4, 128], strides = [1, 1]} : vector<5x128xf32> to vector<4x128xf32>
    %93 = vector.extract_strided_slice %90 {offsets = [1, 0], sizes = [4, 128], strides = [1, 1]} : vector<5x128xf32> to vector<4x128xf32>
    %94 = arith.maximumf %92, %93 : vector<4x128xf32>
    %95 = arith.maximumf %94, %91 : vector<4x128xf32>
    %96 = vector.extract_strided_slice %8 {offsets = [128, 0], sizes = [5, 128], strides = [1, 1]} : vector<144x128xf32> to vector<5x128xf32>
    %97 = vector.extract_strided_slice %8 {offsets = [136, 0], sizes = [4, 128], strides = [1, 1]} : vector<144x128xf32> to vector<4x128xf32>
    %98 = vector.extract_strided_slice %96 {offsets = [0, 0], sizes = [4, 128], strides = [1, 1]} : vector<5x128xf32> to vector<4x128xf32>
    %99 = vector.extract_strided_slice %96 {offsets = [1, 0], sizes = [4, 128], strides = [1, 1]} : vector<5x128xf32> to vector<4x128xf32>
    %100 = arith.maximumf %98, %99 : vector<4x128xf32>
    %101 = arith.maximumf %100, %97 : vector<4x128xf32>
    %102 = arith.maximumf %89, %95 : vector<4x128xf32>
    %103 = arith.maximumf %102, %101 : vector<4x128xf32>
    %104 = vector.extract_strided_slice %103 {offsets = [0, 0], sizes = [4, 64], strides = [1, 1]} : vector<4x128xf32> to vector<4x64xf32>
    %105 = arith.truncf %104 : vector<4x64xf32> to vector<4x64xbf16>
    %c0_17 = arith.constant 0 : index
    %c3 = arith.constant 3 : index
    %c0_18 = arith.constant 0 : index
    %c0_19 = arith.constant 0 : index
    %106 = vector.load %arg4[%c0_17, %c3, %c0_18, %c0_19] : memref<1x4x4x64xbf16, #tpu.memory_space<vmem>>, vector<1x1x4x64xbf16>
    %107 = vector.shape_cast %106 : vector<1x1x4x64xbf16> to vector<4x64xbf16>
    %108 = vector.shape_cast %105 : vector<4x64xbf16> to vector<1x1x4x64xbf16>
    tpu.vector_store %arg4[%c0_17, %c3, %c0_18, %c0_19], %108 {strides = array<i32>} : memref<1x4x4x64xbf16, #tpu.memory_space<vmem>>, vector<1x1x4x64xbf16>,
    return
  }
  func.func @transform_0(%arg0: i32) -> (i32, i32, i32) {
    %c0_i32 = arith.constant 0 : i32
    %c0_i32_0 = arith.constant 0 : i32
    %c0_i32_1 = arith.constant 0 : i32
    return %arg0, %c0_i32, %c0_i32_0 : i32, i32, i32
  }
  func.func @transform_1(%arg0: i32) -> (i32, i32) {
    %c0_i32 = arith.constant 0 : i32
    %c0_i32_0 = arith.constant 0 : i32
    %c0_i32_1 = arith.constant 0 : i32
    return %c0_i32, %c0_i32_0 : i32, i32
  }
  func.func @transform_2(%arg0: i32) -> (i32, i32) {
    %c0_i32 = arith.constant 0 : i32
    %c0_i32_0 = arith.constant 0 : i32
    %c0_i32_1 = arith.constant 0 : i32
    return %c0_i32, %c0_i32_0 : i32, i32
  }
  func.func @transform_3(%arg0: i32) -> (i32, i32, i32, i32) {
    %c0_i32 = arith.constant 0 : i32
    %c0_i32_0 = arith.constant 0 : i32
    %c0_i32_1 = arith.constant 0 : i32
    %c0_i32_2 = arith.constant 0 : i32
    return %arg0, %c0_i32, %c0_i32_0, %c0_i32_1 : i32, i32, i32, i32
  }
}

module attributes {stable_mosaic.version = 11 : i64} {
  func.func @_fc_fused_kernel(%arg0: i32, %arg1: memref<16x1024xbf16, #tpu.memory_space<vmem>>, %arg2: memref<1024x384xbf16, #tpu.memory_space<vmem>>, %arg3: memref<1x384xf32, #tpu.memory_space<vmem>>, %arg4: memref<384x256xbf16, #tpu.memory_space<vmem>>, %arg5: memref<1x256xf32, #tpu.memory_space<vmem>>, %arg6: memref<256x128xbf16, #tpu.memory_space<vmem>>, %arg7: memref<1x128xf32, #tpu.memory_space<vmem>>, %arg8: memref<16x128xf32, #tpu.memory_space<vmem>>) attributes {dimension_semantics = [#tpu.dimension_semantics<parallel>], iteration_bounds = array<i64: 1>, scalar_prefetch = 0 : i64, scratch_operands = 0 : i64, tpu.core_type = #tpu.core_type<tc>, window_params = [{transform_indices = @transform_0, window_bounds = array<i64: 16, 1024>}, {pipeline_mode = #tpu.pipeline_mode<synchronous>, transform_indices = @transform_1, window_bounds = array<i64: 1024, 384>}, {pipeline_mode = #tpu.pipeline_mode<synchronous>, transform_indices = @transform_2, window_bounds = array<i64: 1, 384>}, {pipeline_mode = #tpu.pipeline_mode<synchronous>, transform_indices = @transform_3, window_bounds = array<i64: 384, 256>}, {pipeline_mode = #tpu.pipeline_mode<synchronous>, transform_indices = @transform_4, window_bounds = array<i64: 1, 256>}, {pipeline_mode = #tpu.pipeline_mode<synchronous>, transform_indices = @transform_5, window_bounds = array<i64: 256, 128>}, {pipeline_mode = #tpu.pipeline_mode<synchronous>, transform_indices = @transform_6, window_bounds = array<i64: 1, 128>}, {transform_indices = @transform_7, window_bounds = array<i64: 16, 128>}]} {
    %c0 = arith.constant 0 : index
    %c0_0 = arith.constant 0 : index
    %0 = vector.load %arg1[%c0, %c0_0] : memref<16x1024xbf16, #tpu.memory_space<vmem>>, vector<16x1024xbf16>
    %c0_1 = arith.constant 0 : index
    %c0_2 = arith.constant 0 : index
    %1 = vector.load %arg2[%c0_1, %c0_2] : memref<1024x384xbf16, #tpu.memory_space<vmem>>, vector<1024x384xbf16>
    %cst = arith.constant dense<0.000000e+00> : vector<16x384xf32>
    %2 = tpu.matmul %0, %1, %cst {dimension_numbers = #tpu.dot_dimension_numbers<[1], [0], [0], [1], [0, 0, 1, 1], [], []>} : vector<16x1024xbf16>, vector<1024x384xbf16>, vector<16x384xf32> -> vector<16x384xf32>
    %c0_3 = arith.constant 0 : index
    %c0_4 = arith.constant 0 : index
    %3 = vector.load %arg3[%c0_3, %c0_4] : memref<1x384xf32, #tpu.memory_space<vmem>>, vector<1x384xf32>
    %4 = vector.broadcast %3 : vector<1x384xf32> to vector<16x384xf32>
    %5 = arith.addf %2, %4 : vector<16x384xf32>
    %cst_5 = arith.constant 0.000000e+00 : f32
    %6 = vector.broadcast %cst_5 : f32 to vector<16x384xf32>
    %7 = arith.maximumf %5, %6 : vector<16x384xf32>
    %8 = arith.truncf %7 : vector<16x384xf32> to vector<16x384xbf16>
    %c0_6 = arith.constant 0 : index
    %c0_7 = arith.constant 0 : index
    %9 = vector.load %arg4[%c0_6, %c0_7] : memref<384x256xbf16, #tpu.memory_space<vmem>>, vector<384x256xbf16>
    %cst_8 = arith.constant dense<0.000000e+00> : vector<16x256xf32>
    %10 = tpu.matmul %8, %9, %cst_8 {dimension_numbers = #tpu.dot_dimension_numbers<[1], [0], [0], [1], [0, 0, 1, 1], [], []>} : vector<16x384xbf16>, vector<384x256xbf16>, vector<16x256xf32> -> vector<16x256xf32>
    %c0_9 = arith.constant 0 : index
    %c0_10 = arith.constant 0 : index
    %11 = vector.load %arg5[%c0_9, %c0_10] : memref<1x256xf32, #tpu.memory_space<vmem>>, vector<1x256xf32>
    %12 = vector.broadcast %11 : vector<1x256xf32> to vector<16x256xf32>
    %13 = arith.addf %10, %12 : vector<16x256xf32>
    %cst_11 = arith.constant 0.000000e+00 : f32
    %14 = vector.broadcast %cst_11 : f32 to vector<16x256xf32>
    %15 = arith.maximumf %13, %14 : vector<16x256xf32>
    %16 = arith.truncf %15 : vector<16x256xf32> to vector<16x256xbf16>
    %c0_12 = arith.constant 0 : index
    %c0_13 = arith.constant 0 : index
    %17 = vector.load %arg6[%c0_12, %c0_13] : memref<256x128xbf16, #tpu.memory_space<vmem>>, vector<256x128xbf16>
    %cst_14 = arith.constant dense<0.000000e+00> : vector<16x128xf32>
    %18 = tpu.matmul %16, %17, %cst_14 {dimension_numbers = #tpu.dot_dimension_numbers<[1], [0], [0], [1], [0, 0, 1, 1], [], []>} : vector<16x256xbf16>, vector<256x128xbf16>, vector<16x128xf32> -> vector<16x128xf32>
    %c0_15 = arith.constant 0 : index
    %c0_16 = arith.constant 0 : index
    %19 = vector.load %arg7[%c0_15, %c0_16] : memref<1x128xf32, #tpu.memory_space<vmem>>, vector<1x128xf32>
    %20 = vector.broadcast %19 : vector<1x128xf32> to vector<16x128xf32>
    %21 = arith.addf %18, %20 : vector<16x128xf32>
    %c0_17 = arith.constant 0 : index
    %c0_18 = arith.constant 0 : index
    %22 = vector.load %arg8[%c0_17, %c0_18] : memref<16x128xf32, #tpu.memory_space<vmem>>, vector<16x128xf32>
    tpu.vector_store %arg8[%c0_17, %c0_18], %21 {strides = array<i32>} : memref<16x128xf32, #tpu.memory_space<vmem>>, vector<16x128xf32>,
    return
  }
  func.func @transform_0(%arg0: i32) -> (i32, i32) {
    %c0_i32 = arith.constant 0 : i32
    %c0_i32_0 = arith.constant 0 : i32
    return %arg0, %c0_i32 : i32, i32
  }
  func.func @transform_1(%arg0: i32) -> (i32, i32) {
    %c0_i32 = arith.constant 0 : i32
    %c0_i32_0 = arith.constant 0 : i32
    %c0_i32_1 = arith.constant 0 : i32
    return %c0_i32, %c0_i32_0 : i32, i32
  }
  func.func @transform_2(%arg0: i32) -> (i32, i32) {
    %c0_i32 = arith.constant 0 : i32
    %c0_i32_0 = arith.constant 0 : i32
    %c0_i32_1 = arith.constant 0 : i32
    return %c0_i32, %c0_i32_0 : i32, i32
  }
  func.func @transform_3(%arg0: i32) -> (i32, i32) {
    %c0_i32 = arith.constant 0 : i32
    %c0_i32_0 = arith.constant 0 : i32
    %c0_i32_1 = arith.constant 0 : i32
    return %c0_i32, %c0_i32_0 : i32, i32
  }
  func.func @transform_4(%arg0: i32) -> (i32, i32) {
    %c0_i32 = arith.constant 0 : i32
    %c0_i32_0 = arith.constant 0 : i32
    %c0_i32_1 = arith.constant 0 : i32
    return %c0_i32, %c0_i32_0 : i32, i32
  }
  func.func @transform_5(%arg0: i32) -> (i32, i32) {
    %c0_i32 = arith.constant 0 : i32
    %c0_i32_0 = arith.constant 0 : i32
    %c0_i32_1 = arith.constant 0 : i32
    return %c0_i32, %c0_i32_0 : i32, i32
  }
  func.func @transform_6(%arg0: i32) -> (i32, i32) {
    %c0_i32 = arith.constant 0 : i32
    %c0_i32_0 = arith.constant 0 : i32
    %c0_i32_1 = arith.constant 0 : i32
    return %c0_i32, %c0_i32_0 : i32, i32
  }
  func.func @transform_7(%arg0: i32) -> (i32, i32) {
    %c0_i32 = arith.constant 0 : i32
    %c0_i32_0 = arith.constant 0 : i32
    return %arg0, %c0_i32 : i32, i32
  }
}

</mosaic_0001>

<bundles_post_ra>
// kernel: cnn_forward.3
= control target key start
LH: loop header
LB: loop body
LE: loop exit
PB: predicated region body
PF: predicated region fallthrough
CT: control target
= control target key end

     0   :  { %s2326_s12 = smov 0   ;;  %s3009_s0 = inlined_call_operand.vmem [shape: bf16[2,896,128], index: 0, kind: input, shape index: {}]   ;;  %s3010_s1 = inlined_call_operand.vmem [shape: bf16[128,128], index: 1, kind: input, shape index: {}]   ;;  %s3011_s2 = inlined_call_operand.vmem [shape: f32[1,128], index: 2, kind: input, shape index: {}]   ;;  %s3012_s3 = inlined_call_operand.vmem [shape: bf16[2,13,13,64], index: 3, kind: output, shape index: {}]  }
   0x1 LB: > { %s1853_s13 = sadd.s32 4294967295, %s2304_s12   ;;  %p1857_p0 = scmp.ge.s32.totalorder %s2304_s12, 1  ;;  %s2304_s12 = sphi %s2326_s12, %s13_s12  }
   0x2   : > { %p137_p1 = scmp.lt.s32.totalorder %s2304_s12, 3 }
   0x4   : > { %p138_p2 = pnand %p1857_p0, %p137_p1 }
   0x5   : > { %v2233_v0 = vld [vmem:[%s3010_s1] sm:$0xff] (!%p138_p2)   ;;  %p161_p3 = scmp.lt.s32.totalorder (!%p138_p2), %s1853_s13, 1  ;;  %v2234_v1 = vld [vmem:[%s3010_s1 + $0x8] sm:$0xff] (!%p138_p2)   ;;  %v2235_v2 = vld [vmem:[%s3010_s1 + $0x10] sm:$0xff] (!%p138_p2)   ;;  %vm1278_vm0 = vcmask (!%p138_p2), 1046528   ;;  %vm1324_vm1 = vcmask (!%p138_p2), 518144  }
   0x6   : > { %141 = sbr.rel (%p138_p2) target bundleno = 385 (0x181), region = 32  ;;  %2079 = vmatprep.subr.bf16.mxu0 (!%p138_p2), %v2233_v0  ;;  %2207 = vmatprep.subr.bf16.mxu1 (!%p138_p2), %v2233_v0  ;;  %v2236_v3 = vld [vmem:[%s3010_s1 + $0x18] sm:$0xff] (!%p138_p2)   ;;  %v2237_v6 = vld [vmem:[%s3010_s1 + $0x20] sm:$0xff] (!%p138_p2)   ;;  %v2238_v7 = vld [vmem:[%s3010_s1 + $0x28] sm:$0xff] (!%p138_p2)   ;;  %vm1325_vm2 = vsmask.f32 (!%p138_p2), 2304 }
   0x7   : > { %2080 = vmatpush3.bf16.msra.mxu0 (!%p138_p2), %v2233_v0  ;;  %2215 = vmatpush3.bf16.msra.mxu1 (!%p138_p2), %v2233_v0  ;;  %v2239_v8 = vld [vmem:[%s3010_s1 + $0x30] sm:$0xff] (!%p138_p2)   ;;  %v2240_v9 = vld [vmem:[%s3010_s1 + $0x38] sm:$0xff] (!%p138_p2)   ;;  %v2425_v0 = vld [vmem:[%s3011_s2] ss:$0 sm:$0xff] (!%p138_p2)  ;;  %vm1322_vm3 = vcmask (!%p138_p2), 519168  }
   0x8   : > { %2081 = vmatprep.subr.bf16.mxu0 (!%p138_p2), %v2234_v1  ;;  %2208 = vmatprep.subr.bf16.mxu1 (!%p138_p2), %v2234_v1  ;;  %vm2541_vm4 = vmand (!%p138_p2), %vm1324_vm1, %vm1325_vm2 }
   0xb   : > { %2082 = vmatpush3.bf16.msra.mxu0 (!%p138_p2), %v2234_v1  ;;  %2216 = vmatpush3.bf16.msra.mxu1 (!%p138_p2), %v2234_v1 }
   0xc   : > { %2083 = vmatprep.subr.bf16.mxu0 (!%p138_p2), %v2235_v2  ;;  %2209 = vmatprep.subr.bf16.mxu1 (!%p138_p2), %v2235_v2 }
   0xd   : > { %s3016_s13 = smov (!%p161_p3, %s1853_s13), 1 }
   0xe   : > { %s2223_s20 = smul.u32 448, %s3016_s13 }
   0xf   : > { %2084 = vmatpush3.bf16.msra.mxu0 %v2235_v2  ;;  %2217 = vmatpush3.bf16.msra.mxu1 %v2235_v2  ;;  %s2224_s9 = smul.u32 104, %s3016_s13 }
  0x10   : > { %s2349_s23 = scalar_lea.vmem %s3009_s0, %s2223_s20  ;;  %2085 = vmatprep.subr.bf16.mxu0 %v2236_v3  ;;  %2210 = vmatprep.subr.bf16.mxu1 %v2236_v3 }
  0x11   : > { %v2241_v4 = vld [vmem:[%s2349_s23] sm:$0xff]   ;;  %v2243_v10 = vld [vmem:[%s2349_s23 + $0x8] sm:$0xff]   ;;  %v2245_v12 = vld [vmem:[%s2349_s23 + $0x10] sm:$0xff]   ;;  %s2526_s13 = scalar_lea.vmem %s3012_s3, %s2224_s9 }
  0x12   : > { %v2242_v5 = vld [vmem:[%s2349_s23 + $0xe0] sm:$0xff]   ;;  %2095 = vmatprep.mubr.bf16.mxu0 %v2241_v4  ;;  %v2244_v11 = vld [vmem:[%s2349_s23 + $0xe8] sm:$0xff]   ;;  %v2246_v13 = vld [vmem:[%s2349_s23 + $0xf0] sm:$0xff]  }
  0x13   : > { %2151 = vmatprep.mubr.bf16.mxu1 %v2242_v5  ;;  %2086 = vmatpush3.bf16.msra.mxu0 %v2236_v3  ;;  %v2247_v14 = vld [vmem:[%s2349_s23 + $0x18] sm:$0xff]   ;;  %v2249_v16 = vld [vmem:[%s2349_s23 + $0x20] sm:$0xff]   ;;  %v2251_v18 = vld [vmem:[%s2349_s23 + $0x28] sm:$0xff]  }
  0x14   : > { %2218 = vmatpush3.bf16.msra.mxu1 %v2236_v3  ;;  %2087 = vmatprep.subr.bf16.mxu0 %v2237_v6  ;;  %v2248_v15 = vld [vmem:[%s2349_s23 + $0xf8] sm:$0xff]   ;;  %v2250_v17 = vld [vmem:[%s2349_s23 + $0x100] sm:$0xff]   ;;  %v2252_v19 = vld [vmem:[%s2349_s23 + $0x108] sm:$0xff]  }
  0x15   : > { %2211 = vmatprep.subr.bf16.mxu1 %v2237_v6  ;;  %v2253_v20 = vld [vmem:[%s2349_s23 + $0x30] sm:$0xff]   ;;  %v2255_v22 = vld [vmem:[%s2349_s23 + $0x38] sm:$0xff]   ;;  %v2257_v24 = vld [vmem:[%s2349_s23 + $0x40] sm:$0xff]  }
  0x16   : > { %v2254_v21 = vld [vmem:[%s2349_s23 + $0x110] sm:$0xff]   ;;  %v2256_v23 = vld [vmem:[%s2349_s23 + $0x118] sm:$0xff]   ;;  %v2258_v25 = vld [vmem:[%s2349_s23 + $0x120] sm:$0xff]  }
  0x17   : > { %2088 = vmatpush3.bf16.msra.mxu0 %v2237_v6  ;;  %v2259_v26 = vld [vmem:[%s2349_s23 + $0x48] sm:$0xff]   ;;  %v2261_v28 = vld [vmem:[%s2349_s23 + $0x50] sm:$0xff]   ;;  %v2263_v30 = vld [vmem:[%s2349_s23 + $0x58] sm:$0xff]  }
  0x18   : > { %2219 = vmatpush3.bf16.msra.mxu1 %v2237_v6  ;;  %2089 = vmatprep.subr.bf16.mxu0 %v2238_v7  ;;  %v2260_v27 = vld [vmem:[%s2349_s23 + $0x128] sm:$0xff]   ;;  %v2262_v29 = vld [vmem:[%s2349_s23 + $0x130] sm:$0xff]   ;;  %v2264_v31 = vld [vmem:[%s2349_s23 + $0x138] sm:$0xff]  }
  0x19   : > { %2212 = vmatprep.subr.bf16.mxu1 %v2238_v7  ;;  %v2265_v32 = vld [vmem:[%s2349_s23 + $0x60] sm:$0xff]   ;;  %v2267_v34 = vld [vmem:[%s2349_s23 + $0x68] sm:$0xff]   ;;  %v2269_v36 = vld [vmem:[%s2349_s23 + $0x70] sm:$0xff]  }
  0x1a   : > { %v2266_v33 = vld [vmem:[%s2349_s23 + $0x140] sm:$0xff]   ;;  %v2268_v35 = vld [vmem:[%s2349_s23 + $0x148] sm:$0xff]   ;;  %v2270_v37 = vld [vmem:[%s2349_s23 + $0x150] sm:$0xff]  }
  0x1b   : > { %2090 = vmatpush3.bf16.msra.mxu0 %v2238_v7  ;;  %v2271_v38 = vld [vmem:[%s2349_s23 + $0x78] sm:$0xff]   ;;  %v2273_v40 = vld [vmem:[%s2349_s23 + $0x80] sm:$0xff]   ;;  %v2275_v42 = vld [vmem:[%s2349_s23 + $0x88] sm:$0xff]  }
  0x1c   : > { %2220 = vmatpush3.bf16.msra.mxu1 %v2238_v7  ;;  %2091 = vmatprep.subr.bf16.mxu0 %v2239_v8  ;;  %v2272_v39 = vld [vmem:[%s2349_s23 + $0x158] sm:$0xff]   ;;  %v2274_v41 = vld [vmem:[%s2349_s23 + $0x160] sm:$0xff]   ;;  %v2276_v43 = vld [vmem:[%s2349_s23 + $0x168] sm:$0xff]  }
  0x1d   : > { %2213 = vmatprep.subr.bf16.mxu1 %v2239_v8  ;;  %v2277_v44 = vld [vmem:[%s2349_s23 + $0x90] sm:$0xff]   ;;  %v2279_v46 = vld [vmem:[%s2349_s23 + $0x98] sm:$0xff]   ;;  %v2281_v48 = vld [vmem:[%s2349_s23 + $0xa0] sm:$0xff]  }
  0x1e   : > { %v2278_v45 = vld [vmem:[%s2349_s23 + $0x170] sm:$0xff]   ;;  %v2280_v47 = vld [vmem:[%s2349_s23 + $0x178] sm:$0xff]   ;;  %v2282_v49 = vld [vmem:[%s2349_s23 + $0x180] sm:$0xff]  }
  0x1f   : > { %2092 = vmatpush3.bf16.msra.mxu0 %v2239_v8  ;;  %v2283_v50 = vld [vmem:[%s2349_s23 + $0xa8] sm:$0xff]   ;;  %v2285_v52 = vld [vmem:[%s2349_s23 + $0xb0] sm:$0xff]   ;;  %v2287_v54 = vld [vmem:[%s2349_s23 + $0xb8] sm:$0xff]  }
  0x20   : > { %2221 = vmatpush3.bf16.msra.mxu1 %v2239_v8  ;;  %2093 = vmatprep.subr.bf16.mxu0 %v2240_v9  ;;  %v2284_v51 = vld [vmem:[%s2349_s23 + $0x188] sm:$0xff]   ;;  %v2286_v53 = vld [vmem:[%s2349_s23 + $0x190] sm:$0xff]   ;;  %v2288_v55 = vld [vmem:[%s2349_s23 + $0x198] sm:$0xff]  }
  0x21   : > { %2214 = vmatprep.subr.bf16.mxu1 %v2240_v9  ;;  %v2289_v56 = vld [vmem:[%s2349_s23 + $0xc0] sm:$0xff]   ;;  %v2291_v58 = vld [vmem:[%s2349_s23 + $0xc8] sm:$0xff]   ;;  %v2293_v60 = vld [vmem:[%s2349_s23 + $0xd0] sm:$0xff]  }
  0x22   : > { %v2290_v57 = vld [vmem:[%s2349_s23 + $0x1a0] sm:$0xff]   ;;  %v2292_v59 = vld [vmem:[%s2349_s23 + $0x1a8] sm:$0xff]   ;;  %v2295_v61 = vld [vmem:[%s2349_s23 + $0x1b0] sm:$0xff]  }
  0x23   : > { %2094 = vmatpush3.bf16.msra.mxu0 %v2240_v9  ;;  %v2294_v62 = vld [vmem:[%s2349_s23 + $0xd8] sm:$0xff]  }
  0x24   : > { %2222 = vmatpush3.bf16.msra.mxu1 %v2240_v9  ;;  %v2296_v63 = vld [vmem:[%s2349_s23 + $0x1b8] sm:$0xff]  }
  0x26   : > { %2096 = vmatmul.mubr.bf16.vlgmr.msra.gmra.mrb[0].mxu0 %v2243_v10 }
  0x27   : > { %2152 = vmatmul.mubr.bf16.vlgmr.msra.gmra.mrb[0].mxu1 %v2244_v11  ;;  %2099 = vmatprep.mubr.bf16.mxu0 %v2245_v12 }
  0x28   : > { %2155 = vmatprep.mubr.bf16.mxu1 %v2246_v13 }
  0x2e   : > { %2100 = vmatmul.mubr.bf16.gmra.mrb[4].mxu0 %v2247_v14 }
  0x2f   : > { %2156 = vmatmul.mubr.bf16.gmra.mrb[4].mxu1 %v2248_v15  ;;  %2103 = vmatprep.mubr.bf16.mxu0 %v2249_v16 }
  0x30   : > { %2159 = vmatprep.mubr.bf16.mxu1 %v2250_v17 }
  0x36   : > { %2104 = vmatmul.mubr.bf16.gmra.mrb[8].mxu0 %v2251_v18 }
  0x37   : > { %2160 = vmatmul.mubr.bf16.gmra.mrb[8].mxu1 %v2252_v19  ;;  %2107 = vmatprep.mubr.bf16.mxu0 %v2253_v20 }
  0x38   : > { %2163 = vmatprep.mubr.bf16.mxu1 %v2254_v21 }
  0x3e   : > { %2108 = vmatmul.mubr.bf16.gmra.mrb[12].mxu0 %v2255_v22 }
  0x3f   : > { %2164 = vmatmul.mubr.bf16.gmra.mrb[12].mxu1 %v2256_v23  ;;  %2111 = vmatprep.mubr.bf16.mxu0 %v2257_v24 }
  0x40   : > { %2167 = vmatprep.mubr.bf16.mxu1 %v2258_v25 }
  0x46   : > { %2112 = vmatmul.mubr.bf16.gmra.mrb[16].mxu0 %v2259_v26 }
  0x47   : > { %2168 = vmatmul.mubr.bf16.gmra.mrb[16].mxu1 %v2260_v27  ;;  %2115 = vmatprep.mubr.bf16.mxu0 %v2261_v28 }
  0x48   : > { %2171 = vmatprep.mubr.bf16.mxu1 %v2262_v29 }
  0x4e   : > { %2116 = vmatmul.mubr.bf16.gmra.mrb[20].mxu0 %v2263_v30 }
  0x4f   : > { %2172 = vmatmul.mubr.bf16.gmra.mrb[20].mxu1 %v2264_v31  ;;  %2119 = vmatprep.mubr.bf16.mxu0 %v2265_v32 }
  0x50   : > { %2175 = vmatprep.mubr.bf16.mxu1 %v2266_v33 }
  0x56   : > { %2120 = vmatmul.mubr.bf16.gmra.mrb[24].mxu0 %v2267_v34 }
  0x57   : > { %2176 = vmatmul.mubr.bf16.gmra.mrb[24].mxu1 %v2268_v35  ;;  %2123 = vmatprep.mubr.bf16.mxu0 %v2269_v36 }
  0x58   : > { %2179 = vmatprep.mubr.bf16.mxu1 %v2270_v37 }
  0x5e   : > { %2124 = vmatmul.mubr.bf16.gmra.mrb[28].mxu0 %v2271_v38 }
  0x5f   : > { %2180 = vmatmul.mubr.bf16.gmra.mrb[28].mxu1 %v2272_v39  ;;  %2127 = vmatprep.mubr.bf16.mxu0 %v2273_v40 }
  0x60   : > { %2183 = vmatprep.mubr.bf16.mxu1 %v2274_v41 }
  0x66   : > { %2128 = vmatmul.mubr.bf16.gmra.mrb[32].mxu0 %v2275_v42 }
  0x67   : > { %2184 = vmatmul.mubr.bf16.gmra.mrb[32].mxu1 %v2276_v43  ;;  %2131 = vmatprep.mubr.bf16.mxu0 %v2277_v44 }
  0x68   : > { %2187 = vmatprep.mubr.bf16.mxu1 %v2278_v45 }
  0x6e   : > { %2132 = vmatmul.mubr.bf16.gmra.mrb[36].mxu0 %v2279_v46 }
  0x6f   : > { %2188 = vmatmul.mubr.bf16.gmra.mrb[36].mxu1 %v2280_v47  ;;  %2135 = vmatprep.mubr.bf16.mxu0 %v2281_v48 }
  0x70   : > { %2191 = vmatprep.mubr.bf16.mxu1 %v2282_v49 }
  0x76   : > { %2136 = vmatmul.mubr.bf16.gmra.mrb[40].mxu0 %v2283_v50 }
  0x77   : > { %2192 = vmatmul.mubr.bf16.gmra.mrb[40].mxu1 %v2284_v51  ;;  %2139 = vmatprep.mubr.bf16.mxu0 %v2285_v52 }
  0x78   : > { %2195 = vmatprep.mubr.bf16.mxu1 %v2286_v53 }
  0x7e   : > { %2140 = vmatmul.mubr.bf16.gmra.mrb[44].mxu0 %v2287_v54 }
  0x7f   : > { %2196 = vmatmul.mubr.bf16.gmra.mrb[44].mxu1 %v2288_v55  ;;  %2143 = vmatprep.mubr.bf16.mxu0 %v2289_v56 }
  0x80   : > { %2199 = vmatprep.mubr.bf16.mxu1 %v2290_v57 }
  0x86   : > { %2144 = vmatmul.mubr.bf16.gmra.mrb[48].mxu0 %v2291_v58 }
  0x87   : > { %2200 = vmatmul.mubr.bf16.gmra.mrb[48].mxu1 %v2292_v59  ;;  %2147 = vmatprep.mubr.bf16.mxu0 %v2293_v60 }
  0x88   : > { %2203 = vmatprep.mubr.bf16.mxu1 %v2295_v61 }
  0x8e   : > { %2148 = vmatmul.mubr.bf16.gmra.mrb[52].mxu0 %v2294_v62 }
  0x8f   : > { %2204 = vmatmul.mubr.bf16.gmra.mrb[52].mxu1 %v2296_v63 }
  0xf9   : > { %v2097_v1 = vpop.f32.mrb[0].mxu0 }
  0xfa   : > { %v2153_v2 = vpop.f32.mrb[0].mxu1  ;;  %v725_v3 = vpop.f32.mrb[1].mxu0  ;;  %v734_v21 = vadd.f32 %v2097_v1, %v2425_v0 }
  0xfb   : > { %v949_v4 = vpop.f32.mrb[1].mxu1  ;;  %v726_v5 = vadd.f32 %v2425_v0, %v725_v3  ;;  %v2098_v6 = vpop.f32.mrb[2].mxu0  ;;  %v958_v17 = vadd.f32 %v2153_v2, %v2425_v0 }
  0xfc   : > { %v950_v7 = vadd.f32 %v2425_v0, %v949_v4  ;;  %v2154_v8 = vpop.f32.mrb[2].mxu1  ;;  %v728_v9 = vpop.f32.mrb[3].mxu0  ;;  %v737_v16 = vadd.f32 %v2098_v6, %v2425_v0  ;;  %v1170_v38 = vmax.f32 %v734_v21, 0.0 }
  0xfd   : > { %v961_v10 = vadd.f32 %v2154_v8, %v2425_v0  ;;  %v952_v11 = vpop.f32.mrb[3].mxu1  ;;  %v1168_v12 = vmax.f32 %v726_v5, 0.0  ;;  %v729_v13 = vadd.f32 %v2425_v0, %v728_v9  ;;  %v1226_v29 = vmax.f32 %v958_v17, 0.0 }
  0xfe   : > { %v1224_v14 = vmax.f32 %v950_v7, 0.0  ;;  %v953_v15 = vadd.f32 %v2425_v0, %v952_v11  ;;  %v1171_v28 = vmax.f32 %v737_v16, 0.0 }
  0xff   : > { %v1169_v18 = vmax.f32 %v729_v13, 0.0  ;;  %v1279_v22 = vrot.slane %v1168_v12, 1  ;;  %v1227_v24 = vmax.f32 %v961_v10, 0.0 }
 0x100   : > { %v1538_v19 = vrot.slane %v1224_v14, 1  ;;  %v1225_v20 = vmax.f32 %v953_v15, 0.0 }
 0x101   : > { %v1280_v23 = vrot.slane %v1169_v18, 1  ;;  %v2101_v26 = vpop.f32.mrb[4].mxu0 }
 0x102   : > { %v1539_v25 = vrot.slane %v1225_v20, 1  ;;  %v2157_v27 = vpop.f32.mrb[4].mxu1  ;;  %v741_v30 = vpop.f32.mrb[5].mxu0  ;;  %v750_v41 = vadd.f32 %v2101_v26, %v2425_v0 }
 0x103   : > { %v965_v31 = vpop.f32.mrb[5].mxu1  ;;  %v1281_v32 = vsel %vm1278_vm0, %v1279_v22, %v1280_v23  ;;  %v1285_v33 = vmax.f32 %v1169_v18, %v1280_v23  ;;  %v2102_v36 = vpop.f32.mrb[6].mxu0  ;;  %v742_v46 = vadd.f32 %v2425_v0, %v741_v30  ;;  %v974_v55 = vadd.f32 %v2157_v27, %v2425_v0 }
 0x104   : > { %v1540_v34 = vsel %vm1278_vm0, %v1538_v19, %v1539_v25  ;;  %v1544_v35 = vmax.f32 %v1225_v20, %v1539_v25  ;;  %v2158_v37 = vpop.f32.mrb[6].mxu1  ;;  %v1284_v39 = vmax.f32 %v1168_v12, %v1281_v32  ;;  %v744_v42 = vpop.f32.mrb[7].mxu0  ;;  %v966_v47 = vadd.f32 %v2425_v0, %v965_v31 }
 0x105   : > { %v1543_v40 = vmax.f32 %v1224_v14, %v1540_v34  ;;  %v968_v43 = vpop.f32.mrb[7].mxu1  ;;  %v2438_v44 = vmax.f32 %v1285_v33, %v1171_v28  ;;  %v977_v50 = vadd.f32 %v2158_v37, %v2425_v0  ;;  %v1172_v51 = vmax.f32 %v742_v46, 0.0 }
 0x106   : > { %v2440_v45 = vmax.f32 %v1544_v35, %v1227_v24  ;;  %v2444_v48 = vmax.f32 %v1284_v39, %v1170_v38  ;;  %v1228_v52 = vmax.f32 %v966_v47, 0.0  ;;  %v745_v53 = vadd.f32 %v2425_v0, %v744_v42 }
 0x107   : > { %v2446_v49 = vmax.f32 %v1543_v40, %v1226_v29  ;;  %v969_v54 = vadd.f32 %v2425_v0, %v968_v43  ;;  %v753_v56 = vadd.f32 %v2102_v36, %v2425_v0  ;;  %v1174_v57 = vmax.f32 %v750_v41, 0.0 }
 0x108   : > { %v1566_v58 = vrot.slane %v1228_v52, 1  ;;  %v1173_v59 = vmax.f32 %v745_v53, 0.0  ;;  %v1290_v63 = vrot.slane %v1172_v51, 1  ;;  %v1231_v1 = vmax.f32 %v977_v50, 0.0 }
 0x109   : > { %v1229_v60 = vmax.f32 %v969_v54, 0.0  ;;  %v2105_v61 = vpop.f32.mrb[8].mxu0  ;;  %v1230_v12 = vmax.f32 %v974_v55, 0.0  ;;  %v1175_v13 = vmax.f32 %v753_v56, 0.0 }
 0x10a   : > { %v2161_v62 = vpop.f32.mrb[8].mxu1  ;;  %v2454_v2 = vadd.f32 %v2105_v61, %v2425_v0  ;;  %v757_v4 = vpop.f32.mrb[9].mxu0  ;;  %v1291_v6 = vrot.slane %v1173_v59, 1 }
 0x10b   : > { %v2457_v3 = vadd.f32 %v2161_v62, %v2425_v0  ;;  %v981_v5 = vpop.f32.mrb[9].mxu1  ;;  %v1567_v7 = vrot.slane %v1229_v60, 1  ;;  %v2460_v8 = vadd.f32 %v2425_v0, %v757_v4  ;;  %v2106_v10 = vpop.f32.mrb[10].mxu0 }
 0x10c   : > { %v2463_v9 = vadd.f32 %v2425_v0, %v981_v5  ;;  %v2162_v11 = vpop.f32.mrb[10].mxu1  ;;  %v2466_v14 = vadd.f32 %v2106_v10, %v2425_v0  ;;  %v760_v16 = vpop.f32.mrb[11].mxu0  ;;  %v1292_v18 = vsel %vm1278_vm0, %v1290_v63, %v1291_v6  ;;  %v1296_v19 = vmax.f32 %v1173_v59, %v1291_v6 }
 0x10d   : > { %v2469_v15 = vadd.f32 %v2162_v11, %v2425_v0  ;;  %v984_v17 = vpop.f32.mrb[11].mxu1  ;;  %v1568_v20 = vsel %vm1278_vm0, %v1566_v58, %v1567_v7  ;;  %v1572_v21 = vmax.f32 %v1229_v60, %v1567_v7  ;;  %v1295_v22 = vmax.f32 %v1172_v51, %v1292_v18 }
 0x10e   : > { %v1571_v23 = vmax.f32 %v1228_v52, %v1568_v20  ;;  %v1176_v24 = vmax.f32 %v2460_v8, 0.0  ;;  %v1232_v25 = vmax.f32 %v2463_v9, 0.0  ;;  %v2475_v26 = vmax.f32 %v1296_v19, %v1175_v13 }
 0x10f   : > { %v2477_v27 = vmax.f32 %v1572_v21, %v1231_v1  ;;  %v1178_v28 = vmax.f32 %v2454_v2, 0.0  ;;  %v1234_v29 = vmax.f32 %v2457_v3, 0.0  ;;  %v2481_v30 = vmax.f32 %v1295_v22, %v1174_v57 }
 0x110   : > { %v2483_v31 = vmax.f32 %v1571_v23, %v1230_v12  ;;  %v1179_v32 = vmax.f32 %v2466_v14, 0.0  ;;  %v1235_v33 = vmax.f32 %v2469_v15, 0.0  ;;  %v1311_v34 = vmax.f32 %v2438_v44, %v2475_v26 }
 0x111   : > { %v1301_v35 = vrot.slane %v1176_v24, 1  ;;  %v761_v36 = vadd.f32 %v2425_v0, %v760_v16  ;;  %v985_v37 = vadd.f32 %v2425_v0, %v984_v17  ;;  %v2109_v38 = vpop.f32.mrb[12].mxu0  ;;  %v1310_v40 = vmax.f32 %v2444_v48, %v2481_v30 }
 0x112   : > { %v2165_v39 = vpop.f32.mrb[12].mxu1  ;;  %v1577_v41 = vrot.slane %v1232_v25, 1  ;;  %v2494_v42 = vadd.f32 %v2109_v38, %v2425_v0  ;;  %v773_v44 = vpop.f32.mrb[13].mxu0  ;;  %v1586_v54 = vmax.f32 %v2446_v49, %v2483_v31  ;;  %v1587_v55 = vmax.f32 %v2440_v45, %v2477_v27 }
 0x113   : > { %v2497_v43 = vadd.f32 %v2165_v39, %v2425_v0  ;;  %v997_v46 = vpop.f32.mrb[13].mxu1  ;;  %v1177_v47 = vmax.f32 %v761_v36, 0.0  ;;  %v1233_v50 = vmax.f32 %v985_v37, 0.0  ;;  %v2500_v51 = vadd.f32 %v2425_v0, %v773_v44  ;;  %v2110_v53 = vpop.f32.mrb[14].mxu0  ;;  %v1960_v36 = vld [vmem:[%s2526_s13 + $0x3c] sm:$0x7] }
 0x114   : > { %v2503_v52 = vadd.f32 %v2425_v0, %v997_v46  ;;  %v2166_v48 = vpop.f32.mrb[14].mxu1  ;;  %v785_v56 = vadd.f32 %v2110_v53, %v2425_v0  ;;  %v776_v58 = vpop.f32.mrb[15].mxu0  ;;  %v1182_v62 = vmax.f32 %v2494_v42, 0.0 }
 0x115   : > { %v2511_v57 = vadd.f32 %v2166_v48, %v2425_v0  ;;  %v1000_v59 = vpop.f32.mrb[15].mxu1  ;;  %v1302_v60 = vrot.slane %v1177_v47, 1  ;;  %v1578_v61 = vrot.slane %v1233_v50, 1  ;;  %v1238_v63 = vmax.f32 %v2497_v43, 0.0 }
 0x116   : > { %v1180_v1 = vmax.f32 %v2500_v51, 0.0  ;;  %v1236_v2 = vmax.f32 %v2503_v52, 0.0  ;;  %v777_v3 = vadd.f32 %v2425_v0, %v776_v58  ;;  %v1001_v4 = vadd.f32 %v2425_v0, %v1000_v59 }
 0x117   : > { %v1303_v5 = vsel %vm1278_vm0, %v1301_v35, %v1302_v60  ;;  %v1307_v6 = vmax.f32 %v1177_v47, %v1302_v60  ;;  %v1579_v7 = vsel %vm1278_vm0, %v1577_v41, %v1578_v61  ;;  %v1583_v8 = vmax.f32 %v1233_v50, %v1578_v61 }
 0x118   : > { %v1306_v9 = vmax.f32 %v1176_v24, %v1303_v5  ;;  %v1582_v10 = vmax.f32 %v1232_v25, %v1579_v7  ;;  %v1183_v11 = vmax.f32 %v785_v56, 0.0  ;;  %v1239_v12 = vmax.f32 %v2511_v57, 0.0 }
 0x119   : > { %v2528_v13 = vmax.f32 %v1307_v6, %v1179_v32  ;;  %v2530_v14 = vmax.f32 %v1583_v8, %v1235_v33  ;;  %v1181_v15 = vmax.f32 %v777_v3, 0.0  ;;  %v1237_v16 = vmax.f32 %v1001_v4, 0.0  ;;  %v2113_v17 = vpop.f32.mrb[16].mxu0 }
 0x11a   : > { %v2169_v18 = vpop.f32.mrb[16].mxu1  ;;  %v2532_v19 = vmax.f32 %v1306_v9, %v1178_v28  ;;  %v2534_v20 = vmax.f32 %v1582_v10, %v1234_v29  ;;  %v1332_v21 = vrot.slane %v1180_v1, 1  ;;  %v1605_v22 = vrot.slane %v1236_v2, 1  ;;  %v789_v23 = vpop.f32.mrb[17].mxu0  ;;  %v1327_v29 = vld [vmem:[%s2526_s13 + $0x4] sm:$0x7] }
 0x11b   : > { %v1013_v24 = vpop.f32.mrb[17].mxu1  ;;  %v1313_v25 = vmax.f32 %v1311_v34, %v2528_v13  ;;  %v1589_v26 = vmax.f32 %v1587_v55, %v2530_v14  ;;  %v1333_v27 = vrot.slane %v1181_v15, 1  ;;  %v1606_v30 = vrot.slane %v1237_v16, 1  ;;  %v2114_v31 = vpop.f32.mrb[18].mxu0 }
 0x11c   : > { %v2170_v32 = vpop.f32.mrb[18].mxu1  ;;  %v1312_v33 = vmax.f32 %v1310_v40, %v2532_v19  ;;  %v1588_v35 = vmax.f32 %v1586_v54, %v2534_v20  ;;  %v2549_v34 = vadd.f32 %v2113_v17, %v2425_v0  ;;  %v2552_v37 = vadd.f32 %v2169_v18, %v2425_v0  ;;  %v792_v38 = vpop.f32.mrb[19].mxu0 }
 0x11d   : > { %v1016_v39 = vpop.f32.mrb[19].mxu1  ;;  %v1990_v40 = vpack.c.bf16 %v1313_v25, %v1313_v25  ;;  %v2004_v41 = vpack.c.bf16 %v1589_v26, %v1589_v26  ;;  %v1334_v42 = vsel %vm1278_vm0, %v1332_v21, %v1333_v27  ;;  %v1338_v43 = vmax.f32 %v1181_v15, %v1333_v27 }
 0x11e   : > { %v1989_v44 = vpack.c.bf16 %v1312_v33, %v1312_v33  ;;  %v2003_v46 = vpack.c.bf16 %v1588_v35, %v1588_v35  ;;  %v1337_v47 = vmax.f32 %v1180_v1, %v1334_v42  ;;  %v1607_v50 = vsel %vm1278_vm0, %v1605_v22, %v1606_v30 }
 0x11f   : > { %v1328_v51 = vsel %vm2541_vm4, %v1990_v40, %v1327_v29  ;;  %v1601_v52 = vsel %vm2541_vm4, %v2004_v41, %v1960_v36  ;;  %v2560_v53 = vmax.f32 %v1338_v43, %v1183_v11  ;;  %v1610_v48 = vmax.f32 %v1236_v2, %v1607_v50 }
 0x120   : > { %1323 = vst.msk [vmem:[%s2526_s13] sm:$0xf] %vm1322_vm3, %v1989_v44  ;;  %1329 = vst [vmem:[%s2526_s13 + $0x4] sm:$0x7] %v1328_v51  ;;  %v2568_v54 = vmax.f32 %v1337_v47, %v1182_v62  ;;  %v1611_v55 = vmax.f32 %v1237_v16, %v1606_v30  ;;  %v790_v56 = vadd.f32 %v2425_v0, %v789_v23  ;;  %v1186_v60 = vmax.f32 %v2549_v34, 0.0 }
 0x121   : > { %1959 = vst.msk [vmem:[%s2526_s13 + $0x38] sm:$0xf] %vm1322_vm3, %v2003_v46  ;;  %1961 = vst [vmem:[%s2526_s13 + $0x3c] sm:$0x7] %v1601_v52  ;;  %v1014_v57 = vadd.f32 %v2425_v0, %v1013_v24  ;;  %v1353_v58 = vmax.f32 %v2528_v13, %v2560_v53  ;;  %v2574_v59 = vmax.f32 %v1610_v48, %v1238_v63  ;;  %v2117_v1 = vpop.f32.mrb[20].mxu0  ;;  %v1242_v4 = vmax.f32 %v2552_v37, 0.0 }
 0x122   : > { %v801_v61 = vadd.f32 %v2114_v31, %v2425_v0  ;;  %v2173_v2 = vpop.f32.mrb[20].mxu1  ;;  %v1352_v62 = vmax.f32 %v2532_v19, %v2568_v54  ;;  %v2580_v3 = vmax.f32 %v1611_v55, %v1239_v12  ;;  %v805_v6 = vpop.f32.mrb[21].mxu0  ;;  %v1184_v8 = vmax.f32 %v790_v56, 0.0  ;;  %v1965_v53 = vld [vmem:[%s2526_s13 + $0x44] sm:$0x7] }
 0x123   : > { %v1240_v5 = vmax.f32 %v1014_v57, 0.0  ;;  %v1029_v7 = vpop.f32.mrb[21].mxu1  ;;  %v1625_v63 = vmax.f32 %v2534_v20, %v2574_v59  ;;  %v1025_v9 = vadd.f32 %v2170_v32, %v2425_v0  ;;  %v793_v10 = vadd.f32 %v2425_v0, %v792_v38  ;;  %v2118_v11 = vpop.f32.mrb[22].mxu0 }
 0x124   : > { %v2174_v15 = vpop.f32.mrb[22].mxu1  ;;  %v1626_v16 = vmax.f32 %v2530_v14, %v2580_v3  ;;  %v1187_v17 = vmax.f32 %v801_v61, 0.0  ;;  %v1017_v18 = vadd.f32 %v2425_v0, %v1016_v39  ;;  %v808_v19 = vpop.f32.mrb[23].mxu0  ;;  %v2591_v23 = vadd.f32 %v2117_v1, %v2425_v0 }
 0x125   : > { %v1616_v12 = vrot.slane %v1240_v5, 1  ;;  %v1032_v21 = vpop.f32.mrb[23].mxu1  ;;  %v1185_v22 = vmax.f32 %v793_v10, 0.0  ;;  %v2594_v20 = vadd.f32 %v2173_v2, %v2425_v0  ;;  %v806_v24 = vadd.f32 %v2425_v0, %v805_v6 }
 0x126   : > { %v1241_v25 = vmax.f32 %v1017_v18, 0.0  ;;  %v2598_v26 = vadd.f32 %v2425_v0, %v1029_v7  ;;  %v817_v14 = vadd.f32 %v2118_v11, %v2425_v0  ;;  %v2602_v27 = vadd.f32 %v2174_v15, %v2425_v0 }
 0x127   : > { %v1343_v30 = vrot.slane %v1184_v8, 1  ;;  %v1243_v31 = vmax.f32 %v1025_v9, 0.0  ;;  %v1344_v32 = vrot.slane %v1185_v22, 1  ;;  %v1190_v33 = vmax.f32 %v2591_v23, 0.0 }
 0x128   : > { %v1617_v29 = vrot.slane %v1241_v25, 1  ;;  %v1246_v35 = vmax.f32 %v2594_v20, 0.0  ;;  %v1188_v36 = vmax.f32 %v806_v24, 0.0  ;;  %v1244_v34 = vmax.f32 %v2598_v26, 0.0 }
 0x129   : > { %v1345_v37 = vsel %vm1278_vm0, %v1343_v30, %v1344_v32  ;;  %v1349_v38 = vmax.f32 %v1185_v22, %v1344_v32  ;;  %v1191_v39 = vmax.f32 %v817_v14, 0.0  ;;  %v809_v40 = vadd.f32 %v2425_v0, %v808_v19  ;;  %v2121_v41 = vpop.f32.mrb[24].mxu0 }
 0x12a   : > { %v2177_v42 = vpop.f32.mrb[24].mxu1  ;;  %v1348_v43 = vmax.f32 %v1184_v8, %v1345_v37  ;;  %v1618_v44 = vsel %vm1278_vm0, %v1616_v12, %v1617_v29  ;;  %v1622_v46 = vmax.f32 %v1241_v25, %v1617_v29  ;;  %v1247_v47 = vmax.f32 %v2602_v27, 0.0  ;;  %v821_v50 = vpop.f32.mrb[25].mxu0 }
 0x12b   : > { %v1045_v51 = vpop.f32.mrb[25].mxu1  ;;  %v2611_v52 = vmax.f32 %v1349_v38, %v1187_v17  ;;  %v1621_v48 = vmax.f32 %v1240_v5, %v1618_v44  ;;  %v1189_v54 = vmax.f32 %v809_v40, 0.0  ;;  %v1033_v55 = vadd.f32 %v2425_v0, %v1032_v21  ;;  %v2122_v56 = vpop.f32.mrb[26].mxu0 }
 0x12c   : > { %v2178_v57 = vpop.f32.mrb[26].mxu1  ;;  %v2614_v59 = vmax.f32 %v1348_v43, %v1186_v60  ;;  %v2616_v61 = vmax.f32 %v1622_v46, %v1243_v31  ;;  %v1371_v1 = vrot.slane %v1188_v36, 1  ;;  %v1644_v2 = vrot.slane %v1244_v34, 1  ;;  %v824_v3 = vpop.f32.mrb[27].mxu0  ;;  %v1930_v60 = vld [vmem:[%s2526_s13 + $0xc] sm:$0x7] }
 0x12d   : > { %v1048_v6 = vpop.f32.mrb[27].mxu1  ;;  %v1355_v5 = vmax.f32 %v1353_v58, %v2611_v52  ;;  %v2622_v7 = vmax.f32 %v1621_v48, %v1242_v4  ;;  %v1372_v8 = vrot.slane %v1189_v54, 1  ;;  %v1245_v9 = vmax.f32 %v1033_v55, 0.0 }
 0x12e   : > { %v1354_v10 = vmax.f32 %v1352_v62, %v2614_v59  ;;  %v1628_v11 = vmax.f32 %v1626_v16, %v2616_v61  ;;  %v2628_v15 = vadd.f32 %v2121_v41, %v2425_v0  ;;  %v2631_v12 = vadd.f32 %v2177_v42, %v2425_v0 }
 0x12f   : > { %v1992_v17 = vpack.c.bf16 %v1355_v5, %v1355_v5  ;;  %v1627_v13 = vmax.f32 %v1625_v63, %v2622_v7  ;;  %v1373_v58 = vsel %vm1278_vm0, %v1371_v1, %v1372_v8  ;;  %v1377_v4 = vmax.f32 %v1189_v54, %v1372_v8 }
 0x130   : > { %v1991_v18 = vpack.c.bf16 %v1354_v10, %v1354_v10  ;;  %v2006_v62 = vpack.c.bf16 %v1628_v11, %v1628_v11  ;;  %v1376_v19 = vmax.f32 %v1188_v36, %v1373_v58  ;;  %v1645_v16 = vrot.slane %v1245_v9, 1 }
 0x131   : > { %v1367_v21 = vsel %vm2541_vm4, %v1992_v17, %v1930_v60  ;;  %v2005_v22 = vpack.c.bf16 %v1627_v13, %v1627_v13  ;;  %v2638_v23 = vmax.f32 %v1377_v4, %v1191_v39  ;;  %v822_v24 = vadd.f32 %v2425_v0, %v821_v50  ;;  %v2125_v25 = vpop.f32.mrb[28].mxu0 }
 0x132   : > { %v2181_v63 = vpop.f32.mrb[28].mxu1  ;;  %1929 = vst.msk [vmem:[%s2526_s13 + $0x8] sm:$0xf] %vm1322_vm3, %v1991_v18  ;;  %1931 = vst [vmem:[%s2526_s13 + $0xc] sm:$0x7] %v1367_v21  ;;  %v1640_v26 = vsel %vm2541_vm4, %v2006_v62, %v1965_v53  ;;  %v2646_v14 = vmax.f32 %v1376_v19, %v1190_v33  ;;  %v1646_v27 = vsel %vm1278_vm0, %v1644_v2, %v1645_v16  ;;  %v837_v31 = vpop.f32.mrb[29].mxu0 }
 0x133   : > { %v1650_v30 = vmax.f32 %v1245_v9, %v1645_v16  ;;  %v1061_v32 = vpop.f32.mrb[29].mxu1  ;;  %1964 = vst.msk [vmem:[%s2526_s13 + $0x40] sm:$0xf] %vm1322_vm3, %v2005_v22  ;;  %1966 = vst [vmem:[%s2526_s13 + $0x44] sm:$0x7] %v1640_v26  ;;  %v1392_v29 = vmax.f32 %v2611_v52, %v2638_v23  ;;  %v1649_v36 = vmax.f32 %v1244_v34, %v1646_v27  ;;  %v1192_v37 = vmax.f32 %v822_v24, 0.0 }
 0x134   : > { %v1046_v38 = vadd.f32 %v2425_v0, %v1045_v51  ;;  %v2126_v39 = vpop.f32.mrb[30].mxu0  ;;  %v2182_v40 = vpop.f32.mrb[30].mxu1  ;;  %v1391_v33 = vmax.f32 %v2614_v59, %v2646_v14  ;;  %v1194_v42 = vmax.f32 %v2628_v15, 0.0  ;;  %v1250_v43 = vmax.f32 %v2631_v12, 0.0 }
 0x135   : > { %v1652_v41 = vmax.f32 %v1650_v30, %v1247_v47  ;;  %v840_v44 = vpop.f32.mrb[31].mxu0  ;;  %v1064_v46 = vpop.f32.mrb[31].mxu1  ;;  %v1651_v50 = vmax.f32 %v1649_v36, %v1246_v35  ;;  %v833_v34 = vadd.f32 %v2122_v56, %v2425_v0  ;;  %v825_v51 = vadd.f32 %v2425_v0, %v824_v3 }
 0x136   : > { %v1248_v52 = vmax.f32 %v1046_v38, 0.0  ;;  %v1382_v54 = vrot.slane %v1192_v37, 1  ;;  %v1057_v55 = vadd.f32 %v2178_v57, %v2425_v0  ;;  %v1049_v47 = vadd.f32 %v2425_v0, %v1048_v6 }
 0x137   : > { %v1665_v48 = vmax.f32 %v2616_v61, %v1652_v41  ;;  %v1664_v59 = vmax.f32 %v2622_v7, %v1651_v50  ;;  %v1193_v2 = vmax.f32 %v825_v51, 0.0  ;;  %v2668_v5 = vadd.f32 %v2125_v25, %v2425_v0  ;;  %v1935_v41 = vld [vmem:[%s2526_s13 + $0x14] sm:$0x7]  ;;  %v1970_v51 = vld [vmem:[%s2526_s13 + $0x4c] sm:$0x7] }
 0x138   : > { %v1655_v1 = vrot.slane %v1248_v52, 1  ;;  %v1249_v20 = vmax.f32 %v1049_v47, 0.0  ;;  %v2671_v35 = vadd.f32 %v2181_v63, %v2425_v0  ;;  %v2674_v56 = vadd.f32 %v2425_v0, %v837_v31 }
 0x139   : > { %v2677_v61 = vadd.f32 %v2425_v0, %v1061_v32  ;;  %v1195_v57 = vmax.f32 %v833_v34, 0.0  ;;  %v1383_v3 = vrot.slane %v1193_v2, 1  ;;  %v2680_v6 = vadd.f32 %v2126_v39, %v2425_v0  ;;  %v2129_v8 = vpop.f32.mrb[32].mxu0 }
 0x13a   : > { %v2683_v7 = vadd.f32 %v2182_v40, %v2425_v0  ;;  %v2185_v9 = vpop.f32.mrb[32].mxu1  ;;  %v1251_v10 = vmax.f32 %v1057_v55, 0.0  ;;  %v1656_v60 = vrot.slane %v1249_v20, 1  ;;  %v1198_v11 = vmax.f32 %v2668_v5, 0.0  ;;  %v853_v12 = vpop.f32.mrb[33].mxu0 }
 0x13b   : > { %v1196_v15 = vmax.f32 %v2674_v56, 0.0  ;;  %v1077_v17 = vpop.f32.mrb[33].mxu1  ;;  %v1384_v13 = vsel %vm1278_vm0, %v1382_v54, %v1383_v3  ;;  %v1388_v53 = vmax.f32 %v1193_v2, %v1383_v3  ;;  %v1254_v58 = vmax.f32 %v2671_v35, 0.0  ;;  %v2690_v18 = vpop.f32.mrb[34].mxu0 }
 0x13c   : > { %v1252_v4 = vmax.f32 %v2677_v61, 0.0  ;;  %v2692_v62 = vpop.f32.mrb[34].mxu1  ;;  %v1387_v19 = vmax.f32 %v1192_v37, %v1384_v13  ;;  %v1657_v16 = vsel %vm1278_vm0, %v1655_v1, %v1656_v60  ;;  %v1661_v21 = vmax.f32 %v1249_v20, %v1656_v60  ;;  %v2696_v23 = vpop.f32.mrb[35].mxu0 }
 0x13d   : > { %v1199_v22 = vmax.f32 %v2680_v6, 0.0  ;;  %v2698_v24 = vpop.f32.mrb[35].mxu1  ;;  %v2700_v25 = vmax.f32 %v1388_v53, %v1195_v57  ;;  %v1660_v63 = vmax.f32 %v1248_v52, %v1657_v16  ;;  %v1255_v26 = vmax.f32 %v2683_v7, 0.0 }
 0x13e   : > { %v841_v14 = vadd.f32 %v2425_v0, %v840_v44  ;;  %v2704_v27 = vmax.f32 %v1387_v19, %v1194_v42  ;;  %v2706_v30 = vmax.f32 %v1661_v21, %v1251_v10  ;;  %v1410_v31 = vrot.slane %v1196_v15, 1 }
 0x13f   : > { %v1065_v32 = vadd.f32 %v2425_v0, %v1064_v46  ;;  %v1394_v36 = vmax.f32 %v1392_v29, %v2700_v25  ;;  %v2710_v37 = vmax.f32 %v1660_v63, %v1250_v43  ;;  %v1683_v38 = vrot.slane %v1252_v4, 1 }
 0x140   : > { %v1197_v39 = vmax.f32 %v841_v14, 0.0  ;;  %v1393_v40 = vmax.f32 %v1391_v33, %v2704_v27  ;;  %v1667_v50 = vmax.f32 %v1665_v48, %v2706_v30  ;;  %v2716_v42 = vadd.f32 %v2129_v8, %v2425_v0 }
 0x141   : > { %v1253_v44 = vmax.f32 %v1065_v32, 0.0  ;;  %v1994_v52 = vpack.c.bf16 %v1394_v36, %v1394_v36  ;;  %v1666_v34 = vmax.f32 %v1664_v59, %v2710_v37  ;;  %v2721_v29 = vadd.f32 %v2185_v9, %v2425_v0  ;;  %v2133_v43 = vpop.f32.mrb[36].mxu0 }
 0x142   : > { %v1411_v46 = vrot.slane %v1197_v39, 1  ;;  %v2189_v54 = vpop.f32.mrb[36].mxu1  ;;  %v1993_v33 = vpack.c.bf16 %v1393_v40, %v1393_v40  ;;  %v2008_v55 = vpack.c.bf16 %v1667_v50, %v1667_v50  ;;  %v2724_v48 = vadd.f32 %v2425_v0, %v853_v12  ;;  %v869_v1 = vpop.f32.mrb[37].mxu0 }
 0x143   : > { %v1684_v47 = vrot.slane %v1253_v44, 1  ;;  %v1093_v2 = vpop.f32.mrb[37].mxu1  ;;  %v1406_v59 = vsel %vm2541_vm4, %v1994_v52, %v1935_v41  ;;  %v2007_v20 = vpack.c.bf16 %v1666_v34, %v1666_v34  ;;  %v2134_v57 = vpop.f32.mrb[38].mxu0  ;;  %v1078_v19 = vadd.f32 %v2425_v0, %v1077_v17 }
 0x144   : > { %v1412_v56 = vsel %vm1278_vm0, %v1410_v31, %v1411_v46  ;;  %v1416_v61 = vmax.f32 %v1197_v39, %v1411_v46  ;;  %v2190_v3 = vpop.f32.mrb[38].mxu1  ;;  %1934 = vst.msk [vmem:[%s2526_s13 + $0x10] sm:$0xf] %vm1322_vm3, %v1993_v33  ;;  %1936 = vst [vmem:[%s2526_s13 + $0x14] sm:$0x7] %v1406_v59  ;;  %v1679_v6 = vsel %vm2541_vm4, %v2008_v55, %v1970_v51  ;;  %v872_v10 = vpop.f32.mrb[39].mxu0 }
 0x145   : > { %v1415_v7 = vmax.f32 %v1196_v15, %v1412_v56  ;;  %v1685_v8 = vsel %vm1278_vm0, %v1683_v38, %v1684_v47  ;;  %v1689_v9 = vmax.f32 %v1253_v44, %v1684_v47  ;;  %v1096_v60 = vpop.f32.mrb[39].mxu1  ;;  %1969 = vst.msk [vmem:[%s2526_s13 + $0x48] sm:$0xf] %vm1322_vm3, %v2007_v20  ;;  %1971 = vst [vmem:[%s2526_s13 + $0x4c] sm:$0x7] %v1679_v6  ;;  %v1200_v53 = vmax.f32 %v2724_v48, 0.0 }
 0x146   : > { %v2738_v12 = vmax.f32 %v1416_v61, %v1199_v22  ;;  %v1688_v13 = vmax.f32 %v1252_v4, %v1685_v8  ;;  %v1202_v21 = vmax.f32 %v2716_v42, 0.0  ;;  %v1258_v63 = vmax.f32 %v2721_v29, 0.0 }
 0x147   : > { %v2744_v16 = vmax.f32 %v1415_v7, %v1198_v11  ;;  %v2746_v15 = vmax.f32 %v1689_v9, %v1255_v26  ;;  %v1256_v22 = vmax.f32 %v1078_v19, 0.0  ;;  %v865_v17 = vadd.f32 %v2690_v18, %v2425_v0 }
 0x148   : > { %v1431_v14 = vmax.f32 %v2700_v25, %v2738_v12  ;;  %v2754_v4 = vmax.f32 %v1688_v13, %v1254_v58  ;;  %v1421_v26 = vrot.slane %v1200_v53, 1  ;;  %v1089_v31 = vadd.f32 %v2692_v62, %v2425_v0 }
 0x149   : > { %v1430_v5 = vmax.f32 %v2704_v27, %v2744_v16  ;;  %v1704_v11 = vmax.f32 %v2706_v30, %v2746_v15  ;;  %v1694_v35 = vrot.slane %v1256_v22, 1  ;;  %v857_v58 = vadd.f32 %v2425_v0, %v2696_v23  ;;  %v2137_v32 = vpop.f32.mrb[40].mxu0 }
 0x14a   : > { %v1703_v25 = vmax.f32 %v2710_v37, %v2754_v4  ;;  %v1081_v18 = vadd.f32 %v2425_v0, %v2698_v24  ;;  %v2193_v36 = vpop.f32.mrb[40].mxu1  ;;  %v2771_v27 = vadd.f32 %v2133_v43, %v2425_v0  ;;  %v2774_v30 = vadd.f32 %v2189_v54, %v2425_v0  ;;  %v2780_v37 = vpop.f32.mrb[41].mxu0 }
 0x14b   : > { %v870_v62 = vadd.f32 %v2425_v0, %v869_v1  ;;  %v2778_v38 = vadd.f32 %v2425_v0, %v1093_v2  ;;  %v2782_v39 = vpop.f32.mrb[41].mxu1  ;;  %v1201_v23 = vmax.f32 %v857_v58, 0.0  ;;  %v881_v24 = vadd.f32 %v2134_v57, %v2425_v0  ;;  %v2788_v50 = vpop.f32.mrb[42].mxu0 }
 0x14c   : > { %v1257_v40 = vmax.f32 %v1081_v18, 0.0  ;;  %v2786_v41 = vadd.f32 %v2190_v3, %v2425_v0  ;;  %v2790_v44 = vpop.f32.mrb[42].mxu1  ;;  %v1203_v42 = vmax.f32 %v865_v17, 0.0  ;;  %v1259_v52 = vmax.f32 %v1089_v31, 0.0  ;;  %v2794_v46 = vpop.f32.mrb[43].mxu0 }
 0x14d   : > { %v1206_v34 = vmax.f32 %v2771_v27, 0.0  ;;  %v1262_v51 = vmax.f32 %v2774_v30, 0.0  ;;  %v2796_v29 = vpop.f32.mrb[43].mxu1  ;;  %v1422_v43 = vrot.slane %v1201_v23, 1  ;;  %v1204_v33 = vmax.f32 %v870_v62, 0.0 }
 0x14e   : > { %v1695_v54 = vrot.slane %v1257_v40, 1  ;;  %v1260_v55 = vmax.f32 %v2778_v38, 0.0  ;;  %v1207_v47 = vmax.f32 %v881_v24, 0.0  ;;  %v1263_v48 = vmax.f32 %v2786_v41, 0.0  ;;  %v1940_v18 = vld [vmem:[%s2526_s13 + $0x1c] sm:$0x7] }
 0x14f   : > { %v873_v1 = vadd.f32 %v2425_v0, %v872_v10  ;;  %v1097_v2 = vadd.f32 %v2425_v0, %v1096_v60  ;;  %v1423_v59 = vsel %vm1278_vm0, %v1421_v26, %v1422_v43  ;;  %v1427_v20 = vmax.f32 %v1201_v23, %v1422_v43  ;;  %v1975_v30 = vld [vmem:[%s2526_s13 + $0x54] sm:$0x7] }
 0x150   : > { %v1696_v56 = vsel %vm1278_vm0, %v1694_v35, %v1695_v54  ;;  %v1700_v61 = vmax.f32 %v1257_v40, %v1695_v54  ;;  %v1426_v57 = vmax.f32 %v1200_v53, %v1423_v59  ;;  %v1449_v12 = vrot.slane %v1204_v33, 1 }
 0x151   : > { %v1699_v3 = vmax.f32 %v1256_v22, %v1696_v56  ;;  %v1205_v6 = vmax.f32 %v873_v1, 0.0  ;;  %v1261_v7 = vmax.f32 %v1097_v2, 0.0  ;;  %v2804_v8 = vmax.f32 %v1427_v20, %v1203_v42  ;;  %v2141_v10 = vpop.f32.mrb[44].mxu0 }
 0x152   : > { %v2806_v9 = vmax.f32 %v1700_v61, %v1259_v52  ;;  %v1722_v13 = vrot.slane %v1260_v55, 1  ;;  %v2808_v19 = vpop.f32.mrb[44].mxu1  ;;  %v2810_v60 = vmax.f32 %v1426_v57, %v1202_v21  ;;  %v2814_v4 = vpop.f32.mrb[45].mxu0  ;;  %v2819_v31 = vadd.f32 %v2137_v32, %v2425_v0 }
 0x153   : > { %v2812_v16 = vmax.f32 %v1699_v3, %v1258_v63  ;;  %v1450_v15 = vrot.slane %v1205_v6, 1  ;;  %v1723_v53 = vrot.slane %v1261_v7, 1  ;;  %v1125_v22 = vpop.f32.mrb[45].mxu1  ;;  %v1433_v17 = vmax.f32 %v1431_v14, %v2804_v8  ;;  %v2824_v58 = vpop.f32.mrb[46].mxu0 }
 0x154   : > { %v1706_v26 = vmax.f32 %v1704_v11, %v2806_v9  ;;  %v2822_v35 = vadd.f32 %v2193_v36, %v2425_v0  ;;  %v2826_v21 = vpop.f32.mrb[46].mxu1  ;;  %v1432_v63 = vmax.f32 %v1430_v5, %v2810_v60  ;;  %v2833_v32 = vpop.f32.mrb[47].mxu0  ;;  %v1110_v1 = vadd.f32 %v2425_v0, %v2782_v39 }
 0x155   : > { %v1705_v27 = vmax.f32 %v1703_v25, %v2812_v16  ;;  %v1451_v14 = vsel %vm1278_vm0, %v1449_v12, %v1450_v15  ;;  %v1455_v11 = vmax.f32 %v1205_v6, %v1450_v15  ;;  %v2835_v36 = vpop.f32.mrb[47].mxu1  ;;  %v1996_v62 = vpack.c.bf16 %v1433_v17, %v1433_v17 }
 0x156   : > { %v2010_v38 = vpack.c.bf16 %v1706_v26, %v1706_v26  ;;  %v1454_v23 = vmax.f32 %v1204_v33, %v1451_v14  ;;  %v1724_v5 = vsel %vm1278_vm0, %v1722_v13, %v1723_v53  ;;  %v1995_v40 = vpack.c.bf16 %v1432_v63, %v1432_v63 }
 0x157   : > { %v2009_v24 = vpack.c.bf16 %v1705_v27, %v1705_v27  ;;  %v2838_v25 = vmax.f32 %v1455_v11, %v1207_v47  ;;  %v1727_v41 = vmax.f32 %v1260_v55, %v1724_v5  ;;  %v1445_v42 = vsel %vm2541_vm4, %v1996_v62, %v1940_v18 }
 0x158   : > { %v1718_v52 = vsel %vm2541_vm4, %v2010_v38, %v1975_v30  ;;  %v2844_v43 = vmax.f32 %v1454_v23, %v1206_v34  ;;  %v1728_v54 = vmax.f32 %v1261_v7, %v1723_v53  ;;  %1939 = vst.msk [vmem:[%s2526_s13 + $0x18] sm:$0xf] %vm1322_vm3, %v1995_v40  ;;  %1941 = vst [vmem:[%s2526_s13 + $0x1c] sm:$0x7] %v1445_v42  ;;  %v1210_v12 = vmax.f32 %v2819_v31, 0.0 }
 0x159   : > { %1974 = vst.msk [vmem:[%s2526_s13 + $0x50] sm:$0xf] %vm1322_vm3, %v2009_v24  ;;  %1976 = vst [vmem:[%s2526_s13 + $0x54] sm:$0x7] %v1718_v52  ;;  %v1470_v33 = vmax.f32 %v2804_v8, %v2838_v25  ;;  %v2854_v47 = vmax.f32 %v1727_v41, %v1262_v51  ;;  %v886_v55 = vadd.f32 %v2425_v0, %v2780_v37  ;;  %v2866_v20 = vpop.f32.mrb[48].mxu0  ;;  %v1264_v37 = vmax.f32 %v1110_v1, 0.0 }
 0x15a   : > { %v1469_v34 = vmax.f32 %v2810_v60, %v2844_v43  ;;  %v2862_v2 = vmax.f32 %v1728_v54, %v1263_v48  ;;  %v897_v59 = vadd.f32 %v2788_v50, %v2425_v0  ;;  %v2868_v56 = vpop.f32.mrb[48].mxu1  ;;  %v889_v39 = vadd.f32 %v2425_v0, %v2794_v46  ;;  %v2874_v57 = vpop.f32.mrb[49].mxu0 }
 0x15b   : > { %v1742_v51 = vmax.f32 %v2812_v16, %v2854_v47  ;;  %v1208_v61 = vmax.f32 %v886_v55, 0.0  ;;  %v2876_v3 = vpop.f32.mrb[49].mxu1  ;;  %v1121_v50 = vadd.f32 %v2790_v44, %v2425_v0  ;;  %v1113_v6 = vadd.f32 %v2425_v0, %v2796_v29  ;;  %v2884_v7 = vpop.f32.mrb[50].mxu0  ;;  %v2900_v29 = vld [vmem:[%s3011_s2] ss:$0 sm:$0xff] }
 0x15c   : > { %v1743_v48 = vmax.f32 %v2806_v9, %v2862_v2  ;;  %v2886_v8 = vpop.f32.mrb[50].mxu1  ;;  %v1266_v46 = vmax.f32 %v2822_v35, 0.0  ;;  %v1209_v13 = vmax.f32 %v889_v39, 0.0  ;;  %v2891_v15 = vadd.f32 %v2141_v10, %v2425_v0  ;;  %v2893_v53 = vpop.f32.mrb[51].mxu0 }
 0x15d   : > { %v2895_v9 = vpop.f32.mrb[51].mxu1  ;;  %v1733_v44 = vrot.slane %v1264_v37, 1  ;;  %v1265_v17 = vmax.f32 %v1113_v6, 0.0  ;;  %v2904_v26 = vadd.f32 %v2900_v29, %v2808_v19  ;;  %v2907_v31 = vadd.f32 %v2900_v29, %v1125_v22 }
 0x15e   : > { %v1460_v0 = vrot.slane %v1208_v61, 1  ;;  %v1211_v10 = vmax.f32 %v897_v59, 0.0  ;;  %v1461_v35 = vrot.slane %v1209_v13, 1  ;;  %v902_v63 = vadd.f32 %v2900_v29, %v2814_v4 }
 0x15f   : > { %v1267_v18 = vmax.f32 %v1121_v50, 0.0  ;;  %v1734_v27 = vrot.slane %v1265_v17, 1  ;;  %v1214_v30 = vmax.f32 %v2891_v15, 0.0  ;;  %v913_v14 = vadd.f32 %v2900_v29, %v2824_v58  ;;  %v1945_v15 = vld [vmem:[%s2526_s13 + $0x24] sm:$0x7] }
 0x160   : > { %v1462_v11 = vsel %vm1278_vm0, %v1460_v0, %v1461_v35  ;;  %v1466_v19 = vmax.f32 %v1209_v13, %v1461_v35  ;;  %v1270_v62 = vmax.f32 %v2904_v26, 0.0  ;;  %v1137_v22 = vadd.f32 %v2900_v29, %v2826_v21 }
 0x161   : > { %v1465_v38 = vmax.f32 %v1208_v61, %v1462_v11  ;;  %v1735_v23 = vsel %vm1278_vm0, %v1733_v44, %v1734_v27  ;;  %v1739_v5 = vmax.f32 %v1265_v17, %v1734_v27  ;;  %v1268_v4 = vmax.f32 %v2907_v31, 0.0  ;;  %v2920_v40 = vpop.f32.mrb[52].mxu0 }
 0x162   : > { %v2205_v24 = vpop.f32.mrb[52].mxu1  ;;  %v2922_v25 = vmax.f32 %v1466_v19, %v1211_v10  ;;  %v1738_v58 = vmax.f32 %v1264_v37, %v1735_v23  ;;  %v1212_v41 = vmax.f32 %v902_v63, 0.0  ;;  %v905_v42 = vadd.f32 %v2900_v29, %v2833_v32  ;;  %v933_v52 = vpop.f32.mrb[53].mxu0 }
 0x163   : > { %v1157_v54 = vpop.f32.mrb[53].mxu1  ;;  %v2926_v21 = vmax.f32 %v1465_v38, %v1210_v12  ;;  %v2928_v55 = vmax.f32 %v1739_v5, %v1267_v18  ;;  %v1215_v1 = vmax.f32 %v913_v14, 0.0  ;;  %v1129_v2 = vadd.f32 %v2900_v29, %v2835_v36  ;;  %v2150_v59 = vpop.f32.mrb[54].mxu0 }
 0x164   : > { %v2206_v61 = vpop.f32.mrb[54].mxu1  ;;  %v1472_v37 = vmax.f32 %v1470_v33, %v2922_v25  ;;  %v2933_v39 = vmax.f32 %v1738_v58, %v1266_v46  ;;  %v1271_v50 = vmax.f32 %v1137_v22, 0.0  ;;  %v1213_v32 = vmax.f32 %v905_v42, 0.0  ;;  %v936_v6 = vpop.f32.mrb[55].mxu0  ;;  %v1980_v46 = vld [vmem:[%s2526_s13 + $0x5c] sm:$0x7] }
 0x165   : > { %v1159_v13 = vpop.f32.mrb[55].mxu1  ;;  %v1471_v12 = vmax.f32 %v1469_v34, %v2926_v21  ;;  %v1745_v44 = vmax.f32 %v1743_v48, %v2928_v55  ;;  %v1761_v36 = vrot.slane %v1268_v4, 1  ;;  %v1269_v17 = vmax.f32 %v1129_v2, 0.0 }
 0x166   : > { %v1998_v26 = vpack.c.bf16 %v1472_v37, %v1472_v37  ;;  %v1744_v33 = vmax.f32 %v1742_v51, %v2933_v39  ;;  %v1488_v31 = vrot.slane %v1212_v41, 1  ;;  %v1489_v0 = vrot.slane %v1213_v32, 1 }
 0x167   : > { %v1997_v60 = vpack.c.bf16 %v1471_v12, %v1471_v12  ;;  %v2012_v43 = vpack.c.bf16 %v1745_v44, %v1745_v44  ;;  %v1762_v34 = vrot.slane %v1269_v17, 1  ;;  %v918_v48 = vadd.f32 %v2900_v29, %v2874_v57 }
 0x168   : > { %v1484_v10 = vsel %vm2541_vm4, %v1998_v26, %v1945_v15  ;;  %v2011_v35 = vpack.c.bf16 %v1744_v33, %v1744_v33  ;;  %v1490_v63 = vsel %vm1278_vm0, %v1488_v31, %v1489_v0  ;;  %v1494_v18 = vmax.f32 %v1213_v32, %v1489_v0 }
 0x169   : > { %1944 = vst.msk [vmem:[%s2526_s13 + $0x20] sm:$0xf] %vm1322_vm3, %v1997_v60  ;;  %1946 = vst [vmem:[%s2526_s13 + $0x24] sm:$0x7] %v1484_v10  ;;  %v1757_v16 = vsel %vm2541_vm4, %v2012_v43, %v1980_v46  ;;  %v1493_v47 = vmax.f32 %v1212_v41, %v1490_v63  ;;  %v1763_v51 = vsel %vm1278_vm0, %v1761_v36, %v1762_v34 }
 0x16a   : > { %v1767_v27 = vmax.f32 %v1269_v17, %v1762_v34  ;;  %1979 = vst.msk [vmem:[%s2526_s13 + $0x58] sm:$0xf] %vm1322_vm3, %v2011_v35  ;;  %1981 = vst [vmem:[%s2526_s13 + $0x5c] sm:$0x7] %v1757_v16  ;;  %v1496_v57 = vmax.f32 %v1494_v18, %v1215_v1  ;;  %v1766_v14 = vmax.f32 %v1268_v4, %v1763_v51  ;;  %v1216_v4 = vmax.f32 %v918_v48, 0.0 }
 0x16b   : > { %v1142_v11 = vadd.f32 %v2900_v29, %v2876_v3  ;;  %v1495_v19 = vmax.f32 %v1493_v47, %v1214_v30  ;;  %v926_v5 = vadd.f32 %v2900_v29, %v2866_v20  ;;  %v1150_v42 = vadd.f32 %v2900_v29, %v2868_v56  ;;  %v1950_v18 = vld [vmem:[%s2526_s13 + $0x2c] sm:$0x7]  ;;  %v1985_v47 = vld [vmem:[%s2526_s13 + $0x64] sm:$0x7] }
 0x16c   : > { %v1769_v22 = vmax.f32 %v1767_v27, %v1271_v50  ;;  %v1509_v38 = vmax.f32 %v2922_v25, %v1496_v57  ;;  %v1768_v23 = vmax.f32 %v1766_v14, %v1270_v62  ;;  %v1153_v3 = vadd.f32 %v2900_v29, %v2886_v8 }
 0x16d   : > { %v1272_v24 = vmax.f32 %v1142_v11, 0.0  ;;  %v1508_v58 = vmax.f32 %v2926_v21, %v1495_v19  ;;  %v921_v30 = vadd.f32 %v2900_v29, %v2893_v53  ;;  %v1145_v20 = vadd.f32 %v2900_v29, %v2895_v9 }
 0x16e   : > { %v1782_v41 = vmax.f32 %v2928_v55, %v1769_v22  ;;  %v1781_v54 = vmax.f32 %v2933_v39, %v1768_v23  ;;  %v929_v62 = vadd.f32 %v2900_v29, %v2884_v7  ;;  %v934_v25 = vadd.f32 %v2900_v29, %v933_v52 }
 0x16f   : > { %v945_v21 = vadd.f32 %v2900_v29, %v2150_v59  ;;  %v937_v56 = vadd.f32 %v2900_v29, %v936_v6  ;;  %v1218_v55 = vmax.f32 %v926_v5, 0.0  ;;  %v1772_v1 = vrot.slane %v1272_v24, 1 }
 0x170   : > { %v1217_v2 = vmax.f32 %v921_v30, 0.0  ;;  %v1273_v61 = vmax.f32 %v1145_v20, 0.0  ;;  %v1274_v8 = vmax.f32 %v1150_v42, 0.0  ;;  %v1499_v37 = vrot.slane %v1216_v4, 1 }
 0x171   : > { %v1220_v39 = vmax.f32 %v934_v25, 0.0  ;;  %v1221_v53 = vmax.f32 %v937_v56, 0.0  ;;  %v1275_v50 = vmax.f32 %v1153_v3, 0.0  ;;  %v942_v7 = vadd.f32 %v2900_v29, %v2920_v40 }
 0x172   : > { %v1500_v32 = vrot.slane %v1217_v2, 1  ;;  %v1773_v9 = vrot.slane %v1273_v61, 1  ;;  %v1219_v13 = vmax.f32 %v929_v62, 0.0  ;;  %v1223_v12 = vmax.f32 %v945_v21, 0.0 }
 0x173   : > { %v1527_v52 = vrot.slane %v1220_v39, 1  ;;  %v1528_v59 = vrot.slane %v1221_v53, 1  ;;  %v1222_v29 = vmax.f32 %v942_v7, 0.0 }
 0x174   : > { %v1501_v6 = vsel %vm1278_vm0, %v1499_v37, %v1500_v32  ;;  %v1505_v15 = vmax.f32 %v1217_v2, %v1500_v32  ;;  %v1774_v44 = vsel %vm1278_vm0, %v1772_v1, %v1773_v9  ;;  %v1778_v36 = vmax.f32 %v1273_v61, %v1773_v9 }
 0x175   : > { %v1504_v17 = vmax.f32 %v1216_v4, %v1501_v6  ;;  %v1777_v26 = vmax.f32 %v1272_v24, %v1774_v44  ;;  %v1529_v33 = vsel %vm1278_vm0, %v1527_v52, %v1528_v59  ;;  %v1533_v46 = vmax.f32 %v1221_v53, %v1528_v59  ;;  %v1955_v24 = vld [vmem:[%s2526_s13 + $0x34] sm:$0x7] }
 0x176   : > { %v1507_v31 = vmax.f32 %v1505_v15, %v1219_v13  ;;  %v1780_v0 = vmax.f32 %v1778_v36, %v1275_v50  ;;  %v1532_v40 = vmax.f32 %v1220_v39, %v1529_v33 }
 0x177   : > { %v1506_v60 = vmax.f32 %v1504_v17, %v1218_v55  ;;  %v1779_v43 = vmax.f32 %v1777_v26, %v1274_v8  ;;  %v1535_v34 = vmax.f32 %v1533_v46, %v1223_v12 }
 0x178   : > { %v1511_v48 = vmax.f32 %v1509_v38, %v1507_v31  ;;  %v1784_v10 = vmax.f32 %v1782_v41, %v1780_v0  ;;  %v1534_v35 = vmax.f32 %v1532_v40, %v1222_v29 }
 0x179   : > { %v1510_v63 = vmax.f32 %v1508_v58, %v1506_v60  ;;  %v1783_v16 = vmax.f32 %v1781_v54, %v1779_v43  ;;  %v1548_v51 = vmax.f32 %v1507_v31, %v1535_v34 }
 0x17a   : > { %v2000_v27 = vpack.c.bf16 %v1511_v48, %v1511_v48  ;;  %v2014_v57 = vpack.c.bf16 %v1784_v10, %v1784_v10  ;;  %v1547_v14 = vmax.f32 %v1506_v60, %v1534_v35 }
 0x17b   : > { %v1999_v11 = vpack.c.bf16 %v1510_v63, %v1510_v63  ;;  %v2013_v19 = vpack.c.bf16 %v1783_v16, %v1783_v16  ;;  %v1550_v22 = vmax.f32 %v1548_v51, %v2440_v45 }
 0x17c   : > { %v1523_v38 = vsel %vm2541_vm4, %v2000_v27, %v1950_v18  ;;  %v1796_v23 = vsel %vm2541_vm4, %v2014_v57, %v1985_v47  ;;  %v1549_v5 = vmax.f32 %v1547_v14, %v2446_v49 }
 0x17d   : > { %1949 = vst.msk [vmem:[%s2526_s13 + $0x28] sm:$0xf] %vm1322_vm3, %v1999_v11  ;;  %1951 = vst [vmem:[%s2526_s13 + $0x2c] sm:$0x7] %v1523_v38  ;;  %v2002_v58 = vpack.c.bf16 %v1550_v22, %v1550_v22 }
 0x17e   : > { %1984 = vst.msk [vmem:[%s2526_s13 + $0x60] sm:$0xf] %vm1322_vm3, %v2013_v19  ;;  %1986 = vst [vmem:[%s2526_s13 + $0x64] sm:$0x7] %v1796_v23  ;;  %v2001_v41 = vpack.c.bf16 %v1549_v5, %v1549_v5 }
 0x17f   : > { %v1562_v45 = vsel %vm2541_vm4, %v2002_v58, %v1955_v24 }
 0x180   : > { %1954 = vst.msk [vmem:[%s2526_s13 + $0x30] sm:$0xf] %vm1322_vm3, %v2001_v41  ;;  %1956 = vst [vmem:[%s2526_s13 + $0x34] sm:$0x7] %v1562_v45 }
 0x181 PF: > { %s13_s12 = sadd.s32 1, %s2304_s12  }
 0x182   : > { %p10_p4 = scmp.ge.s32.totalorder %s13_s12, 4  }
 0x184   :  { %12 = sbr.rel (!%p10_p4) target bundleno = 1 (0x1), region = 74 }

// kernel: cnn_forward.5
= control target key start
LH: loop header
LB: loop body
LE: loop exit
PB: predicated region body
PF: predicated region fallthrough
CT: control target
= control target key end

     0   :  { %s3924_s1 = inlined_call_operand.vmem [shape: bf16[1024,384], index: 1, kind: input, shape index: {}]   ;;  %s3925_s0 = inlined_call_operand.vmem [shape: bf16[16,1024], index: 0, kind: input, shape index: {}]   ;;  %s3926_s3 = inlined_call_operand.vmem [shape: bf16[384,256], index: 3, kind: input, shape index: {}]   ;;  %s3927_s2 = inlined_call_operand.vmem [shape: f32[1,384], index: 2, kind: input, shape index: {}]   ;;  %s3928_s5 = inlined_call_operand.vmem [shape: bf16[256,128], index: 5, kind: input, shape index: {}]   ;;  %s3929_s4 = inlined_call_operand.vmem [shape: f32[1,256], index: 4, kind: input, shape index: {}]   ;;  %s3930_s6 = inlined_call_operand.vmem [shape: f32[1,128], index: 6, kind: input, shape index: {}]   ;;  %s3931_s7 = inlined_call_operand.vmem [shape: f32[16,128], index: 7, kind: output, shape index: {}]  }
   0x1   :  { %v2691_v0 = vld [vmem:[%s3924_s1 + $0x4] ss:$12 sps:$4 sm:$0xff]   ;;  %v2693_v1 = vld [vmem:[%s3924_s1] ss:$12 sps:$4 sm:$0xff]   ;;  %v2694_v2 = vld [vmem:[%s3924_s1 + $0x1c] ss:$12 sps:$4 sm:$0xff]  }
   0x2   :  { %1372 = vmatprep.subr.bf16.mxu0 %v2691_v0  ;;  %v2696_v3 = vld [vmem:[%s3924_s1 + $0x18] ss:$12 sps:$4 sm:$0xff]   ;;  %v2697_v4 = vld [vmem:[%s3924_s1 + $0x34] ss:$12 sps:$4 sm:$0xff]   ;;  %v2699_v5 = vld [vmem:[%s3924_s1 + $0x30] ss:$12 sps:$4 sm:$0xff]  }
   0x3   :  { %1373 = vmatpush1.bf16.msra.mxu0 %v2693_v1  ;;  %v2700_v6 = vld [vmem:[%s3924_s1 + $0x4c] ss:$12 sps:$4 sm:$0xff]   ;;  %v2702_v7 = vld [vmem:[%s3924_s1 + $0x48] ss:$12 sps:$4 sm:$0xff]   ;;  %v2703_v8 = vld [vmem:[%s3924_s1 + $0x64] ss:$12 sps:$4 sm:$0xff]  }
   0x4   :  { %1374 = vmatprep.subr.bf16.mxu0 %v2694_v2  ;;  %v2705_v9 = vld [vmem:[%s3924_s1 + $0x60] ss:$12 sps:$4 sm:$0xff]   ;;  %v2706_v10 = vld [vmem:[%s3924_s1 + $0x7c] ss:$12 sps:$4 sm:$0xff]   ;;  %v2708_v11 = vld [vmem:[%s3924_s1 + $0x78] ss:$12 sps:$4 sm:$0xff]  }
   0x5   :  { %v2709_v12 = vld [vmem:[%s3924_s1 + $0x94] ss:$12 sps:$4 sm:$0xff]   ;;  %v2711_v15 = vld [vmem:[%s3924_s1 + $0x90] ss:$12 sps:$4 sm:$0xff]   ;;  %v2712_v17 = vld [vmem:[%s3924_s1 + $0xac] ss:$12 sps:$4 sm:$0xff]  }
   0x6   :  { %v3118_v13 = vld [vmem:[%s3925_s0] sm:$0xff]  ;;  %v2742_v18 = vld [vmem:[%s3924_s1 + $0xc8] ss:$12 sps:$4 sm:$0xff]   ;;  %v2757_v29 = vld [vmem:[%s3924_s1 + $0x110] ss:$12 sps:$4 sm:$0xff]  }
   0x7   :  { %1375 = vmatpush1.bf16.msra.mxu0 %v2696_v3  ;;  %v3123_v14 = vld [vmem:[%s3925_s0 + $0x20] sm:$0xff]  ;;  %v2743_v19 = vld [vmem:[%s3924_s1 + $0x8] ss:$12 sps:$4 sm:$0xff]   ;;  %2556 = vmatprep.subr.bf16.mxu1 %v2742_v18  ;;  %v2758_v30 = vld [vmem:[%s3924_s1 + $0x50] ss:$12 sps:$4 sm:$0xff]  }
   0x8   :  { %1376 = vmatprep.subr.bf16.mxu0 %v2697_v4  ;;  %v2292_v16 = vcombine.high %v3118_v13, %v3123_v14  ;;  %v2714_v20 = vld [vmem:[%s3924_s1 + $0xa8] ss:$12 sps:$4 sm:$0xff]   ;;  %v2715_v21 = vld [vmem:[%s3924_s1 + $0xc4] ss:$12 sps:$4 sm:$0xff]   ;;  %2557 = vmatpush3.bf16.msra.mxu1 %v2743_v19  ;;  %v2747_v22 = vld [vmem:[%s3924_s1 + $0xe0] ss:$12 sps:$4 sm:$0xff]   ;;  %v2291_v52 = vcombine.low %v3118_v13, %v3123_v14 }
   0x9   :  { %v2748_v23 = vld [vmem:[%s3924_s1 + $0x20] ss:$12 sps:$4 sm:$0xff]   ;;  %2558 = vmatprep.subr.bf16.mxu1 %v2747_v22  ;;  %v2752_v25 = vld [vmem:[%s3924_s1 + $0xf8] ss:$12 sps:$4 sm:$0xff]   ;;  %v2718_v27 = vld [vmem:[%s3924_s1 + $0xdc] ss:$12 sps:$4 sm:$0xff]  }
   0xa   :  { %1404 = vmatprep.mubr.bf16.mxu0 %v2292_v16  ;;  %1576 = vmatprep.mubr.bf16.mxu1 %v2292_v16  ;;  %v2717_v24 = vld [vmem:[%s3924_s1 + $0xc0] ss:$12 sps:$4 sm:$0xff]   ;;  %v2753_v26 = vld [vmem:[%s3924_s1 + $0x38] ss:$12 sps:$4 sm:$0xff]   ;;  %v2762_v32 = vld [vmem:[%s3924_s1 + $0x128] ss:$12 sps:$4 sm:$0xff]  }
   0xb   :  { %1377 = vmatpush1.bf16.msra.mxu0 %v2699_v5  ;;  %v2720_v28 = vld [vmem:[%s3924_s1 + $0xd8] ss:$12 sps:$4 sm:$0xff]   ;;  %v2721_v31 = vld [vmem:[%s3924_s1 + $0xf4] ss:$12 sps:$4 sm:$0xff]   ;;  %v2723_v33 = vld [vmem:[%s3924_s1 + $0xf0] ss:$12 sps:$4 sm:$0xff]  }
   0xc   :  { %1378 = vmatprep.subr.bf16.mxu0 %v2700_v6  ;;  %2559 = vmatpush3.bf16.msra.mxu1 %v2748_v23  ;;  %v2724_v34 = vld [vmem:[%s3924_s1 + $0x10c] ss:$12 sps:$4 sm:$0xff]   ;;  %v2763_v35 = vld [vmem:[%s3924_s1 + $0x68] ss:$12 sps:$4 sm:$0xff]   ;;  %v2727_v38 = vld [vmem:[%s3924_s1 + $0x124] ss:$12 sps:$4 sm:$0xff]  }
   0xd   :  { %2560 = vmatprep.subr.bf16.mxu1 %v2752_v25  ;;  %v2767_v36 = vld [vmem:[%s3924_s1 + $0x140] ss:$12 sps:$4 sm:$0xff]   ;;  %v2726_v37 = vld [vmem:[%s3924_s1 + $0x108] ss:$12 sps:$4 sm:$0xff]   ;;  %v2772_v40 = vld [vmem:[%s3924_s1 + $0x158] ss:$12 sps:$4 sm:$0xff]  }
   0xe   :  { %v2768_v39 = vld [vmem:[%s3924_s1 + $0x80] ss:$12 sps:$4 sm:$0xff]   ;;  %v2730_v42 = vld [vmem:[%s3924_s1 + $0x13c] ss:$12 sps:$4 sm:$0xff]   ;;  %v2773_v43 = vld [vmem:[%s3924_s1 + $0x98] ss:$12 sps:$4 sm:$0xff]  }
   0xf   :  { %1379 = vmatpush1.bf16.msra.mxu0 %v2702_v7  ;;  %v2729_v41 = vld [vmem:[%s3924_s1 + $0x120] ss:$12 sps:$4 sm:$0xff]   ;;  %v2777_v44 = vld [vmem:[%s3924_s1 + $0x170] ss:$12 sps:$4 sm:$0xff]   ;;  %v2732_v45 = vld [vmem:[%s3924_s1 + $0x138] ss:$12 sps:$4 sm:$0xff]  }
  0x10   :  { %1380 = vmatprep.subr.bf16.mxu0 %v2703_v8  ;;  %2561 = vmatpush3.bf16.msra.mxu1 %v2753_v26  ;;  %v2733_v46 = vld [vmem:[%s3924_s1 + $0x154] ss:$12 sps:$4 sm:$0xff]   ;;  %v2778_v47 = vld [vmem:[%s3924_s1 + $0xb0] ss:$12 sps:$4 sm:$0xff]   ;;  %v2736_v51 = vld [vmem:[%s3924_s1 + $0x16c] ss:$12 sps:$4 sm:$0xff]  }
  0x11   :  { %2562 = vmatprep.subr.bf16.mxu1 %v2757_v29  ;;  %v2782_v48 = vld [vmem:[%s3924_s1 + $0x248] ss:$12 sps:$4 sm:$0xff]   ;;  %v2735_v49 = vld [vmem:[%s3924_s1 + $0x150] ss:$12 sps:$4 sm:$0xff]   ;;  %v2787_v53 = vld [vmem:[%s3924_s1 + $0x260] ss:$12 sps:$4 sm:$0xff]  }
  0x12   :  { %v2783_v50 = vld [vmem:[%s3924_s1 + $0x188] ss:$12 sps:$4 sm:$0xff]   ;;  %v2741_v55 = vld [vmem:[%s3924_s1 + $0x184] ss:$12 sps:$4 sm:$0xff]   ;;  %v2788_v56 = vld [vmem:[%s3924_s1 + $0x1a0] ss:$12 sps:$4 sm:$0xff]  }
  0x13   :  { %1381 = vmatpush1.bf16.msra.mxu0 %v2705_v9  ;;  %v2738_v54 = vld [vmem:[%s3924_s1 + $0x168] ss:$12 sps:$4 sm:$0xff]   ;;  %v2792_v57 = vld [vmem:[%s3924_s1 + $0x278] ss:$12 sps:$4 sm:$0xff]   ;;  %v2739_v58 = vld [vmem:[%s3924_s1 + $0x180] ss:$12 sps:$4 sm:$0xff]  }
  0x14   :  { %1382 = vmatprep.subr.bf16.mxu0 %v2706_v10  ;;  %2563 = vmatpush3.bf16.msra.mxu1 %v2758_v30  ;;  %v2746_v59 = vld [vmem:[%s3924_s1 + $0x19c] ss:$12 sps:$4 sm:$0xff]   ;;  %v2793_v60 = vld [vmem:[%s3924_s1 + $0x1b8] ss:$12 sps:$4 sm:$0xff]   ;;  %v2751_v63 = vld [vmem:[%s3924_s1 + $0x1b4] ss:$12 sps:$4 sm:$0xff]  }
  0x15   :  { %2564 = vmatprep.subr.bf16.mxu1 %v2762_v32  ;;  %v2797_v61 = vld [vmem:[%s3924_s1 + $0x290] ss:$12 sps:$4 sm:$0xff]   ;;  %v2744_v62 = vld [vmem:[%s3924_s1 + $0x198] ss:$12 sps:$4 sm:$0xff]   ;;  %v2802_v1 = vld [vmem:[%s3924_s1 + $0x2a8] ss:$12 sps:$4 sm:$0xff]  }
  0x16   :  { %v2798_v0 = vld [vmem:[%s3924_s1 + $0x1d0] ss:$12 sps:$4 sm:$0xff]   ;;  %v2756_v3 = vld [vmem:[%s3924_s1 + $0x1cc] ss:$12 sps:$4 sm:$0xff]   ;;  %v2803_v4 = vld [vmem:[%s3924_s1 + $0x1e8] ss:$12 sps:$4 sm:$0xff]  }
  0x17   :  { %1383 = vmatpush1.bf16.msra.mxu0 %v2708_v11  ;;  %v2749_v2 = vld [vmem:[%s3924_s1 + $0x1b0] ss:$12 sps:$4 sm:$0xff]   ;;  %v2807_v5 = vld [vmem:[%s3924_s1 + $0x2c0] ss:$12 sps:$4 sm:$0xff]   ;;  %v2754_v6 = vld [vmem:[%s3924_s1 + $0x1c8] ss:$12 sps:$4 sm:$0xff]  }
  0x18   :  { %1384 = vmatprep.subr.bf16.mxu0 %v2709_v12  ;;  %2565 = vmatpush3.bf16.msra.mxu1 %v2763_v35  ;;  %v2761_v7 = vld [vmem:[%s3924_s1 + $0x1e4] ss:$12 sps:$4 sm:$0xff]   ;;  %v2808_v8 = vld [vmem:[%s3924_s1 + $0x200] ss:$12 sps:$4 sm:$0xff]   ;;  %v2823_v23 = vld [vmem:[%s3924_s1 + $0x308] ss:$12 sps:$4 sm:$0xff]  }
  0x19   :  { %2566 = vmatprep.subr.bf16.mxu1 %v2767_v36  ;;  %v28_v9 = vld [vmem:[%s3925_s0 + $0x8] sm:$0xff]  ;;  %v2812_v11 = vld [vmem:[%s3924_s1 + $0x2d8] ss:$12 sps:$4 sm:$0xff]   ;;  %v2817_v16 = vld [vmem:[%s3924_s1 + $0x2f0] ss:$12 sps:$4 sm:$0xff]  }
  0x1a   :  { %v32_v10 = vld [vmem:[%s3925_s0 + $0x28] sm:$0xff]  ;;  %v2813_v14 = vld [vmem:[%s3924_s1 + $0x218] ss:$12 sps:$4 sm:$0xff]   ;;  %v2771_v18 = vld [vmem:[%s3924_s1 + $0x214] ss:$12 sps:$4 sm:$0xff]  }
  0x1b   :  { %1385 = vmatpush1.bf16.msra.mxu0 %v2711_v15  ;;  %v2294_v12 = vcombine.high %v28_v9, %v32_v10  ;;  %v2759_v13 = vld [vmem:[%s3924_s1 + $0x1e0] ss:$12 sps:$4 sm:$0xff]   ;;  %v2766_v15 = vld [vmem:[%s3924_s1 + $0x1fc] ss:$12 sps:$4 sm:$0xff]   ;;  %v2832_v29 = vld [vmem:[%s3924_s1 + $0x3f8] ss:$12 sps:$4 sm:$0xff]  }
  0x1c   :  { %1386 = vmatprep.subr.bf16.mxu0 %v2712_v17  ;;  %2567 = vmatpush3.bf16.msra.mxu1 %v2768_v39  ;;  %v2764_v17 = vld [vmem:[%s3924_s1 + $0x1f8] ss:$12 sps:$4 sm:$0xff]   ;;  %v2818_v19 = vld [vmem:[%s3924_s1 + $0x230] ss:$12 sps:$4 sm:$0xff]   ;;  %v2827_v25 = vld [vmem:[%s3924_s1 + $0x3e0] ss:$12 sps:$4 sm:$0xff]  }
  0x1d   :  { %2568 = vmatprep.subr.bf16.mxu1 %v2772_v40  ;;  %v2776_v22 = vld [vmem:[%s3924_s1 + $0x22c] ss:$12 sps:$4 sm:$0xff]   ;;  %v2774_v26 = vld [vmem:[%s3924_s1 + $0x228] ss:$12 sps:$4 sm:$0xff]   ;;  %v2838_v35 = vld [vmem:[%s3924_s1 + $0x350] ss:$12 sps:$4 sm:$0xff]  }
  0x1e   :  { %v2779_v30 = vld [vmem:[%s3924_s1 + $0x240] ss:$12 sps:$4 sm:$0xff]   ;;  %v2833_v32 = vld [vmem:[%s3924_s1 + $0x338] ss:$12 sps:$4 sm:$0xff]   ;;  %v2843_v40 = vld [vmem:[%s3924_s1 + $0x368] ss:$12 sps:$4 sm:$0xff]  }
  0x1f   :  { %1387 = vmatpush1.bf16.msra.mxu0 %v2714_v20  ;;  %v2822_v20 = vld [vmem:[%s3924_s1 + $0x3c8] ss:$12 sps:$4 sm:$0xff]   ;;  %v2796_v39 = vld [vmem:[%s3924_s1 + $0x28c] ss:$12 sps:$4 sm:$0xff]  }
  0x20   :  { %1388 = vmatprep.subr.bf16.mxu0 %v2715_v21  ;;  %2569 = vmatpush3.bf16.msra.mxu1 %v2773_v43  ;;  %v2769_v21 = vld [vmem:[%s3924_s1 + $0x210] ss:$12 sps:$4 sm:$0xff]   ;;  %v2791_v36 = vld [vmem:[%s3924_s1 + $0x274] ss:$12 sps:$4 sm:$0xff]  }
  0x21   :  { %2570 = vmatprep.subr.bf16.mxu1 %v2777_v44  ;;  %v33_v43 = vld [vmem:[%s3925_s0 + $0x30] sm:$0xff] }
  0x23   :  { %1389 = vmatpush1.bf16.msra.mxu0 %v2717_v24  ;;  %v3339_v24 = vcombine.low %v28_v9, %v32_v10  ;;  %v30_v9 = vld [vmem:[%s3925_s0 + $0x18] sm:$0xff] }
  0x24   :  { %1390 = vmatprep.subr.bf16.mxu0 %v2718_v27  ;;  %2571 = vmatpush3.bf16.msra.mxu1 %v2778_v47  ;;  %v2781_v27 = vld [vmem:[%s3924_s1 + $0x244] ss:$12 sps:$4 sm:$0xff]   ;;  %v2848_v47 = vld [vmem:[%s3924_s1 + $0x380] ss:$12 sps:$4 sm:$0xff]   ;;  %v34_v10 = vld [vmem:[%s3925_s0 + $0x38] sm:$0xff] }
  0x25   :  { %2578 = vmatprep.subr.bf16.mxu1 %v2782_v48  ;;  %v2852_v48 = vld [vmem:[%s3924_s1 + $0x458] ss:$12 sps:$4 sm:$0xff]  }
  0x27   :  { %1391 = vmatpush1.bf16.msra.mxu0 %v2720_v28  ;;  %1577 = vmatmul.mubr.bf16.vlgmr.msra.gmra.mrb[0].mxu1 %v2291_v52  ;;  %v2828_v28 = vld [vmem:[%s3924_s1 + $0x320] ss:$12 sps:$4 sm:$0xff]  }
  0x28   :  { %1392 = vmatprep.subr.bf16.mxu0 %v2721_v31  ;;  %2579 = vmatpush3.bf16.msra.mxu1 %v2783_v50  ;;  %v2786_v31 = vld [vmem:[%s3924_s1 + $0x25c] ss:$12 sps:$4 sm:$0xff]  }
  0x29   :  { %2580 = vmatprep.subr.bf16.mxu1 %v2787_v53  ;;  %1617 = vmatprep.mubr.bf16.mxu1 %v2294_v12  ;;  %v2806_v50 = vld [vmem:[%s3924_s1 + $0x2bc] ss:$12 sps:$4 sm:$0xff]   ;;  %v2804_v53 = vld [vmem:[%s3924_s1 + $0x2b8] ss:$12 sps:$4 sm:$0xff]  }
  0x2b   :  { %1393 = vmatpush1.bf16.msra.mxu0 %v2723_v33  ;;  %v2837_v33 = vld [vmem:[%s3924_s1 + $0x410] ss:$12 sps:$4 sm:$0xff]  }
  0x2c   :  { %1394 = vmatprep.subr.bf16.mxu0 %v2724_v34  ;;  %2581 = vmatpush3.bf16.msra.mxu1 %v2788_v56  ;;  %v2784_v34 = vld [vmem:[%s3924_s1 + $0x258] ss:$12 sps:$4 sm:$0xff]   ;;  %v2862_v56 = vld [vmem:[%s3924_s1 + $0x548] ss:$12 sps:$4 sm:$0xff]  }
  0x2d   :  { %2582 = vmatprep.subr.bf16.mxu1 %v2792_v57  ;;  %v2809_v57 = vld [vmem:[%s3924_s1 + $0x2d0] ss:$12 sps:$4 sm:$0xff]  }
  0x2f   :  { %1395 = vmatpush1.bf16.msra.mxu0 %v2726_v37  ;;  %v2842_v37 = vld [vmem:[%s3924_s1 + $0x428] ss:$12 sps:$4 sm:$0xff]  }
  0x30   :  { %1396 = vmatprep.subr.bf16.mxu0 %v2727_v38  ;;  %2583 = vmatpush3.bf16.msra.mxu1 %v2793_v60  ;;  %v2789_v38 = vld [vmem:[%s3924_s1 + $0x270] ss:$12 sps:$4 sm:$0xff]   ;;  %v2863_v60 = vld [vmem:[%s3924_s1 + $0x488] ss:$12 sps:$4 sm:$0xff]  }
  0x31   :  { %2584 = vmatprep.subr.bf16.mxu1 %v2797_v61  ;;  %v2867_v61 = vld [vmem:[%s3924_s1 + $0x560] ss:$12 sps:$4 sm:$0xff]  }
  0x33   :  { %1397 = vmatpush1.bf16.msra.mxu0 %v2729_v41  ;;  %v2847_v41 = vld [vmem:[%s3924_s1 + $0x440] ss:$12 sps:$4 sm:$0xff]  }
  0x34   :  { %1398 = vmatprep.subr.bf16.mxu0 %v2730_v42  ;;  %2585 = vmatpush3.bf16.msra.mxu1 %v2798_v0  ;;  %v29_v42 = vld [vmem:[%s3925_s0 + $0x10] sm:$0xff] }
  0x35   :  { %2586 = vmatprep.subr.bf16.mxu1 %v2802_v1  ;;  %v3399_v44 = vcombine.high %v29_v42, %v33_v43  ;;  %v2821_v0 = vld [vmem:[%s3924_s1 + $0x304] ss:$12 sps:$4 sm:$0xff]  }
  0x36   :  { %v2872_v1 = vld [vmem:[%s3924_s1 + $0x578] ss:$12 sps:$4 sm:$0xff]  }
  0x37   :  { %1399 = vmatpush1.bf16.msra.mxu0 %v2732_v45  ;;  %v2794_v45 = vld [vmem:[%s3924_s1 + $0x288] ss:$12 sps:$4 sm:$0xff]  }
  0x38   :  { %1400 = vmatprep.subr.bf16.mxu0 %v2733_v46  ;;  %2587 = vmatpush3.bf16.msra.mxu1 %v2803_v4  ;;  %v2801_v46 = vld [vmem:[%s3924_s1 + $0x2a4] ss:$12 sps:$4 sm:$0xff]  }
  0x39   :  { %2588 = vmatprep.subr.bf16.mxu1 %v2807_v5  ;;  %v2873_v4 = vld [vmem:[%s3924_s1 + $0x4b8] ss:$12 sps:$4 sm:$0xff]   ;;  %v2877_v5 = vld [vmem:[%s3924_s1 + $0x590] ss:$12 sps:$4 sm:$0xff]  }
  0x3b   :  { %1401 = vmatpush1.bf16.msra.mxu0 %v2735_v49  ;;  %v2799_v49 = vld [vmem:[%s3924_s1 + $0x2a0] ss:$12 sps:$4 sm:$0xff]  }
  0x3c   :  { %1402 = vmatprep.subr.bf16.mxu0 %v2736_v51  ;;  %2589 = vmatpush3.bf16.msra.mxu1 %v2808_v8  ;;  %v2853_v51 = vld [vmem:[%s3924_s1 + $0x398] ss:$12 sps:$4 sm:$0xff]   ;;  %v2878_v8 = vld [vmem:[%s3924_s1 + $0x4d0] ss:$12 sps:$4 sm:$0xff]  }
  0x3d   :  { %2590 = vmatprep.subr.bf16.mxu1 %v2812_v11  ;;  %v2882_v11 = vld [vmem:[%s3924_s1 + $0x5a8] ss:$12 sps:$4 sm:$0xff]  }
  0x3f   :  { %1403 = vmatpush1.bf16.msra.mxu0 %v2738_v54  ;;  %v2811_v54 = vld [vmem:[%s3924_s1 + $0x2d4] ss:$12 sps:$4 sm:$0xff]  }
  0x40   :  { %1415 = vmatprep.subr.bf16.mxu0 %v2741_v55  ;;  %2591 = vmatpush3.bf16.msra.mxu1 %v2813_v14  ;;  %v2858_v55 = vld [vmem:[%s3924_s1 + $0x3b0] ss:$12 sps:$4 sm:$0xff]   ;;  %v2836_v14 = vld [vmem:[%s3924_s1 + $0x34c] ss:$12 sps:$4 sm:$0xff]  }
  0x41   :  { %2592 = vmatprep.subr.bf16.mxu1 %v2817_v16  ;;  %v2887_v16 = vld [vmem:[%s3924_s1 + $0x5c0] ss:$12 sps:$4 sm:$0xff]  }
  0x42   :  { %1405 = vmatmul.mubr.bf16.vlgmr.msra.gmra.mrb[0].mxu0 %v2291_v52  ;;  %v2857_v52 = vld [vmem:[%s3924_s1 + $0x470] ss:$12 sps:$4 sm:$0xff]  }
  0x43   :  { %1416 = vmatpush1.bf16.msra.mxu0 %v2739_v58  ;;  %1447 = vmatprep.mubr.bf16.mxu0 %v2294_v12  ;;  %v2816_v58 = vld [vmem:[%s3924_s1 + $0x2ec] ss:$12 sps:$4 sm:$0xff]   ;;  %v3496_v12 = vcombine.high %v30_v9, %v34_v10 }
  0x44   :  { %1417 = vmatprep.subr.bf16.mxu0 %v2746_v59  ;;  %2593 = vmatpush3.bf16.msra.mxu1 %v2818_v19  ;;  %v3444_v59 = vcombine.low %v29_v42, %v33_v43  ;;  %v2888_v19 = vld [vmem:[%s3924_s1 + $0x500] ss:$12 sps:$4 sm:$0xff]   ;;  %v2886_v42 = vld [vmem:[%s3924_s1 + $0x43c] ss:$12 sps:$4 sm:$0xff]   ;;  %v2884_v43 = vld [vmem:[%s3924_s1 + $0x438] ss:$12 sps:$4 sm:$0xff]  }
  0x45   :  { %2600 = vmatprep.subr.bf16.mxu1 %v2822_v20  ;;  %v2892_v20 = vld [vmem:[%s3924_s1 + $0x5d8] ss:$12 sps:$4 sm:$0xff]  }
  0x47   :  { %1418 = vmatpush1.bf16.msra.mxu0 %v2744_v62  ;;  %1618 = vmatmul.mubr.bf16.vlgmr.msra.gmra.mrb[4].mxu1 %v3339_v24  ;;  %v2814_v62 = vld [vmem:[%s3924_s1 + $0x2e8] ss:$12 sps:$4 sm:$0xff]  }
  0x48   :  { %1419 = vmatprep.subr.bf16.mxu0 %v2751_v63  ;;  %2601 = vmatpush3.bf16.msra.mxu1 %v2823_v23  ;;  %v2868_v63 = vld [vmem:[%s3924_s1 + $0x4a0] ss:$12 sps:$4 sm:$0xff]   ;;  %v2893_v23 = vld [vmem:[%s3924_s1 + $0x518] ss:$12 sps:$4 sm:$0xff]  }
  0x49   :  { %2602 = vmatprep.subr.bf16.mxu1 %v2827_v25  ;;  %1658 = vmatprep.mubr.bf16.mxu1 %v3399_v44  ;;  %v2844_v25 = vld [vmem:[%s3924_s1 + $0x378] ss:$12 sps:$4 sm:$0xff]  }
  0x4b   :  { %1420 = vmatpush1.bf16.msra.mxu0 %v2749_v2  ;;  %v2819_v2 = vld [vmem:[%s3924_s1 + $0x300] ss:$12 sps:$4 sm:$0xff]  }
  0x4c   :  { %1421 = vmatprep.subr.bf16.mxu0 %v2756_v3  ;;  %2603 = vmatpush3.bf16.msra.mxu1 %v2828_v28  ;;  %v2826_v3 = vld [vmem:[%s3924_s1 + $0x31c] ss:$12 sps:$4 sm:$0xff]   ;;  %v3545_v28 = vcombine.low %v30_v9, %v34_v10  ;;  %v2935_v9 = vld [vmem:[%s3924_s1 + $0x5a0] ss:$12 sps:$4 sm:$0xff]  }
  0x4d   :  { %2604 = vmatprep.subr.bf16.mxu1 %v2832_v29  ;;  %v2849_v29 = vld [vmem:[%s3924_s1 + $0x390] ss:$12 sps:$4 sm:$0xff]  }
  0x4e   :  { %v2940_v10 = vld [vmem:[%s3924_s1 + $0x5bc] ss:$12 sps:$4 sm:$0xff]  }
  0x4f   :  { %1422 = vmatpush1.bf16.msra.mxu0 %v2754_v6  ;;  %v2824_v6 = vld [vmem:[%s3924_s1 + $0x318] ss:$12 sps:$4 sm:$0xff]  }
  0x50   :  { %1423 = vmatprep.subr.bf16.mxu0 %v2761_v7  ;;  %2605 = vmatpush3.bf16.msra.mxu1 %v2833_v32  ;;  %v2831_v7 = vld [vmem:[%s3924_s1 + $0x334] ss:$12 sps:$4 sm:$0xff]   ;;  %v2861_v32 = vld [vmem:[%s3924_s1 + $0x3c4] ss:$12 sps:$4 sm:$0xff]  }
  0x51   :  { %2606 = vmatprep.subr.bf16.mxu1 %v2837_v33  ;;  %v2859_v33 = vld [vmem:[%s3924_s1 + $0x3c0] ss:$12 sps:$4 sm:$0xff]  }
  0x53   :  { %1424 = vmatpush1.bf16.msra.mxu0 %v2759_v13  ;;  %v2829_v13 = vld [vmem:[%s3924_s1 + $0x330] ss:$12 sps:$4 sm:$0xff]  }
  0x54   :  { %1425 = vmatprep.subr.bf16.mxu0 %v2766_v15  ;;  %2607 = vmatpush3.bf16.msra.mxu1 %v2838_v35  ;;  %v2883_v15 = vld [vmem:[%s3924_s1 + $0x4e8] ss:$12 sps:$4 sm:$0xff]   ;;  %v2864_v35 = vld [vmem:[%s3924_s1 + $0x3d8] ss:$12 sps:$4 sm:$0xff]  }
  0x55   :  { %2608 = vmatprep.subr.bf16.mxu1 %v2842_v37  ;;  %v2869_v37 = vld [vmem:[%s3924_s1 + $0x3f0] ss:$12 sps:$4 sm:$0xff]  }
  0x57   :  { %1426 = vmatpush1.bf16.msra.mxu0 %v2764_v17  ;;  %v2834_v17 = vld [vmem:[%s3924_s1 + $0x348] ss:$12 sps:$4 sm:$0xff]  }
  0x58   :  { %1427 = vmatprep.subr.bf16.mxu0 %v2771_v18  ;;  %2609 = vmatpush3.bf16.msra.mxu1 %v2843_v40  ;;  %v2841_v18 = vld [vmem:[%s3924_s1 + $0x364] ss:$12 sps:$4 sm:$0xff]  }
  0x59   :  { %2610 = vmatprep.subr.bf16.mxu1 %v2847_v41  ;;  %v2881_v40 = vld [vmem:[%s3924_s1 + $0x424] ss:$12 sps:$4 sm:$0xff]   ;;  %v2879_v41 = vld [vmem:[%s3924_s1 + $0x420] ss:$12 sps:$4 sm:$0xff]  }
  0x5b   :  { %1428 = vmatpush1.bf16.msra.mxu0 %v2769_v21  ;;  %v2839_v21 = vld [vmem:[%s3924_s1 + $0x360] ss:$12 sps:$4 sm:$0xff]  }
  0x5c   :  { %1429 = vmatprep.subr.bf16.mxu0 %v2776_v22  ;;  %2611 = vmatpush3.bf16.msra.mxu1 %v2848_v47  ;;  %v2846_v22 = vld [vmem:[%s3924_s1 + $0x37c] ss:$12 sps:$4 sm:$0xff]  }
  0x5d   :  { %2612 = vmatprep.subr.bf16.mxu1 %v2852_v48  ;;  %v2894_v47 = vld [vmem:[%s3924_s1 + $0x468] ss:$12 sps:$4 sm:$0xff]   ;;  %v2901_v48 = vld [vmem:[%s3924_s1 + $0x484] ss:$12 sps:$4 sm:$0xff]  }
  0x5f   :  { %1430 = vmatpush1.bf16.msra.mxu0 %v2774_v26  ;;  %v2898_v26 = vld [vmem:[%s3924_s1 + $0x530] ss:$12 sps:$4 sm:$0xff]  }
  0x60   :  { %1431 = vmatprep.subr.bf16.mxu0 %v2781_v27  ;;  %2613 = vmatpush3.bf16.msra.mxu1 %v2853_v51  ;;  %v2851_v27 = vld [vmem:[%s3924_s1 + $0x394] ss:$12 sps:$4 sm:$0xff]   ;;  %v2902_v51 = vld [vmem:[%s3924_s1 + $0x498] ss:$12 sps:$4 sm:$0xff]  }
  0x61   :  { %2614 = vmatprep.subr.bf16.mxu1 %v2857_v52  ;;  %v2907_v52 = vld [vmem:[%s3924_s1 + $0x4b4] ss:$12 sps:$4 sm:$0xff]  }
  0x63   :  { %1432 = vmatpush1.bf16.msra.mxu0 %v2779_v30  ;;  %v2856_v30 = vld [vmem:[%s3924_s1 + $0x3ac] ss:$12 sps:$4 sm:$0xff]  }
  0x64   :  { %1433 = vmatprep.subr.bf16.mxu0 %v2786_v31  ;;  %2615 = vmatpush3.bf16.msra.mxu1 %v2858_v55  ;;  %v2854_v31 = vld [vmem:[%s3924_s1 + $0x3a8] ss:$12 sps:$4 sm:$0xff]  }
  0x65   :  { %2622 = vmatprep.subr.bf16.mxu1 %v2862_v56  ;;  %v2908_v55 = vld [vmem:[%s3924_s1 + $0x4c8] ss:$12 sps:$4 sm:$0xff]   ;;  %v2913_v56 = vld [vmem:[%s3924_s1 + $0x4e4] ss:$12 sps:$4 sm:$0xff]  }
  0x67   :  { %1434 = vmatpush1.bf16.msra.mxu0 %v2784_v34  ;;  %1659 = vmatmul.mubr.bf16.vlgmr.msra.gmra.mrb[8].mxu1 %v3444_v59  ;;  %v2866_v34 = vld [vmem:[%s3924_s1 + $0x3dc] ss:$12 sps:$4 sm:$0xff]  }
  0x68   :  { %1435 = vmatprep.subr.bf16.mxu0 %v2791_v36  ;;  %2623 = vmatpush3.bf16.msra.mxu1 %v2863_v60  ;;  %v2871_v36 = vld [vmem:[%s3924_s1 + $0x3f4] ss:$12 sps:$4 sm:$0xff]  }
  0x69   :  { %2624 = vmatprep.subr.bf16.mxu1 %v2867_v61  ;;  %1699 = vmatprep.mubr.bf16.mxu1 %v3496_v12  ;;  %v2919_v60 = vld [vmem:[%s3924_s1 + $0x514] ss:$12 sps:$4 sm:$0xff]   ;;  %v2917_v61 = vld [vmem:[%s3924_s1 + $0x510] ss:$12 sps:$4 sm:$0xff]  }
  0x6b   :  { %1436 = vmatpush1.bf16.msra.mxu0 %v2789_v38  ;;  %v2876_v38 = vld [vmem:[%s3924_s1 + $0x40c] ss:$12 sps:$4 sm:$0xff]  }
  0x6c   :  { %1437 = vmatprep.subr.bf16.mxu0 %v2796_v39  ;;  %2625 = vmatpush3.bf16.msra.mxu1 %v2868_v63  ;;  %v2874_v39 = vld [vmem:[%s3924_s1 + $0x408] ss:$12 sps:$4 sm:$0xff]  }
  0x6d   :  { %2626 = vmatprep.subr.bf16.mxu1 %v2872_v1  ;;  %v2920_v63 = vld [vmem:[%s3924_s1 + $0x528] ss:$12 sps:$4 sm:$0xff]   ;;  %v2923_v1 = vld [vmem:[%s3924_s1 + $0x540] ss:$12 sps:$4 sm:$0xff]  }
  0x6f   :  { %1438 = vmatpush1.bf16.msra.mxu0 %v2794_v45  ;;  %v2889_v45 = vld [vmem:[%s3924_s1 + $0x450] ss:$12 sps:$4 sm:$0xff]  }
  0x70   :  { %1439 = vmatprep.subr.bf16.mxu0 %v2801_v46  ;;  %2627 = vmatpush3.bf16.msra.mxu1 %v2873_v4  ;;  %v2896_v46 = vld [vmem:[%s3924_s1 + $0x46c] ss:$12 sps:$4 sm:$0xff]   ;;  %v2931_v4 = vld [vmem:[%s3924_s1 + $0x574] ss:$12 sps:$4 sm:$0xff]  }
  0x71   :  { %2628 = vmatprep.subr.bf16.mxu1 %v2877_v5  ;;  %v2929_v5 = vld [vmem:[%s3924_s1 + $0x570] ss:$12 sps:$4 sm:$0xff]  }
  0x73   :  { %1440 = vmatpush1.bf16.msra.mxu0 %v2799_v49  ;;  %v2899_v49 = vld [vmem:[%s3924_s1 + $0x480] ss:$12 sps:$4 sm:$0xff]  }
  0x74   :  { %1441 = vmatprep.subr.bf16.mxu0 %v2806_v50  ;;  %2629 = vmatpush3.bf16.msra.mxu1 %v2878_v8  ;;  %v2904_v50 = vld [vmem:[%s3924_s1 + $0x49c] ss:$12 sps:$4 sm:$0xff]   ;;  %v2937_v8 = vld [vmem:[%s3924_s1 + $0x5a4] ss:$12 sps:$4 sm:$0xff]  }
  0x75   :  { %2630 = vmatprep.subr.bf16.mxu1 %v2882_v11  ;;  %v2938_v11 = vld [vmem:[%s3924_s1 + $0x5b8] ss:$12 sps:$4 sm:$0xff]  }
  0x77   :  { %1442 = vmatpush1.bf16.msra.mxu0 %v2804_v53  ;;  %v2905_v53 = vld [vmem:[%s3924_s1 + $0x4b0] ss:$12 sps:$4 sm:$0xff]  }
  0x78   :  { %1443 = vmatprep.subr.bf16.mxu0 %v2811_v54  ;;  %2631 = vmatpush3.bf16.msra.mxu1 %v2883_v15  ;;  %v2910_v54 = vld [vmem:[%s3924_s1 + $0x4cc] ss:$12 sps:$4 sm:$0xff]   ;;  %v2947_v15 = vld [vmem:[%s3926_s3] ss:$8 sps:$4 sm:$0xff]  }
  0x79   :  { %2632 = vmatprep.subr.bf16.mxu1 %v2887_v16  ;;  %v2949_v16 = vld [vmem:[%s3926_s3 + $0x4] ss:$8 sps:$4 sm:$0xff]  }
  0x7b   :  { %1444 = vmatpush1.bf16.msra.mxu0 %v2809_v57  ;;  %v2911_v57 = vld [vmem:[%s3924_s1 + $0x4e0] ss:$12 sps:$4 sm:$0xff]  }
  0x7c   :  { %1445 = vmatprep.subr.bf16.mxu0 %v2816_v58  ;;  %2633 = vmatpush3.bf16.msra.mxu1 %v2888_v19  ;;  %v2916_v58 = vld [vmem:[%s3924_s1 + $0x4fc] ss:$12 sps:$4 sm:$0xff]   ;;  %v2950_v19 = vld [vmem:[%s3926_s3 + $0x10] ss:$8 sps:$4 sm:$0xff]  }
  0x7d   :  { %2634 = vmatprep.subr.bf16.mxu1 %v2892_v20  ;;  %v2955_v20 = vld [vmem:[%s3926_s3 + $0x24] ss:$8 sps:$4 sm:$0xff]  }
  0x7f   :  { %1446 = vmatpush1.bf16.msra.mxu0 %v2814_v62  ;;  %v2922_v62 = vld [vmem:[%s3924_s1 + $0x52c] ss:$12 sps:$4 sm:$0xff]  }
  0x80   :  { %1458 = vmatprep.subr.bf16.mxu0 %v2821_v0  ;;  %2635 = vmatpush3.bf16.msra.mxu1 %v2893_v23  ;;  %v2925_v0 = vld [vmem:[%s3924_s1 + $0x544] ss:$12 sps:$4 sm:$0xff]  }
  0x81   :  { %v2956_v23 = vld [vmem:[%s3926_s3 + $0x30] ss:$8 sps:$4 sm:$0xff]  }
  0x82   :  { %1448 = vmatmul.mubr.bf16.vlgmr.msra.gmra.mrb[0].mxu0 %v3339_v24  ;;  %v2897_v24 = vld [vmem:[%s3924_s1 + $0x5f0] ss:$12 sps:$4 sm:$0xff]  }
  0x83   :  { %1459 = vmatpush1.bf16.msra.mxu0 %v2819_v2  ;;  %1490 = vmatprep.mubr.bf16.mxu0 %v3399_v44  ;;  %v2891_v44 = vld [vmem:[%s3924_s1 + $0x454] ss:$12 sps:$4 sm:$0xff]   ;;  %v2928_v2 = vld [vmem:[%s3924_s1 + $0x55c] ss:$12 sps:$4 sm:$0xff]  }
  0x84   :  { %1460 = vmatprep.subr.bf16.mxu0 %v2826_v3  ;;  %2636 = vmatprep.subr.bf16.mxu1 %v2897_v24  ;;  %v2926_v3 = vld [vmem:[%s3924_s1 + $0x558] ss:$12 sps:$4 sm:$0xff]  }
  0x85   :  { %2637 = vmatpush3.bf16.msra.mxu1 %v2898_v26  ;;  %v2961_v24 = vld [vmem:[%s3926_s3 + $0x44] ss:$8 sps:$4 sm:$0xff]   ;;  %v2964_v26 = vld [vmem:[%s3926_s3 + $0x54] ss:$8 sps:$4 sm:$0xff]  }
  0x86   :  { %2017 = vmatprep.subr.bf16.mxu1 %v2949_v16 }
  0x87   :  { %1461 = vmatpush1.bf16.msra.mxu0 %v2824_v6  ;;  %v2934_v6 = vld [vmem:[%s3924_s1 + $0x58c] ss:$12 sps:$4 sm:$0xff]  }
  0x88   :  { %1462 = vmatprep.subr.bf16.mxu0 %v2831_v7  ;;  %1700 = vmatmul.mubr.bf16.vlgmr.msra.gmra.mrb[12].mxu1 %v3545_v28  ;;  %v2932_v7 = vld [vmem:[%s3924_s1 + $0x588] ss:$12 sps:$4 sm:$0xff]  }
  0x89   :  { %2018 = vmatpush1.bf16.msra.mxu1 %v2947_v15 }
  0x8b   :  { %1463 = vmatpush1.bf16.msra.mxu0 %v2829_v13  ;;  %v2941_v13 = vld [vmem:[%s3924_s1 + $0x5d0] ss:$12 sps:$4 sm:$0xff]  }
  0x8c   :  { %1464 = vmatprep.subr.bf16.mxu0 %v2836_v14  ;;  %v2946_v14 = vld [vmem:[%s3924_s1 + $0x5ec] ss:$12 sps:$4 sm:$0xff]  }
  0x8f   :  { %1465 = vmatpush1.bf16.msra.mxu0 %v2834_v17  ;;  %v2952_v17 = vld [vmem:[%s3926_s3 + $0x14] ss:$8 sps:$4 sm:$0xff]  }
  0x90   :  { %1466 = vmatprep.subr.bf16.mxu0 %v2841_v18  ;;  %v2944_v18 = vld [vmem:[%s3924_s1 + $0x5e8] ss:$12 sps:$4 sm:$0xff]   ;;  %2019 = vmatprep.subr.bf16.mxu1 %v2952_v17 }
  0x91   :  { %2020 = vmatpush1.bf16.msra.mxu1 %v2950_v19 }
  0x92   :  { %2021 = vmatprep.subr.bf16.mxu1 %v2955_v20 }
  0x93   :  { %1467 = vmatpush1.bf16.msra.mxu0 %v2839_v21  ;;  %v2953_v21 = vld [vmem:[%s3926_s3 + $0x20] ss:$8 sps:$4 sm:$0xff]  }
  0x94   :  { %1468 = vmatprep.subr.bf16.mxu0 %v2846_v22  ;;  %v2958_v22 = vld [vmem:[%s3926_s3 + $0x34] ss:$8 sps:$4 sm:$0xff]  }
  0x95   :  { %2022 = vmatpush1.bf16.msra.mxu1 %v2953_v21 }
  0x96   :  { %2023 = vmatprep.subr.bf16.mxu1 %v2958_v22 }
  0x97   :  { %1469 = vmatpush1.bf16.msra.mxu0 %v2844_v25  ;;  %v2959_v25 = vld [vmem:[%s3926_s3 + $0x40] ss:$8 sps:$4 sm:$0xff]  }
  0x98   :  { %1470 = vmatprep.subr.bf16.mxu0 %v2851_v27  ;;  %v2962_v27 = vld [vmem:[%s3926_s3 + $0x50] ss:$8 sps:$4 sm:$0xff]  }
  0x99   :  { %2024 = vmatpush1.bf16.msra.mxu1 %v2956_v23 }
  0x9a   :  { %2025 = vmatprep.subr.bf16.mxu1 %v2961_v24 }
  0x9b   :  { %1471 = vmatpush1.bf16.msra.mxu0 %v2849_v29 }
  0x9c   :  { %1472 = vmatprep.subr.bf16.mxu0 %v2856_v30 }
  0x9d   :  { %2026 = vmatpush1.bf16.msra.mxu1 %v2959_v25 }
  0x9e   :  { %2027 = vmatprep.subr.bf16.mxu1 %v2964_v26 }
  0x9f   :  { %1473 = vmatpush1.bf16.msra.mxu0 %v2854_v31  ;;  %v2965_v31 = vld [vmem:[%s3926_s3 + $0x60] ss:$8 sps:$4 sm:$0xff]  }
  0xa0   :  { %1474 = vmatprep.subr.bf16.mxu0 %v2861_v32 }
  0xa1   :  { %2028 = vmatpush1.bf16.msra.mxu1 %v2962_v27 }
  0xa3   :  { %1475 = vmatpush1.bf16.msra.mxu0 %v2859_v33 }
  0xa4   :  { %1476 = vmatprep.subr.bf16.mxu0 %v2866_v34 }
  0xa7   :  { %1477 = vmatpush1.bf16.msra.mxu0 %v2864_v35 }
  0xa8   :  { %1478 = vmatprep.subr.bf16.mxu0 %v2871_v36  ;;  %v2970_v36 = vld [vmem:[%s3926_s3 + $0x74] ss:$8 sps:$4 sm:$0xff]  }
  0xab   :  { %1479 = vmatpush1.bf16.msra.mxu0 %v2869_v37  ;;  %v2968_v37 = vld [vmem:[%s3926_s3 + $0x70] ss:$8 sps:$4 sm:$0xff]  }
  0xac   :  { %1480 = vmatprep.subr.bf16.mxu0 %v2876_v38  ;;  %v2973_v38 = vld [vmem:[%s3926_s3 + $0x84] ss:$8 sps:$4 sm:$0xff]  }
  0xaf   :  { %1481 = vmatpush1.bf16.msra.mxu0 %v2874_v39  ;;  %v2971_v39 = vld [vmem:[%s3926_s3 + $0x80] ss:$8 sps:$4 sm:$0xff]  }
  0xb0   :  { %1482 = vmatprep.subr.bf16.mxu0 %v2881_v40  ;;  %v2976_v40 = vld [vmem:[%s3926_s3 + $0x94] ss:$8 sps:$4 sm:$0xff]  }
  0xb3   :  { %1483 = vmatpush1.bf16.msra.mxu0 %v2879_v41  ;;  %v2974_v41 = vld [vmem:[%s3926_s3 + $0x90] ss:$8 sps:$4 sm:$0xff]  }
  0xb4   :  { %1484 = vmatprep.subr.bf16.mxu0 %v2886_v42  ;;  %v293_v42 = vlaneseq }
  0xb7   :  { %1485 = vmatpush1.bf16.msra.mxu0 %v2884_v43  ;;  %v2979_v43 = vld [vmem:[%s3926_s3 + $0xa4] ss:$8 sps:$4 sm:$0xff]  }
  0xb8   :  { %1486 = vmatprep.subr.bf16.mxu0 %v2891_v44  ;;  %v2977_v44 = vld [vmem:[%s3926_s3 + $0xa0] ss:$8 sps:$4 sm:$0xff]  }
  0xbb   :  { %1487 = vmatpush1.bf16.msra.mxu0 %v2889_v45  ;;  %v3770_v45 = vshrl.u32 %v293_v42, 7 }
  0xbc   :  { %1488 = vmatprep.subr.bf16.mxu0 %v2896_v46  ;;  %v2982_v46 = vld [vmem:[%s3926_s3 + $0xb4] ss:$8 sps:$4 sm:$0xff]  }
  0xbd   :  { %v295_v25 = vsub.s32 0, %v3770_v45  ;;  %v299_v26 = vsub.s32 1, %v3770_v45 }
  0xbf   :  { %1489 = vmatpush1.bf16.msra.mxu0 %v2894_v47  ;;  %v2980_v47 = vld [vmem:[%s3926_s3 + $0xb0] ss:$8 sps:$4 sm:$0xff]  }
  0xc0   :  { %1501 = vmatprep.subr.bf16.mxu0 %v2901_v48  ;;  %v303_v48 = vsub.s32 2, %v3770_v45  ;;  %v2539_v45 = vld [vmem:[%s3930_s6] ss:$0 sm:$0xff] }
  0xc2   :  { %1491 = vmatmul.mubr.bf16.vlgmr.msra.gmra.mrb[0].mxu0 %v3444_v59  ;;  %v2914_v59 = vld [vmem:[%s3924_s1 + $0x4f8] ss:$12 sps:$4 sm:$0xff]  }
  0xc3   :  { %1502 = vmatpush1.bf16.msra.mxu0 %v2899_v49  ;;  %1533 = vmatprep.mubr.bf16.mxu0 %v3496_v12  ;;  %v2943_v12 = vld [vmem:[%s3924_s1 + $0x5d4] ss:$12 sps:$4 sm:$0xff]   ;;  %v2985_v49 = vld [vmem:[%s3926_s3 + $0xc4] ss:$8 sps:$4 sm:$0xff]  }
  0xc4   :  { %1503 = vmatprep.subr.bf16.mxu0 %v2904_v50  ;;  %v291_v50 = vld [vmem:[%s3927_s2] sm:$0x7] }
  0xc5   :  { %v296_v27 = vrot.slane %v291_v50, %v295_v25 }
  0xc7   :  { %1504 = vmatpush1.bf16.msra.mxu0 %v2902_v51  ;;  %v2983_v51 = vld [vmem:[%s3926_s3 + $0xc0] ss:$8 sps:$4 sm:$0xff]  }
  0xc8   :  { %1505 = vmatprep.subr.bf16.mxu0 %v2907_v52  ;;  %v304_v52 = vrot.slane %v291_v50, %v303_v48  ;;  %v3003_v48 = vld [vmem:[%s3926_s3 + $0x124] ss:$8 sps:$4 sm:$0xff]  }
  0xcb   :  { %1506 = vmatpush1.bf16.msra.mxu0 %v2905_v53  ;;  %v2988_v53 = vld [vmem:[%s3926_s3 + $0xd4] ss:$8 sps:$4 sm:$0xff]  }
  0xcc   :  { %1507 = vmatprep.subr.bf16.mxu0 %v2910_v54  ;;  %v2986_v54 = vld [vmem:[%s3926_s3 + $0xd0] ss:$8 sps:$4 sm:$0xff]  }
  0xcf   :  { %1508 = vmatpush1.bf16.msra.mxu0 %v2908_v55 }
  0xd0   :  { %1509 = vmatprep.subr.bf16.mxu0 %v2913_v56 }
  0xd3   :  { %1510 = vmatpush1.bf16.msra.mxu0 %v2911_v57 }
  0xd4   :  { %1511 = vmatprep.subr.bf16.mxu0 %v2916_v58 }
  0xd7   :  { %1512 = vmatpush1.bf16.msra.mxu0 %v2914_v59 }
  0xd8   :  { %1513 = vmatprep.subr.bf16.mxu0 %v2919_v60 }
  0xdb   :  { %1514 = vmatpush1.bf16.msra.mxu0 %v2917_v61 }
  0xdc   :  { %1515 = vmatprep.subr.bf16.mxu0 %v2922_v62 }
  0xdf   :  { %1516 = vmatpush1.bf16.msra.mxu0 %v2920_v63 }
  0xe0   :  { %1517 = vmatprep.subr.bf16.mxu0 %v2925_v0 }
  0xe3   :  { %1518 = vmatpush1.bf16.msra.mxu0 %v2923_v1 }
  0xe4   :  { %1519 = vmatprep.subr.bf16.mxu0 %v2928_v2 }
  0xe7   :  { %1520 = vmatpush1.bf16.msra.mxu0 %v2926_v3 }
  0xe8   :  { %1521 = vmatprep.subr.bf16.mxu0 %v2931_v4 }
  0xeb   :  { %1522 = vmatpush1.bf16.msra.mxu0 %v2929_v5 }
  0xec   :  { %1523 = vmatprep.subr.bf16.mxu0 %v2934_v6 }
  0xef   :  { %1524 = vmatpush1.bf16.msra.mxu0 %v2932_v7 }
  0xf0   :  { %1525 = vmatprep.subr.bf16.mxu0 %v2937_v8 }
  0xf3   :  { %1526 = vmatpush1.bf16.msra.mxu0 %v2935_v9  ;;  %v2991_v9 = vld [vmem:[%s3926_s3 + $0xe4] ss:$8 sps:$4 sm:$0xff]  }
  0xf4   :  { %1527 = vmatprep.subr.bf16.mxu0 %v2940_v10  ;;  %v2989_v10 = vld [vmem:[%s3926_s3 + $0xe0] ss:$8 sps:$4 sm:$0xff]  }
  0xf7   :  { %1528 = vmatpush1.bf16.msra.mxu0 %v2938_v11  ;;  %v2994_v11 = vld [vmem:[%s3926_s3 + $0xf4] ss:$8 sps:$4 sm:$0xff]  }
  0xf8   :  { %1529 = vmatprep.subr.bf16.mxu0 %v2943_v12  ;;  %v2992_v12 = vld [vmem:[%s3926_s3 + $0xf0] ss:$8 sps:$4 sm:$0xff]  }
  0xfa   :  { %v2572_v29 = vpop.f32.mrb[0].mxu1 }
  0xfb   :  { %1530 = vmatpush1.bf16.msra.mxu0 %v2941_v13  ;;  %v2573_v30 = vpop.f32.mrb[1].mxu1  ;;  %v2997_v13 = vld [vmem:[%s3926_s3 + $0x104] ss:$8 sps:$4 sm:$0xff]  }
  0xfc   :  { %1531 = vmatprep.subr.bf16.mxu0 %v2946_v14  ;;  %v2574_v32 = vadd.f32 %v2573_v30, %v2572_v29  ;;  %v2575_v33 = vpop.f32.mrb[2].mxu1 }
  0xfd   :  { %v2576_v34 = vpop.f32.mrb[3].mxu1 }
  0xfe   :  { %v2577_v35 = vadd.f32 %v2576_v34, %v2575_v33  ;;  %v1579_v55 = vadd.f32 %v2574_v32, %v304_v52 }
  0xff   :  { %1532 = vmatpush1.bf16.msra.mxu0 %v2944_v18 }
 0x100   :  { %v1582_v58 = vadd.f32 %v2577_v35, %v304_v52  ;;  %v3009_v52 = vld [vmem:[%s3926_s3 + $0x144] ss:$8 sps:$4 sm:$0xff]  }
 0x102   :  { %1534 = vmatmul.mubr.bf16.vlgmr.msra.gmra.mrb[0].mxu0 %v3545_v28  ;;  %v2967_v28 = vld [vmem:[%s3926_s3 + $0x64] ss:$8 sps:$4 sm:$0xff]  }
 0x103   :  { %2029 = vmatprep.subr.bf16.mxu1 %v2967_v28  ;;  %v300_v28 = vrot.slane %v291_v50, %v299_v26  ;;  %v3006_v50 = vld [vmem:[%s3926_s3 + $0x134] ss:$8 sps:$4 sm:$0xff]  }
 0x104   :  { %2030 = vmatpush1.bf16.msra.mxu1 %v2965_v31 }
 0x105   :  { %2031 = vmatprep.subr.bf16.mxu1 %v2970_v36 }
 0x108   :  { %2032 = vmatpush1.bf16.msra.mxu1 %v2968_v37 }
 0x109   :  { %2033 = vmatprep.subr.bf16.mxu1 %v2973_v38 }
 0x10c   :  { %2034 = vmatpush1.bf16.msra.mxu1 %v2971_v39 }
 0x10d   :  { %2035 = vmatprep.subr.bf16.mxu1 %v2976_v40 }
 0x110   :  { %2036 = vmatpush1.bf16.msra.mxu1 %v2974_v41 }
 0x111   :  { %2037 = vmatprep.subr.bf16.mxu1 %v2979_v43  ;;  %v2995_v43 = vld [vmem:[%s3926_s3 + $0x100] ss:$8 sps:$4 sm:$0xff]  }
 0x114   :  { %2038 = vmatpush1.bf16.msra.mxu1 %v2977_v44  ;;  %v3000_v44 = vld [vmem:[%s3926_s3 + $0x114] ss:$8 sps:$4 sm:$0xff]  }
 0x115   :  { %2039 = vmatprep.subr.bf16.mxu1 %v2982_v46  ;;  %v2998_v46 = vld [vmem:[%s3926_s3 + $0x110] ss:$8 sps:$4 sm:$0xff]  }
 0x118   :  { %2040 = vmatpush1.bf16.msra.mxu1 %v2980_v47  ;;  %v3035_v47 = vmov 0  }
 0x119   :  { %2041 = vmatprep.subr.bf16.mxu1 %v2985_v49  ;;  %v3001_v49 = vld [vmem:[%s3926_s3 + $0x120] ss:$8 sps:$4 sm:$0xff]  }
 0x11a   :  { %v2594_v56 = vpop.f32.mrb[4].mxu1 }
 0x11b   :  { %v2595_v57 = vpop.f32.mrb[5].mxu1 }
 0x11c   :  { %2042 = vmatpush1.bf16.msra.mxu1 %v2983_v51  ;;  %v2596_v59 = vadd.f32 %v2595_v57, %v2594_v56  ;;  %v2597_v60 = vpop.f32.mrb[6].mxu1  ;;  %v3004_v51 = vld [vmem:[%s3926_s3 + $0x130] ss:$8 sps:$4 sm:$0xff]   ;;  %v3015_v56 = vld [vmem:[%s3926_s3 + $0x164] ss:$8 sps:$4 sm:$0xff]  }
 0x11d   :  { %2043 = vmatprep.subr.bf16.mxu1 %v2988_v53  ;;  %v2598_v61 = vpop.f32.mrb[7].mxu1  ;;  %v3007_v53 = vld [vmem:[%s3926_s3 + $0x140] ss:$8 sps:$4 sm:$0xff]  }
 0x11e   :  { %v1620_v62 = vadd.f32 %v2596_v59, %v1579_v55  ;;  %v2599_v63 = vadd.f32 %v2598_v61, %v2597_v60  ;;  %v3010_v55 = vld [vmem:[%s3926_s3 + $0x150] ss:$8 sps:$4 sm:$0xff]   ;;  %v3013_v57 = vld [vmem:[%s3926_s3 + $0x160] ss:$8 sps:$4 sm:$0xff]  }
 0x11f   :  { %v3016_v59 = vld [vmem:[%s3926_s3 + $0x170] ss:$8 sps:$4 sm:$0xff]   ;;  %v3019_v60 = vld [vmem:[%s3928_s5 + $0x40] sm:$0xff]  }
 0x120   :  { %2044 = vmatpush1.bf16.msra.mxu1 %v2986_v54  ;;  %v1623_v0 = vadd.f32 %v2599_v63, %v1582_v58  ;;  %v3012_v54 = vld [vmem:[%s3926_s3 + $0x154] ss:$8 sps:$4 sm:$0xff]   ;;  %v3020_v61 = vld [vmem:[%s3928_s5] sm:$0xff]   ;;  %v3022_v63 = vld [vmem:[%s3928_s5 + $0x8] sm:$0xff]  }
 0x121   :  { %2045 = vmatprep.subr.bf16.mxu1 %v2991_v9  ;;  %v3018_v58 = vld [vmem:[%s3926_s3 + $0x174] ss:$8 sps:$4 sm:$0xff]  }
 0x122   :  { %v3032_v9 = vld [vmem:[%s3928_s5 + $0x30] sm:$0xff]  }
 0x124   :  { %2046 = vmatpush1.bf16.msra.mxu1 %v2989_v10  ;;  %v3033_v10 = vld [vmem:[%s3928_s5 + $0x78] sm:$0xff]  }
 0x125   :  { %2047 = vmatprep.subr.bf16.mxu1 %v2994_v11  ;;  %v3034_v11 = vld [vmem:[%s3928_s5 + $0x38] sm:$0xff]  }
 0x128   :  { %2048 = vmatpush1.bf16.msra.mxu1 %v2992_v12  ;;  %v1765_v12 = vld [vmem:[%s3929_s4] sm:$0x3] }
 0x129   :  { %2060 = vmatprep.subr.bf16.mxu1 %v2997_v13  ;;  %v1770_v13 = vrot.slane %v1765_v12, %v295_v25 }
 0x13a   :  { %v2616_v1 = vpop.f32.mrb[8].mxu1 }
 0x13b   :  { %v2617_v2 = vpop.f32.mrb[9].mxu1 }
 0x13c   :  { %v2618_v3 = vadd.f32 %v2617_v2, %v2616_v1  ;;  %v2619_v4 = vpop.f32.mrb[10].mxu1  ;;  %v3024_v1 = vld [vmem:[%s3928_s5 + $0x10] sm:$0xff]   ;;  %v3025_v2 = vld [vmem:[%s3928_s5 + $0x58] sm:$0xff]  }
 0x13d   :  { %v2620_v5 = vpop.f32.mrb[11].mxu1 }
 0x13e   :  { %v1661_v6 = vadd.f32 %v2618_v3, %v1620_v62  ;;  %v2621_v7 = vadd.f32 %v2620_v5, %v2619_v4  ;;  %v3021_v62 = vld [vmem:[%s3928_s5 + $0x48] sm:$0xff]   ;;  %v3026_v3 = vld [vmem:[%s3928_s5 + $0x18] sm:$0xff]   ;;  %v3027_v4 = vld [vmem:[%s3928_s5 + $0x60] sm:$0xff]  }
 0x13f   :  { %v3028_v5 = vld [vmem:[%s3928_s5 + $0x20] sm:$0xff]  }
 0x140   :  { %v1664_v8 = vadd.f32 %v2621_v7, %v1623_v0  ;;  %v3023_v0 = vld [vmem:[%s3928_s5 + $0x50] sm:$0xff]   ;;  %v3030_v7 = vld [vmem:[%s3928_s5 + $0x28] sm:$0xff]  }
 0x15b   :  { %v2638_v14 = vpop.f32.mrb[12].mxu1 }
 0x15c   :  { %v2639_v15 = vpop.f32.mrb[13].mxu1 }
 0x15d   :  { %v2640_v16 = vadd.f32 %v2639_v15, %v2638_v14  ;;  %v2641_v17 = vpop.f32.mrb[14].mxu1  ;;  %v1774_v14 = vrot.slane %v1765_v12, %v299_v26 }
 0x15e   :  { %v2642_v18 = vpop.f32.mrb[15].mxu1 }
 0x15f   :  { %v1702_v19 = vadd.f32 %v2640_v16, %v1661_v6  ;;  %v2643_v20 = vadd.f32 %v2642_v18, %v2641_v17  ;;  %v3029_v6 = vld [vmem:[%s3928_s5 + $0x68] sm:$0xff]  }
 0x161   :  { %v1710_v21 = vmax.f32 %v1702_v19, 0.0  ;;  %v1705_v22 = vadd.f32 %v2643_v20, %v1664_v8  ;;  %v3031_v8 = vld [vmem:[%s3928_s5 + $0x70] sm:$0xff]  }
 0x163   :  { %v1713_v23 = vmax.f32 %v1705_v22, 0.0 }
 0x165   :  { %v1716_v24 = vpack.c.bf16 %v1713_v23, %v1710_v21 }
 0x1d5   :  { %v1535_v29 = vpop.f32.mrb[0].mxu0 }
 0x1d6   :  { %v2666_v30 = vadd.f32 %v1535_v29, %v296_v27  ;;  %v1537_v31 = vpop.f32.mrb[1].mxu0 }
 0x1d7   :  { %v2667_v32 = vadd.f32 %v1537_v31, %v300_v28  ;;  %v1539_v33 = vpop.f32.mrb[2].mxu0 }
 0x1d8   :  { %v2668_v34 = vadd.f32 %v1539_v33, %v296_v27  ;;  %v1541_v35 = vpop.f32.mrb[3].mxu0  ;;  %v1708_v37 = vmax.f32 %v2666_v30, 0.0 }
 0x1d9   :  { %v2669_v36 = vadd.f32 %v1541_v35, %v300_v28  ;;  %v1709_v39 = vmax.f32 %v2667_v32, 0.0 }
 0x1da   :  { %v1711_v38 = vmax.f32 %v2668_v34, 0.0 }
 0x1db   :  { %v1712_v40 = vmax.f32 %v2669_v36, 0.0 }
 0x1dc   :  { %v1714_v41 = vpack.c.bf16 %v1711_v38, %v1708_v37 }
 0x1dd   :  { %v1715_v42 = vpack.c.bf16 %v1712_v40, %v1709_v39 }
 0x1df   :  { %2049 = vmatprep.mubr.bf16.mxu1 %v1715_v42 }
 0x1e0   :  { %2050 = vmatmul.mubr.bf16.vlgmr.msra.gmra.mrb[16].mxu1 %v1714_v41 }
 0x1e1   :  { %2061 = vmatpush1.bf16.msra.mxu1 %v2995_v43  ;;  %2092 = vmatprep.mubr.bf16.mxu1 %v3035_v47 }
 0x1e2   :  { %2062 = vmatprep.subr.bf16.mxu1 %v3000_v44 }
 0x1e5   :  { %2063 = vmatpush1.bf16.msra.mxu1 %v2998_v46 }
 0x1e6   :  { %2064 = vmatprep.subr.bf16.mxu1 %v3003_v48 }
 0x1e9   :  { %2065 = vmatpush1.bf16.msra.mxu1 %v3001_v49 }
 0x1ea   :  { %2066 = vmatprep.subr.bf16.mxu1 %v3006_v50 }
 0x1ed   :  { %2067 = vmatpush1.bf16.msra.mxu1 %v3004_v51 }
 0x1ee   :  { %2068 = vmatprep.subr.bf16.mxu1 %v3009_v52 }
 0x1f1   :  { %2069 = vmatpush1.bf16.msra.mxu1 %v3007_v53 }
 0x1f2   :  { %2070 = vmatprep.subr.bf16.mxu1 %v3012_v54 }
 0x1f5   :  { %2071 = vmatpush1.bf16.msra.mxu1 %v3010_v55 }
 0x1f6   :  { %2072 = vmatprep.subr.bf16.mxu1 %v3015_v56 }
 0x1f9   :  { %2073 = vmatpush1.bf16.msra.mxu1 %v3013_v57 }
 0x1fa   :  { %2074 = vmatprep.subr.bf16.mxu1 %v3018_v58 }
 0x1fd   :  { %2075 = vmatpush1.bf16.msra.mxu1 %v3016_v59 }
 0x1fe   :  { %2644 = vmatprep.subr.bf16.mxu1 %v3019_v60 }
 0x200   :  { %2093 = vmatmul.mubr.bf16.vlgmr.msra.gmra.mrb[16].mxu1 %v1716_v24 }
 0x201   :  { %2645 = vmatpush3.bf16.msra.mxu1 %v3020_v61 }
 0x202   :  { %2646 = vmatprep.subr.bf16.mxu1 %v3021_v62 }
 0x205   :  { %2647 = vmatpush3.bf16.msra.mxu1 %v3022_v63 }
 0x206   :  { %2648 = vmatprep.subr.bf16.mxu1 %v3023_v0 }
 0x209   :  { %2649 = vmatpush3.bf16.msra.mxu1 %v3024_v1 }
 0x20a   :  { %2650 = vmatprep.subr.bf16.mxu1 %v3025_v2 }
 0x20d   :  { %2651 = vmatpush3.bf16.msra.mxu1 %v3026_v3 }
 0x20e   :  { %2652 = vmatprep.subr.bf16.mxu1 %v3027_v4 }
 0x211   :  { %2653 = vmatpush3.bf16.msra.mxu1 %v3028_v5 }
 0x212   :  { %2654 = vmatprep.subr.bf16.mxu1 %v3029_v6 }
 0x215   :  { %2655 = vmatpush3.bf16.msra.mxu1 %v3030_v7 }
 0x216   :  { %2656 = vmatprep.subr.bf16.mxu1 %v3031_v8 }
 0x219   :  { %2657 = vmatpush3.bf16.msra.mxu1 %v3032_v9 }
 0x21a   :  { %2658 = vmatprep.subr.bf16.mxu1 %v3033_v10 }
 0x21d   :  { %2659 = vmatpush3.bf16.msra.mxu1 %v3034_v11 }
 0x2d3   :  { %v2094_v15 = vpop.f32.mrb[16].mxu1 }
 0x2d4   :  { %v2670_v16 = vadd.f32 %v2094_v15, %v1770_v13  ;;  %v2096_v17 = vpop.f32.mrb[17].mxu1 }
 0x2d5   :  { %v2671_v18 = vadd.f32 %v2096_v17, %v1774_v14  ;;  %v2098_v19 = vpop.f32.mrb[18].mxu1 }
 0x2d6   :  { %v2672_v20 = vadd.f32 %v2098_v19, %v1770_v13  ;;  %v2100_v21 = vpop.f32.mrb[19].mxu1  ;;  %v2103_v23 = vmax.f32 %v2670_v16, 0.0 }
 0x2d7   :  { %v2673_v22 = vadd.f32 %v2100_v21, %v1774_v14  ;;  %v2104_v27 = vmax.f32 %v2671_v18, 0.0 }
 0x2d8   :  { %v2105_v24 = vmax.f32 %v2672_v20, 0.0 }
 0x2d9   :  { %v2106_v28 = vmax.f32 %v2673_v22, 0.0 }
 0x2da   :  { %v2107_v29 = vpack.c.bf16 %v2105_v24, %v2103_v23 }
 0x2db   :  { %v2108_v30 = vpack.c.bf16 %v2106_v28, %v2104_v27 }
 0x2dd   :  { %2276 = vmatprep.mubr.bf16.mxu1 %v2108_v30 }
 0x2de   :  { %2277 = vmatmul.mubr.bf16.vlgmr.msra.gmra.mrb[20].mxu1 %v2107_v29 }
 0x3b1   :  { %v2660_v25 = vpop.f32.mrb[20].mxu1 }
 0x3b2   :  { %v2661_v26 = vpop.f32.mrb[21].mxu1 }
 0x3b3   :  { %v2662_v31 = vadd.f32 %v2661_v26, %v2660_v25  ;;  %v2663_v32 = vpop.f32.mrb[22].mxu1 }
 0x3b4   :  { %v2664_v33 = vpop.f32.mrb[23].mxu1 }
 0x3b5   :  { %v2279_v34 = vadd.f32 %v2662_v31, %v2539_v45  ;;  %v2665_v35 = vadd.f32 %v2664_v33, %v2663_v32 }
 0x3b7   :  { %2285 = vst [vmem:[%s3931_s7] sm:$0xff] %v2279_v34  ;;  %v2282_v36 = vadd.f32 %v2665_v35, %v2539_v45 }
 0x3b9   :  { %2286 = vst [vmem:[%s3931_s7 + $0x8] sm:$0xff] %v2282_v36 }

// kernel: cnn_forward.4
= control target key start
LH: loop header
LB: loop body
LE: loop exit
PB: predicated region body
PF: predicated region fallthrough
CT: control target
= control target key end

     0   :  { %s3661_s12 = smov 0   ;;  %s4334_s0 = inlined_call_operand.vmem [shape: bf16[2,144,1664], index: 0, kind: input, shape index: {}]   ;;  %s4335_s1 = inlined_call_operand.vmem [shape: bf16[1664,128], index: 1, kind: input, shape index: {}]   ;;  %s4336_s2 = inlined_call_operand.vmem [shape: f32[1,128], index: 2, kind: input, shape index: {}]   ;;  %s4337_s3 = inlined_call_operand.vmem [shape: bf16[2,4,4,64], index: 3, kind: output, shape index: {}]  }
   0x1 LB: > { %s2604_s13 = sadd.s32 4294967295, %s3637_s12   ;;  %p2608_p0 = scmp.ge.s32.totalorder %s3637_s12, 1  ;;  %s3637_s12 = sphi %s3661_s12, %s13_s12  }
   0x2   : > { %p137_p1 = scmp.lt.s32.totalorder %s3637_s12, 3 }
   0x4   : > { %p138_p2 = pnand %p2608_p0, %p137_p1 }
   0x5   : > { %v3356_v0 = vld [vmem:[%s4335_s1 + $0x40] sm:$0xff] (!%p138_p2)   ;;  %v3358_v2 = vld [vmem:[%s4335_s1 + $0x48] sm:$0xff] (!%p138_p2)   ;;  %p161_p3 = scmp.lt.s32.totalorder (!%p138_p2), %s2604_s13, 1  ;;  %v3360_v4 = vld [vmem:[%s4335_s1 + $0x50] sm:$0xff] (!%p138_p2)   ;;  %vm3640_vm0 = vmmov (!%p138_p2), 0   ;;  %vm2502_vm1 = vcmask (!%p138_p2), 517120  }
   0x6   : > { %141 = sbr.rel (%p138_p2) target bundleno = 518 (0x206), region = 32  ;;  %v3357_v1 = vld [vmem:[%s4335_s1] sm:$0xff] (!%p138_p2)   ;;  %3329 = vmatprep.subr.bf16.mxu1 (!%p138_p2), %v3356_v0  ;;  %2840 = vmatprep.subr.bf16.mxu0 (!%p138_p2), %v3356_v0  ;;  %v3359_v3 = vld [vmem:[%s4335_s1 + $0x8] sm:$0xff] (!%p138_p2)   ;;  %v3361_v5 = vld [vmem:[%s4335_s1 + $0x10] sm:$0xff] (!%p138_p2)  }
   0x7   : > { %3337 = vmatpush3.bf16.msra.mxu1 (!%p138_p2), %v3357_v1  ;;  %2841 = vmatpush3.bf16.msra.mxu0 (!%p138_p2), %v3357_v1  ;;  %v3362_v6 = vld [vmem:[%s4335_s1 + $0x58] sm:$0xff] (!%p138_p2)   ;;  %v3364_v8 = vld [vmem:[%s4335_s1 + $0x60] sm:$0xff] (!%p138_p2)   ;;  %v3366_v10 = vld [vmem:[%s4335_s1 + $0x68] sm:$0xff] (!%p138_p2)  }
   0x8   : > { %3330 = vmatprep.subr.bf16.mxu1 (!%p138_p2), %v3358_v2  ;;  %2842 = vmatprep.subr.bf16.mxu0 (!%p138_p2), %v3358_v2  ;;  %v3363_v7 = vld [vmem:[%s4335_s1 + $0x18] sm:$0xff] (!%p138_p2)   ;;  %v3365_v9 = vld [vmem:[%s4335_s1 + $0x20] sm:$0xff] (!%p138_p2)   ;;  %v3367_v12 = vld [vmem:[%s4335_s1 + $0x28] sm:$0xff] (!%p138_p2)  }
   0x9   : > { %v3368_v13 = vld [vmem:[%s4335_s1 + $0x70] sm:$0xff] (!%p138_p2)   ;;  %v3370_v16 = vld [vmem:[%s4335_s1 + $0x78] sm:$0xff] (!%p138_p2)   ;;  %v3375_v18 = vld [vmem:[%s4335_s1 + $0xc0] sm:$0xff] (!%p138_p2)  }
   0xa   : > { %v3369_v14 = vld [vmem:[%s4335_s1 + $0x30] sm:$0xff] (!%p138_p2)   ;;  %v3371_v17 = vld [vmem:[%s4335_s1 + $0x38] sm:$0xff] (!%p138_p2)   ;;  %v3386_v20 = vld [vmem:[%s4335_s1 + $0x140] sm:$0xff] (!%p138_p2)  }
   0xb   : > { %3338 = vmatpush3.bf16.msra.mxu1 (!%p138_p2), %v3359_v3  ;;  %2843 = vmatpush3.bf16.msra.mxu0 (!%p138_p2), %v3359_v3  ;;  %v3376_v21 = vld [vmem:[%s4335_s1 + $0x80] sm:$0xff] (!%p138_p2)   ;;  %v3377_v22 = vld [vmem:[%s4335_s1 + $0xc8] sm:$0xff] (!%p138_p2)   ;;  %v3385_v29 = vld [vmem:[%s4335_s1 + $0xd0] sm:$0xff] (!%p138_p2)  }
   0xc   : > { %3331 = vmatprep.subr.bf16.mxu1 (!%p138_p2), %v3360_v4  ;;  %2844 = vmatprep.subr.bf16.mxu0 (!%p138_p2), %v3360_v4  ;;  %v3388_v25 = vld [vmem:[%s4335_s1 + $0x100] sm:$0xff] (!%p138_p2)   ;;  %v3389_v26 = vld [vmem:[%s4335_s1 + $0x148] sm:$0xff] (!%p138_p2)   ;;  %v3387_v32 = vld [vmem:[%s4335_s1 + $0x90] sm:$0xff] (!%p138_p2)  }
   0xd   : > { %s4339_s13 = smov (!%p161_p3, %s2604_s13), 1  ;;  %v3378_v27 = vld [vmem:[%s4335_s1 + $0x88] sm:$0xff]   ;;  %v3399_v34 = vld [vmem:[%s4335_s1 + $0x150] sm:$0xff]   ;;  %v3392_v36 = vld [vmem:[%s4335_s1 + $0xd8] sm:$0xff]  }
   0xe   : > { %s3345_s28 = smul.u32 936, %s4339_s13  ;;  %v3393_v31 = vld [vmem:[%s4335_s1 + $0x108] sm:$0xff]   ;;  %v3400_v37 = vld [vmem:[%s4335_s1 + $0x110] sm:$0xff]   ;;  %v3395_v38 = vld [vmem:[%s4335_s1 + $0x98] sm:$0xff]  }
   0xf   : > { %3339 = vmatpush3.bf16.msra.mxu1 %v3361_v5  ;;  %2845 = vmatpush3.bf16.msra.mxu0 %v3361_v5  ;;  %v3403_v39 = vld [vmem:[%s4335_s1 + $0x158] sm:$0xff]   ;;  %v3401_v41 = vld [vmem:[%s4335_s1 + $0xe0] sm:$0xff]   ;;  %v3410_v48 = vld [vmem:[%s4335_s1 + $0xe8] sm:$0xff]  }
  0x10   : > { %3332 = vmatprep.subr.bf16.mxu1 %v3362_v6  ;;  %2846 = vmatprep.subr.bf16.mxu0 %v3362_v6  ;;  %s3702_s8 = scalar_lea.vmem %s4334_s0, %s3345_s28  ;;  %v3406_v43 = vld [vmem:[%s4335_s1 + $0x118] sm:$0xff]   ;;  %v3402_v44 = vld [vmem:[%s4335_s1 + $0xa0] sm:$0xff]   ;;  %v3416_v50 = vld [vmem:[%s4335_s1 + $0x168] sm:$0xff]  }
  0x11   : > { %v3374_v11 = vld [vmem:[%s3702_s8 + $0x1a4] ss:$52 sps:$4 sm:$0xff]   ;;  %v3372_v19 = vld [vmem:[%s3702_s8 + $0x1a0] ss:$52 sps:$4 sm:$0xff]   ;;  %v3381_v30 = vld [vmem:[%s3702_s8 + $0x208] ss:$52 sps:$4 sm:$0xff]  }
  0x12   : > { %1795 = vmatprep.mubr.bf16.mxu1 %v3374_v11  ;;  %v3384_v15 = vld [vmem:[%s3702_s8 + $0x4] ss:$52 sps:$4 sm:$0xff]   ;;  %v3382_v23 = vld [vmem:[%s3702_s8] ss:$52 sps:$4 sm:$0xff]   ;;  %v3398_v35 = vld [vmem:[%s3702_s8 + $0x68] ss:$52 sps:$4 sm:$0xff]  }
  0x13   : > { %3340 = vmatpush3.bf16.msra.mxu1 %v3363_v7  ;;  %2847 = vmatpush3.bf16.msra.mxu0 %v3363_v7  ;;  %v3379_v24 = vld [vmem:[%s3702_s8 + $0x20c] ss:$52 sps:$4 sm:$0xff]   ;;  %v3390_v33 = vld [vmem:[%s3702_s8 + $0x274] ss:$52 sps:$4 sm:$0xff]   ;;  %v3394_v42 = vld [vmem:[%s3702_s8 + $0x270] ss:$52 sps:$4 sm:$0xff]  }
  0x14   : > { %3333 = vmatprep.subr.bf16.mxu1 %v3364_v8  ;;  %2848 = vmatprep.subr.bf16.mxu0 %v3364_v8  ;;  %v3396_v28 = vld [vmem:[%s3702_s8 + $0x6c] ss:$52 sps:$4 sm:$0xff]   ;;  %v3408_v40 = vld [vmem:[%s3702_s8 + $0xd4] ss:$52 sps:$4 sm:$0xff]   ;;  %v3404_v45 = vld [vmem:[%s3702_s8 + $0x2dc] ss:$52 sps:$4 sm:$0xff]  }
  0x15   : > { %1763 = vmatprep.mubr.bf16.mxu0 %v3384_v15  ;;  %v3411_v46 = vld [vmem:[%s3702_s8 + $0xd0] ss:$52 sps:$4 sm:$0xff]   ;;  %v3412_v51 = vld [vmem:[%s4335_s1 + $0xa8] sm:$0xff]   ;;  %v3426_v60 = vld [vmem:[%s4335_s1 + $0xf8] sm:$0xff]  }
  0x16   : > { %v3413_v47 = vld [vmem:[%s4335_s1 + $0x160] sm:$0xff]   ;;  %v3407_v52 = vld [vmem:[%s3702_s8 + $0x2d8] ss:$52 sps:$4 sm:$0xff]   ;;  %v3415_v53 = vld [vmem:[%s4335_s1 + $0xf0] sm:$0xff]  }
  0x17   : > { %3341 = vmatpush3.bf16.msra.mxu1 %v3365_v9  ;;  %2849 = vmatpush3.bf16.msra.mxu0 %v3365_v9  ;;  %v3414_v49 = vld [vmem:[%s4335_s1 + $0x120] sm:$0xff]   ;;  %v3420_v54 = vld [vmem:[%s4335_s1 + $0x128] sm:$0xff]   ;;  %v3419_v56 = vld [vmem:[%s4335_s1 + $0xb0] sm:$0xff]  }
  0x18   : > { %3334 = vmatprep.subr.bf16.mxu1 %v3366_v10  ;;  %2850 = vmatprep.subr.bf16.mxu0 %v3366_v10  ;;  %v3417_v55 = vld [vmem:[%s3702_s8 + $0x344] ss:$52 sps:$4 sm:$0xff]   ;;  %v3422_v57 = vld [vmem:[%s3702_s8 + $0x13c] ss:$52 sps:$4 sm:$0xff]   ;;  %v3421_v0 = vld [vmem:[%s3702_s8 + $0x340] ss:$52 sps:$4 sm:$0xff]  }
  0x19   : > { %v3424_v58 = vld [vmem:[%s3702_s8 + $0x138] ss:$52 sps:$4 sm:$0xff]   ;;  %v3425_v59 = vld [vmem:[%s4335_s1 + $0x170] sm:$0xff]   ;;  %v3434_v3 = vld [vmem:[%s4335_s1 + $0x1c0] sm:$0xff]  }
  0x1a   : > { %v3427_v61 = vld [vmem:[%s4335_s1 + $0x130] sm:$0xff]   ;;  %v3429_v62 = vld [vmem:[%s4335_s1 + $0x178] sm:$0xff]   ;;  %v3432_v1 = vld [vmem:[%s3702_s8 + $0xc] ss:$52 sps:$4 sm:$0xff]  }
  0x1b   : > { %3342 = vmatpush3.bf16.msra.mxu1 %v3367_v12  ;;  %2851 = vmatpush3.bf16.msra.mxu0 %v3367_v12  ;;  %v3428_v63 = vld [vmem:[%s4335_s1 + $0xb8] sm:$0xff]   ;;  %v3435_v4 = vld [vmem:[%s3702_s8 + $0x10] ss:$52 sps:$4 sm:$0xff]   ;;  %v3437_v5 = vld [vmem:[%s3702_s8 + $0x14] ss:$52 sps:$4 sm:$0xff]  }
  0x1c   : > { %3335 = vmatprep.subr.bf16.mxu1 %v3368_v13  ;;  %2852 = vmatprep.subr.bf16.mxu0 %v3368_v13  ;;  %v3433_v2 = vld [vmem:[%s4335_s1 + $0x138] sm:$0xff]   ;;  %v3439_v6 = vld [vmem:[%s4335_s1 + $0x240] sm:$0xff]   ;;  %v3441_v11 = vld [vmem:[%s3702_s8 + $0x74] ss:$52 sps:$4 sm:$0xff]  }
  0x1d   : > { %v3440_v7 = vld [vmem:[%s4335_s1 + $0x200] sm:$0xff]   ;;  %v3430_v8 = vld [vmem:[%s3702_s8 + $0x8] ss:$52 sps:$4 sm:$0xff]   ;;  %v3447_v13 = vld [vmem:[%s3702_s8 + $0x78] ss:$52 sps:$4 sm:$0xff]  }
  0x1e   : > { %v3444_v9 = vld [vmem:[%s3702_s8 + $0x7c] ss:$52 sps:$4 sm:$0xff]   ;;  %v3438_v10 = vld [vmem:[%s4335_s1 + $0x180] sm:$0xff]   ;;  %v3446_v12 = vld [vmem:[%s4335_s1 + $0x1c8] sm:$0xff]  }
  0x1f   : > { %3343 = vmatpush3.bf16.msra.mxu1 %v3369_v14  ;;  %2853 = vmatpush3.bf16.msra.mxu0 %v3369_v14  ;;  %v3449_v14 = vld [vmem:[%s4335_s1 + $0x248] sm:$0xff]  }
  0x20   : > { %3336 = vmatprep.subr.bf16.mxu1 %v3370_v16  ;;  %2854 = vmatprep.subr.bf16.mxu0 %v3370_v16  ;;  %v3452_v15 = vld [vmem:[%s4335_s1 + $0x208] sm:$0xff]  }
  0x21   : > { %v3448_v16 = vld [vmem:[%s4335_s1 + $0x188] sm:$0xff]  }
  0x23   : > { %3344 = vmatpush3.bf16.msra.mxu1 %v3371_v17  ;;  %2855 = vmatpush3.bf16.msra.mxu0 %v3371_v17  ;;  %v3454_v17 = vld [vmem:[%s3702_s8 + $0xe4] ss:$52 sps:$4 sm:$0xff]  }
  0x24   : > { %2910 = vmatprep.subr.bf16.mxu1 %v3375_v18  ;;  %2980 = vmatprep.subr.bf16.mxu0 %v3386_v20  ;;  %v3443_v18 = vld [vmem:[%s3702_s8 + $0x70] ss:$52 sps:$4 sm:$0xff]  }
  0x25   : > { %v3450_v20 = vld [vmem:[%s3702_s8 + $0xdc] ss:$52 sps:$4 sm:$0xff]  }
  0x26   : > { %1796 = vmatmul.mubr.bf16.vlgmr.msra.gmra.mrb[0].mxu1 %v3372_v19  ;;  %1764 = vmatmul.mubr.bf16.vlgmr.msra.gmra.mrb[0].mxu0 %v3382_v23  ;;  %v3457_v19 = vld [vmem:[%s4335_s1 + $0x1d0] sm:$0xff]  }
  0x27   : > { %2911 = vmatpush3.bf16.msra.mxu1 %v3376_v21  ;;  %1803 = vmatprep.mubr.bf16.mxu1 %v3379_v24  ;;  %v3458_v21 = vld [vmem:[%s4335_s1 + $0x190] sm:$0xff]  }
  0x28   : > { %2912 = vmatprep.subr.bf16.mxu1 %v3377_v22  ;;  %2981 = vmatpush3.bf16.msra.mxu0 %v3388_v25  ;;  %v3461_v22 = vld [vmem:[%s4335_s1 + $0x250] sm:$0xff]   ;;  %v3464_v25 = vld [vmem:[%s3702_s8 + $0x14c] ss:$52 sps:$4 sm:$0xff]  }
  0x29   : > { %2982 = vmatprep.subr.bf16.mxu0 %v3389_v26  ;;  %1771 = vmatprep.mubr.bf16.mxu0 %v3396_v28  ;;  %v3456_v23 = vld [vmem:[%s3702_s8 + $0xe0] ss:$52 sps:$4 sm:$0xff]   ;;  %v3467_v26 = vld [vmem:[%s4335_s1 + $0x1d8] sm:$0xff]  }
  0x2a   : > { %v3463_v24 = vld [vmem:[%s4335_s1 + $0x210] sm:$0xff]   ;;  %v3453_v28 = vld [vmem:[%s3702_s8 + $0xd8] ss:$52 sps:$4 sm:$0xff]  }
  0x2b   : > { %2913 = vmatpush3.bf16.msra.mxu1 %v3378_v27  ;;  %v3468_v27 = vld [vmem:[%s4335_s1 + $0x198] sm:$0xff]  }
  0x2c   : > { %2914 = vmatprep.subr.bf16.mxu1 %v3385_v29  ;;  %2983 = vmatpush3.bf16.msra.mxu0 %v3393_v31  ;;  %v3459_v29 = vld [vmem:[%s3702_s8 + $0x144] ss:$52 sps:$4 sm:$0xff]   ;;  %v3466_v31 = vld [vmem:[%s3702_s8 + $0x148] ss:$52 sps:$4 sm:$0xff]  }
  0x2d   : > { %2984 = vmatprep.subr.bf16.mxu0 %v3399_v34  ;;  %v3477_v34 = vld [vmem:[%s4335_s1 + $0x1e0] sm:$0xff]  }
  0x2e   : > { %1804 = vmatmul.mubr.bf16.gmra.mrb[4].mxu1 %v3381_v30  ;;  %1772 = vmatmul.mubr.bf16.gmra.mrb[4].mxu0 %v3398_v35  ;;  %v3472_v30 = vld [vmem:[%s4335_s1 + $0x258] sm:$0xff]   ;;  %v3478_v35 = vld [vmem:[%s4335_s1 + $0x1a0] sm:$0xff]  }
  0x2f   : > { %2915 = vmatpush3.bf16.msra.mxu1 %v3387_v32  ;;  %1811 = vmatprep.mubr.bf16.mxu1 %v3390_v33  ;;  %v3475_v32 = vld [vmem:[%s4335_s1 + $0x218] sm:$0xff]   ;;  %v3473_v33 = vld [vmem:[%s3702_s8 + $0x1b4] ss:$52 sps:$4 sm:$0xff]  }
  0x30   : > { %2916 = vmatprep.subr.bf16.mxu1 %v3392_v36  ;;  %2985 = vmatpush3.bf16.msra.mxu0 %v3400_v37  ;;  %v3462_v36 = vld [vmem:[%s3702_s8 + $0x140] ss:$52 sps:$4 sm:$0xff]  }
  0x31   : > { %2986 = vmatprep.subr.bf16.mxu0 %v3403_v39  ;;  %1779 = vmatprep.mubr.bf16.mxu0 %v3408_v40  ;;  %v3469_v37 = vld [vmem:[%s3702_s8 + $0x1ac] ss:$52 sps:$4 sm:$0xff]   ;;  %v3482_v40 = vld [vmem:[%s3702_s8 + $0x21c] ss:$52 sps:$4 sm:$0xff]  }
  0x32   : > { %v3484_v39 = vld [vmem:[%s4335_s1 + $0x260] sm:$0xff]  }
  0x33   : > { %2917 = vmatpush3.bf16.msra.mxu1 %v3395_v38  ;;  %v3476_v38 = vld [vmem:[%s3702_s8 + $0x1b0] ss:$52 sps:$4 sm:$0xff]  }
  0x34   : > { %2918 = vmatprep.subr.bf16.mxu1 %v3401_v41  ;;  %2987 = vmatpush3.bf16.msra.mxu0 %v3406_v43  ;;  %v3486_v41 = vld [vmem:[%s4335_s1 + $0x220] sm:$0xff]   ;;  %v3488_v43 = vld [vmem:[%s4335_s1 + $0x1a8] sm:$0xff]  }
  0x35   : > { %2988 = vmatprep.subr.bf16.mxu0 %v3413_v47  ;;  %v3496_v47 = vld [vmem:[%s4335_s1 + $0x228] sm:$0xff]  }
  0x36   : > { %1812 = vmatmul.mubr.bf16.gmra.mrb[8].mxu1 %v3394_v42  ;;  %1780 = vmatmul.mubr.bf16.gmra.mrb[8].mxu0 %v3411_v46  ;;  %v3487_v42 = vld [vmem:[%s4335_s1 + $0x1e8] sm:$0xff]  }
  0x37   : > { %2919 = vmatpush3.bf16.msra.mxu1 %v3402_v44  ;;  %1819 = vmatprep.mubr.bf16.mxu1 %v3404_v45  ;;  %v3471_v44 = vld [vmem:[%s3702_s8 + $0x1a8] ss:$52 sps:$4 sm:$0xff]  }
  0x38   : > { %2920 = vmatprep.subr.bf16.mxu1 %v3410_v48  ;;  %2989 = vmatpush3.bf16.msra.mxu0 %v3414_v49  ;;  %v3479_v45 = vld [vmem:[%s3702_s8 + $0x214] ss:$52 sps:$4 sm:$0xff]   ;;  %v3485_v49 = vld [vmem:[%s3702_s8 + $0x218] ss:$52 sps:$4 sm:$0xff]  }
  0x39   : > { %2990 = vmatprep.subr.bf16.mxu0 %v3416_v50  ;;  %1787 = vmatprep.mubr.bf16.mxu0 %v3422_v57  ;;  %v3495_v46 = vld [vmem:[%s4335_s1 + $0x268] sm:$0xff]   ;;  %v3497_v48 = vld [vmem:[%s4335_s1 + $0x1f0] sm:$0xff]   ;;  %v3492_v50 = vld [vmem:[%s3702_s8 + $0x284] ss:$52 sps:$4 sm:$0xff]  }
  0x3a   : > { %v3509_v57 = vld [vmem:[%s4335_s1 + $0x1f8] sm:$0xff]  }
  0x3b   : > { %2921 = vmatpush3.bf16.msra.mxu1 %v3412_v51  ;;  %v3500_v51 = vld [vmem:[%s4335_s1 + $0x1b0] sm:$0xff]  }
  0x3c   : > { %2922 = vmatprep.subr.bf16.mxu1 %v3415_v53  ;;  %2991 = vmatpush3.bf16.msra.mxu0 %v3420_v54  ;;  %v3505_v53 = vld [vmem:[%s4335_s1 + $0x270] sm:$0xff]  }
  0x3d   : > { %2992 = vmatprep.subr.bf16.mxu0 %v3425_v59  ;;  %v3506_v54 = vld [vmem:[%s4335_s1 + $0x230] sm:$0xff]   ;;  %v3502_v59 = vld [vmem:[%s3702_s8 + $0x2ec] ss:$52 sps:$4 sm:$0xff]  }
  0x3e   : > { %1820 = vmatmul.mubr.bf16.gmra.mrb[12].mxu1 %v3407_v52  ;;  %1788 = vmatmul.mubr.bf16.gmra.mrb[12].mxu0 %v3424_v58  ;;  %v3481_v52 = vld [vmem:[%s3702_s8 + $0x210] ss:$52 sps:$4 sm:$0xff]   ;;  %v3511_v58 = vld [vmem:[%s4335_s1 + $0x1b8] sm:$0xff]  }
  0x3f   : > { %1827 = vmatprep.mubr.bf16.mxu1 %v3417_v55  ;;  %2923 = vmatpush3.bf16.msra.mxu1 %v3419_v56  ;;  %v3489_v55 = vld [vmem:[%s3702_s8 + $0x27c] ss:$52 sps:$4 sm:$0xff]   ;;  %v3494_v56 = vld [vmem:[%s3702_s8 + $0x280] ss:$52 sps:$4 sm:$0xff]  }
  0x40   : > { %2924 = vmatprep.subr.bf16.mxu1 %v3426_v60  ;;  %2993 = vmatpush3.bf16.msra.mxu0 %v3427_v61  ;;  %v3515_v60 = vld [vmem:[%s4335_s1 + $0x278] sm:$0xff]  }
  0x41   : > { %2994 = vmatprep.subr.bf16.mxu0 %v3429_v62  ;;  %1973 = vmatprep.mubr.bf16.mxu0 %v3437_v5  ;;  %v3516_v61 = vld [vmem:[%s4335_s1 + $0x238] sm:$0xff]   ;;  %v3507_v5 = vld [vmem:[%s3702_s8 + $0x34c] ss:$52 sps:$4 sm:$0xff]  }
  0x42   : > { %v3491_v62 = vld [vmem:[%s3702_s8 + $0x278] ss:$52 sps:$4 sm:$0xff]  }
  0x43   : > { %2925 = vmatpush3.bf16.msra.mxu1 %v3428_v63  ;;  %v3520_v63 = vld [vmem:[%s4335_s1 + $0x2c0] sm:$0xff]  }
  0x44   : > { %2995 = vmatpush3.bf16.msra.mxu0 %v3433_v2  ;;  %3050 = vmatprep.subr.bf16.mxu1 %v3434_v3  ;;  %v3504_v2 = vld [vmem:[%s3702_s8 + $0x2e8] ss:$52 sps:$4 sm:$0xff]  }
  0x45   : > { %3120 = vmatprep.subr.bf16.mxu0 %v3439_v6  ;;  %v3512_v3 = vld [vmem:[%s3702_s8 + $0x354] ss:$52 sps:$4 sm:$0xff]   ;;  %v3514_v6 = vld [vmem:[%s3702_s8 + $0x350] ss:$52 sps:$4 sm:$0xff]  }
  0x46   : > { %1828 = vmatmul.mubr.bf16.gmra.mrb[16].mxu1 %v3421_v0  ;;  %v3639_v0 = vmov 0.0  }
  0x47   : > { %1868 = vmatprep.mubr.bf16.mxu1 %v3432_v1  ;;  %1974 = vmatmul.mubr.bf16.vlgmr.msra.gmra.mrb[16].mxu0 %v3435_v4  ;;  %v3498_v1 = vld [vmem:[%s3702_s8 + $0x2e4] ss:$52 sps:$4 sm:$0xff]   ;;  %v3501_v4 = vld [vmem:[%s3702_s8 + $0x2e0] ss:$52 sps:$4 sm:$0xff]  }
  0x48   : > { %3121 = vmatpush3.bf16.msra.mxu0 %v3440_v7  ;;  %1981 = vmatprep.mubr.bf16.mxu0 %v3444_v9  ;;  %v3523_v7 = vld [vmem:[%s3702_s8 + $0x24] ss:$52 sps:$4 sm:$0xff]   ;;  %v3519_v9 = vld [vmem:[%s3702_s8 + $0x1c] ss:$52 sps:$4 sm:$0xff]  }
  0x49   : > { %3122 = vmatprep.subr.bf16.mxu0 %v3449_v14  ;;  %v3536_v14 = vld [vmem:[%s4335_s1 + $0x308] sm:$0xff]  }
  0x4c   : > { %3123 = vmatpush3.bf16.msra.mxu0 %v3452_v15  ;;  %v3524_v15 = vld [vmem:[%s4335_s1 + $0x280] sm:$0xff]  }
  0x4d   : > { %3124 = vmatprep.subr.bf16.mxu0 %v3461_v22  ;;  %v3528_v22 = vld [vmem:[%s3702_s8 + $0x80] ss:$52 sps:$4 sm:$0xff]  }
  0x4e   : > { %1869 = vmatmul.mubr.bf16.vlgmr.msra.gmra.mrb[20].mxu1 %v3430_v8  ;;  %v3510_v8 = vld [vmem:[%s3702_s8 + $0x348] ss:$52 sps:$4 sm:$0xff]  }
  0x4f   : > { %3051 = vmatpush3.bf16.msra.mxu1 %v3438_v10  ;;  %1876 = vmatprep.mubr.bf16.mxu1 %v3441_v11  ;;  %v3521_v10 = vld [vmem:[%s3702_s8 + $0x20] ss:$52 sps:$4 sm:$0xff]  }
  0x50   : > { %3052 = vmatprep.subr.bf16.mxu1 %v3446_v12  ;;  %1982 = vmatmul.mubr.bf16.gmra.mrb[20].mxu0 %v3447_v13  ;;  %v3525_v11 = vld [vmem:[%s4335_s1 + $0x300] sm:$0xff]   ;;  %v3517_v13 = vld [vmem:[%s3702_s8 + $0x18] ss:$52 sps:$4 sm:$0xff]  }
  0x51   : > { %1989 = vmatprep.mubr.bf16.mxu0 %v3454_v17  ;;  %3125 = vmatpush3.bf16.msra.mxu0 %v3463_v24  ;;  %v3529_v12 = vld [vmem:[%s3702_s8 + $0x8c] ss:$52 sps:$4 sm:$0xff]  }
  0x52   : > { %3126 = vmatprep.subr.bf16.mxu0 %v3472_v30  ;;  %v3531_v17 = vld [vmem:[%s4335_s1 + $0x2c8] sm:$0xff]   ;;  %v3567_v30 = vld [vmem:[%s4335_s1 + $0x320] sm:$0xff]  }
  0x53   : > { %3053 = vmatpush3.bf16.msra.mxu1 %v3448_v16  ;;  %v3526_v16 = vld [vmem:[%s3702_s8 + $0x84] ss:$52 sps:$4 sm:$0xff]   ;;  %v3534_v24 = vld [vmem:[%s3702_s8 + $0xec] ss:$52 sps:$4 sm:$0xff]  }
  0x54   : > { %3054 = vmatprep.subr.bf16.mxu1 %v3457_v19  ;;  %v3538_v19 = vld [vmem:[%s3702_s8 + $0xf4] ss:$52 sps:$4 sm:$0xff]  }
  0x55   : > { %3127 = vmatpush3.bf16.msra.mxu0 %v3475_v32  ;;  %v3537_v32 = vld [vmem:[%s3702_s8 + $0xe8] ss:$52 sps:$4 sm:$0xff]  }
  0x56   : > { %1877 = vmatmul.mubr.bf16.gmra.mrb[24].mxu1 %v3443_v18  ;;  %3128 = vmatprep.subr.bf16.mxu0 %v3484_v39  ;;  %v3532_v18 = vld [vmem:[%s3702_s8 + $0x88] ss:$52 sps:$4 sm:$0xff]  }
  0x57   : > { %1884 = vmatprep.mubr.bf16.mxu1 %v3450_v20  ;;  %3055 = vmatpush3.bf16.msra.mxu1 %v3458_v21  ;;  %v3546_v20 = vld [vmem:[%s4335_s1 + $0x310] sm:$0xff]   ;;  %v3533_v21 = vld [vmem:[%s4335_s1 + $0x288] sm:$0xff]  }
  0x58   : > { %1990 = vmatmul.mubr.bf16.gmra.mrb[24].mxu0 %v3456_v23  ;;  %3056 = vmatprep.subr.bf16.mxu1 %v3467_v26  ;;  %v3541_v23 = vld [vmem:[%s4335_s1 + $0x2d0] sm:$0xff]   ;;  %v3568_v39 = vld [vmem:[%s4335_s1 + $0x2e8] sm:$0xff]  }
  0x59   : > { %1997 = vmatprep.mubr.bf16.mxu0 %v3464_v25  ;;  %3129 = vmatpush3.bf16.msra.mxu0 %v3486_v41  ;;  %v3557_v25 = vld [vmem:[%s4335_s1 + $0x318] sm:$0xff]   ;;  %v3540_v26 = vld [vmem:[%s3702_s8 + $0xf0] ss:$52 sps:$4 sm:$0xff]   ;;  %v3569_v41 = vld [vmem:[%s4335_s1 + $0x2a8] sm:$0xff]  }
  0x5a   : > { %3130 = vmatprep.subr.bf16.mxu0 %v3495_v46  ;;  %v3558_v46 = vld [vmem:[%s3702_s8 + $0x1c0] ss:$52 sps:$4 sm:$0xff]  }
  0x5b   : > { %3057 = vmatpush3.bf16.msra.mxu1 %v3468_v27  ;;  %v3542_v27 = vld [vmem:[%s4335_s1 + $0x290] sm:$0xff]  }
  0x5c   : > { %3058 = vmatprep.subr.bf16.mxu1 %v3477_v34  ;;  %v3543_v34 = vld [vmem:[%s3702_s8 + $0x154] ss:$52 sps:$4 sm:$0xff]  }
  0x5d   : > { %3131 = vmatpush3.bf16.msra.mxu0 %v3496_v47  ;;  %v3580_v47 = vld [vmem:[%s4335_s1 + $0x2b0] sm:$0xff]  }
  0x5e   : > { %1885 = vmatmul.mubr.bf16.gmra.mrb[28].mxu1 %v3453_v28  ;;  %3132 = vmatprep.subr.bf16.mxu0 %v3505_v53  ;;  %v3547_v28 = vld [vmem:[%s3702_s8 + $0x15c] ss:$52 sps:$4 sm:$0xff]  }
  0x5f   : > { %1892 = vmatprep.mubr.bf16.mxu1 %v3459_v29  ;;  %3059 = vmatpush3.bf16.msra.mxu1 %v3478_v35  ;;  %v3550_v29 = vld [vmem:[%s4335_s1 + $0x2d8] sm:$0xff]   ;;  %v3576_v35 = vld [vmem:[%s4335_s1 + $0x328] sm:$0xff]  }
  0x60   : > { %1998 = vmatmul.mubr.bf16.gmra.mrb[28].mxu0 %v3466_v31  ;;  %3060 = vmatprep.subr.bf16.mxu1 %v3487_v42  ;;  %v3551_v31 = vld [vmem:[%s4335_s1 + $0x298] sm:$0xff]   ;;  %v3545_v42 = vld [vmem:[%s3702_s8 + $0x150] ss:$52 sps:$4 sm:$0xff]  }
  0x61   : > { %2005 = vmatprep.mubr.bf16.mxu0 %v3473_v33  ;;  %3133 = vmatpush3.bf16.msra.mxu0 %v3506_v54  ;;  %v3559_v33 = vld [vmem:[%s4335_s1 + $0x2e0] sm:$0xff]   ;;  %v3566_v53 = vld [vmem:[%s3702_s8 + $0x228] ss:$52 sps:$4 sm:$0xff]  }
  0x62   : > { %3134 = vmatprep.subr.bf16.mxu0 %v3515_v60  ;;  %v3573_v54 = vld [vmem:[%s3702_s8 + $0x294] ss:$52 sps:$4 sm:$0xff]  }
  0x63   : > { %3061 = vmatpush3.bf16.msra.mxu1 %v3488_v43  ;;  %v3577_v43 = vld [vmem:[%s4335_s1 + $0x2f0] sm:$0xff]  }
  0x64   : > { %3062 = vmatprep.subr.bf16.mxu1 %v3497_v48  ;;  %v3588_v48 = vld [vmem:[%s4335_s1 + $0x2f8] sm:$0xff]   ;;  %v3578_v60 = vld [vmem:[%s3702_s8 + $0x2f4] ss:$52 sps:$4 sm:$0xff]  }
  0x65   : > { %3135 = vmatpush3.bf16.msra.mxu0 %v3516_v61  ;;  %v3584_v61 = vld [vmem:[%s3702_s8 + $0x2f8] ss:$52 sps:$4 sm:$0xff]  }
  0x66   : > { %1893 = vmatmul.mubr.bf16.gmra.mrb[32].mxu1 %v3462_v36  ;;  %3277 = vmatprep.subr.bf16.mxu0 %v3639_v0  ;;  %v3549_v36 = vld [vmem:[%s3702_s8 + $0x158] ss:$52 sps:$4 sm:$0xff]  }
  0x67   : > { %1900 = vmatprep.mubr.bf16.mxu1 %v3469_v37  ;;  %3063 = vmatpush3.bf16.msra.mxu1 %v3500_v51  ;;  %v3560_v37 = vld [vmem:[%s4335_s1 + $0x2a0] sm:$0xff]   ;;  %v3554_v51 = vld [vmem:[%s3702_s8 + $0x1b8] ss:$52 sps:$4 sm:$0xff]  }
  0x68   : > { %2006 = vmatmul.mubr.bf16.gmra.mrb[32].mxu0 %v3476_v38  ;;  %3064 = vmatprep.subr.bf16.mxu1 %v3509_v57  ;;  %v3555_v38 = vld [vmem:[%s3702_s8 + $0x1c4] ss:$52 sps:$4 sm:$0xff]  }
  0x69   : > { %2013 = vmatprep.mubr.bf16.mxu0 %v3482_v40  ;;  %v3585_v40 = vld [vmem:[%s4335_s1 + $0x330] sm:$0xff]  }
  0x6a   : > { %v3575_v57 = vld [vmem:[%s3702_s8 + $0x290] ss:$52 sps:$4 sm:$0xff]  }
  0x6b   : > { %3065 = vmatpush3.bf16.msra.mxu1 %v3511_v58  ;;  %v3582_v58 = vld [vmem:[%s3702_s8 + $0x2fc] ss:$52 sps:$4 sm:$0xff]  }
  0x6c   : > { %3190 = vmatprep.subr.bf16.mxu1 %v3520_v63  ;;  %v3581_v63 = vld [vmem:[%s3702_s8 + $0x2f0] ss:$52 sps:$4 sm:$0xff]  }
  0x6e   : > { %1901 = vmatmul.mubr.bf16.gmra.mrb[36].mxu1 %v3471_v44  ;;  %v3594_v44 = vld [vmem:[%s4335_s1 + $0x338] sm:$0xff]  }
  0x6f   : > { %1908 = vmatprep.mubr.bf16.mxu1 %v3479_v45  ;;  %v3552_v45 = vld [vmem:[%s3702_s8 + $0x1bc] ss:$52 sps:$4 sm:$0xff]  }
  0x70   : > { %2014 = vmatmul.mubr.bf16.gmra.mrb[36].mxu0 %v3485_v49  ;;  %v3564_v49 = vld [vmem:[%s3702_s8 + $0x22c] ss:$52 sps:$4 sm:$0xff]  }
  0x71   : > { %2021 = vmatprep.mubr.bf16.mxu0 %v3492_v50  ;;  %v3590_v50 = vld [vmem:[%s4335_s1 + $0x2b8] sm:$0xff]  }
  0x76   : > { %1909 = vmatmul.mubr.bf16.gmra.mrb[40].mxu1 %v3481_v52  ;;  %v3561_v52 = vld [vmem:[%s3702_s8 + $0x224] ss:$52 sps:$4 sm:$0xff]  }
  0x77   : > { %1916 = vmatprep.mubr.bf16.mxu1 %v3489_v55  ;;  %v3563_v55 = vld [vmem:[%s3702_s8 + $0x220] ss:$52 sps:$4 sm:$0xff]  }
  0x78   : > { %2022 = vmatmul.mubr.bf16.gmra.mrb[40].mxu0 %v3494_v56  ;;  %v3570_v56 = vld [vmem:[%s3702_s8 + $0x28c] ss:$52 sps:$4 sm:$0xff]  }
  0x79   : > { %2029 = vmatprep.mubr.bf16.mxu0 %v3502_v59  ;;  %v3572_v59 = vld [vmem:[%s3702_s8 + $0x288] ss:$52 sps:$4 sm:$0xff]  }
  0x7e   : > { %1917 = vmatmul.mubr.bf16.gmra.mrb[44].mxu1 %v3491_v62  ;;  %v3591_v62 = vld [vmem:[%s3702_s8 + $0x364] ss:$52 sps:$4 sm:$0xff]  }
  0x7f   : > { %1924 = vmatprep.mubr.bf16.mxu1 %v3498_v1  ;;  %v3586_v1 = vld [vmem:[%s3702_s8 + $0x35c] ss:$52 sps:$4 sm:$0xff]  }
  0x80   : > { %2030 = vmatmul.mubr.bf16.gmra.mrb[44].mxu0 %v3504_v2  ;;  %v3593_v2 = vld [vmem:[%s3702_s8 + $0x360] ss:$52 sps:$4 sm:$0xff]  }
  0x81   : > { %2037 = vmatprep.mubr.bf16.mxu0 %v3512_v3  ;;  %v3589_v3 = vld [vmem:[%s3702_s8 + $0x358] ss:$52 sps:$4 sm:$0xff]  }
  0x86   : > { %1925 = vmatmul.mubr.bf16.gmra.mrb[48].mxu1 %v3501_v4  ;;  %v3597_v4 = vld [vmem:[%s3702_s8 + $0x2c] ss:$52 sps:$4 sm:$0xff]  }
  0x87   : > { %1932 = vmatprep.mubr.bf16.mxu1 %v3507_v5  ;;  %v3598_v5 = vld [vmem:[%s3702_s8 + $0x30] ss:$52 sps:$4 sm:$0xff]  }
  0x88   : > { %2038 = vmatmul.mubr.bf16.gmra.mrb[48].mxu0 %v3514_v6  ;;  %v3595_v6 = vld [vmem:[%s3702_s8 + $0x28] ss:$52 sps:$4 sm:$0xff]  }
  0x89   : > { %2183 = vmatprep.mubr.bf16.mxu0 %v3523_v7  ;;  %v3599_v7 = vld [vmem:[%s3702_s8 + $0x94] ss:$52 sps:$4 sm:$0xff]  }
  0x8e   : > { %1933 = vmatmul.mubr.bf16.gmra.mrb[52].mxu1 %v3510_v8  ;;  %v3602_v8 = vld [vmem:[%s3702_s8 + $0x98] ss:$52 sps:$4 sm:$0xff]  }
  0x8f   : > { %2078 = vmatprep.mubr.bf16.mxu1 %v3519_v9  ;;  %v3601_v9 = vld [vmem:[%s3702_s8 + $0x90] ss:$52 sps:$4 sm:$0xff]  }
  0x90   : > { %2184 = vmatmul.mubr.bf16.vlgmr.msra.gmra.mrb[52].mxu0 %v3521_v10  ;;  %v3603_v10 = vld [vmem:[%s3702_s8 + $0xfc] ss:$52 sps:$4 sm:$0xff]  }
  0x91   : > { %3278 = vmatpush3.bf16.msra.mxu0 %v3525_v11  ;;  %2191 = vmatprep.mubr.bf16.mxu0 %v3529_v12  ;;  %v3606_v11 = vld [vmem:[%s3702_s8 + $0x100] ss:$52 sps:$4 sm:$0xff]   ;;  %v3605_v12 = vld [vmem:[%s3702_s8 + $0xf8] ss:$52 sps:$4 sm:$0xff]  }
  0x92   : > { %3279 = vmatprep.subr.bf16.mxu0 %v3639_v0 }
  0x95   : > { %3280 = vmatpush3.bf16.msra.mxu0 %v3536_v14  ;;  %v3610_v14 = vld [vmem:[%s3702_s8 + $0x168] ss:$52 sps:$4 sm:$0xff]  }
  0x96   : > { %2079 = vmatmul.mubr.bf16.vlgmr.msra.gmra.mrb[56].mxu1 %v3517_v13  ;;  %3281 = vmatprep.subr.bf16.mxu0 %v3639_v0  ;;  %v3607_v13 = vld [vmem:[%s3702_s8 + $0x164] ss:$52 sps:$4 sm:$0xff]  }
  0x97   : > { %3191 = vmatpush3.bf16.msra.mxu1 %v3524_v15  ;;  %2086 = vmatprep.mubr.bf16.mxu1 %v3526_v16  ;;  %v3609_v15 = vld [vmem:[%s3702_s8 + $0x160] ss:$52 sps:$4 sm:$0xff]  }
  0x98   : > { %3192 = vmatprep.subr.bf16.mxu1 %v3531_v17  ;;  %2192 = vmatmul.mubr.bf16.gmra.mrb[56].mxu0 %v3532_v18  ;;  %v3611_v16 = vld [vmem:[%s3702_s8 + $0x1cc] ss:$52 sps:$4 sm:$0xff]   ;;  %v3614_v17 = vld [vmem:[%s3702_s8 + $0x1d0] ss:$52 sps:$4 sm:$0xff]  }
  0x99   : > { %2199 = vmatprep.mubr.bf16.mxu0 %v3538_v19  ;;  %3282 = vmatpush3.bf16.msra.mxu0 %v3546_v20 }
  0x9a   : > { %3283 = vmatprep.subr.bf16.mxu0 %v3639_v0 }
  0x9b   : > { %3193 = vmatpush3.bf16.msra.mxu1 %v3533_v21  ;;  %v3613_v21 = vld [vmem:[%s3702_s8 + $0x1c8] ss:$52 sps:$4 sm:$0xff]  }
  0x9c   : > { %3194 = vmatprep.subr.bf16.mxu1 %v3541_v23 }
  0x9d   : > { %3284 = vmatpush3.bf16.msra.mxu0 %v3557_v25 }
  0x9e   : > { %2087 = vmatmul.mubr.bf16.gmra.mrb[60].mxu1 %v3528_v22  ;;  %3285 = vmatprep.subr.bf16.mxu0 %v3639_v0 }
  0x9f   : > { %2094 = vmatprep.mubr.bf16.mxu1 %v3534_v24  ;;  %3195 = vmatpush3.bf16.msra.mxu1 %v3542_v27 }
  0xa0   : > { %2200 = vmatmul.mubr.bf16.gmra.mrb[60].mxu0 %v3540_v26  ;;  %3196 = vmatprep.subr.bf16.mxu1 %v3550_v29  ;;  %v3615_v26 = vld [vmem:[%s3702_s8 + $0x234] ss:$52 sps:$4 sm:$0xff]  }
  0xa1   : > { %2207 = vmatprep.mubr.bf16.mxu0 %v3547_v28  ;;  %3286 = vmatpush3.bf16.msra.mxu0 %v3567_v30  ;;  %v3618_v30 = vld [vmem:[%s3702_s8 + $0x238] ss:$52 sps:$4 sm:$0xff]  }
  0xa2   : > { %3287 = vmatprep.subr.bf16.mxu0 %v3639_v0 }
  0xa3   : > { %3197 = vmatpush3.bf16.msra.mxu1 %v3551_v31 }
  0xa4   : > { %3198 = vmatprep.subr.bf16.mxu1 %v3559_v33 }
  0xa5   : > { %3288 = vmatpush3.bf16.msra.mxu0 %v3576_v35 }
  0xa6   : > { %2095 = vmatmul.mubr.bf16.gmra.mrb[64].mxu1 %v3537_v32  ;;  %3289 = vmatprep.subr.bf16.mxu0 %v3639_v0 }
  0xa7   : > { %2102 = vmatprep.mubr.bf16.mxu1 %v3543_v34  ;;  %3199 = vmatpush3.bf16.msra.mxu1 %v3560_v37 }
  0xa8   : > { %2208 = vmatmul.mubr.bf16.gmra.mrb[64].mxu0 %v3549_v36  ;;  %3200 = vmatprep.subr.bf16.mxu1 %v3568_v39  ;;  %v3617_v36 = vld [vmem:[%s3702_s8 + $0x230] ss:$52 sps:$4 sm:$0xff]  }
  0xa9   : > { %2215 = vmatprep.mubr.bf16.mxu0 %v3555_v38  ;;  %3290 = vmatpush3.bf16.msra.mxu0 %v3585_v40 }
  0xaa   : > { %3291 = vmatprep.subr.bf16.mxu0 %v3639_v0 }
  0xab   : > { %3201 = vmatpush3.bf16.msra.mxu1 %v3569_v41  ;;  %v3619_v41 = vld [vmem:[%s3702_s8 + $0x29c] ss:$52 sps:$4 sm:$0xff]  }
  0xac   : > { %3202 = vmatprep.subr.bf16.mxu1 %v3577_v43 }
  0xad   : > { %3292 = vmatpush3.bf16.msra.mxu0 %v3594_v44 }
  0xae   : > { %2103 = vmatmul.mubr.bf16.gmra.mrb[68].mxu1 %v3545_v42 }
  0xaf   : > { %2110 = vmatprep.mubr.bf16.mxu1 %v3552_v45  ;;  %3203 = vmatpush3.bf16.msra.mxu1 %v3580_v47  ;;  %v3622_v45 = vld [vmem:[%s3702_s8 + $0x2a0] ss:$52 sps:$4 sm:$0xff]  }
  0xb0   : > { %2216 = vmatmul.mubr.bf16.gmra.mrb[68].mxu0 %v3558_v46  ;;  %3204 = vmatprep.subr.bf16.mxu1 %v3588_v48 }
  0xb1   : > { %2223 = vmatprep.mubr.bf16.mxu0 %v3564_v49 }
  0xb3   : > { %3205 = vmatpush3.bf16.msra.mxu1 %v3590_v50 }
  0xb6   : > { %2111 = vmatmul.mubr.bf16.gmra.mrb[72].mxu1 %v3554_v51  ;;  %v3621_v51 = vld [vmem:[%s3702_s8 + $0x298] ss:$52 sps:$4 sm:$0xff]  }
  0xb7   : > { %2118 = vmatprep.mubr.bf16.mxu1 %v3561_v52 }
  0xb8   : > { %2224 = vmatmul.mubr.bf16.gmra.mrb[72].mxu0 %v3566_v53 }
  0xb9   : > { %2231 = vmatprep.mubr.bf16.mxu0 %v3573_v54 }
  0xbe   : > { %2119 = vmatmul.mubr.bf16.gmra.mrb[76].mxu1 %v3563_v55 }
  0xbf   : > { %2126 = vmatprep.mubr.bf16.mxu1 %v3570_v56  ;;  %v3623_v56 = vld [vmem:[%s3702_s8 + $0x304] ss:$52 sps:$4 sm:$0xff]  }
  0xc0   : > { %2232 = vmatmul.mubr.bf16.gmra.mrb[76].mxu0 %v3575_v57 }
  0xc1   : > { %2239 = vmatprep.mubr.bf16.mxu0 %v3582_v58 }
  0xc6   : > { %2127 = vmatmul.mubr.bf16.gmra.mrb[80].mxu1 %v3572_v59 }
  0xc7   : > { %2134 = vmatprep.mubr.bf16.mxu1 %v3578_v60  ;;  %v3626_v60 = vld [vmem:[%s3702_s8 + $0x308] ss:$52 sps:$4 sm:$0xff]  }
  0xc8   : > { %2240 = vmatmul.mubr.bf16.gmra.mrb[80].mxu0 %v3584_v61 }
  0xc9   : > { %2247 = vmatprep.mubr.bf16.mxu0 %v3591_v62 }
  0xce   : > { %2135 = vmatmul.mubr.bf16.gmra.mrb[84].mxu1 %v3581_v63 }
  0xcf   : > { %2142 = vmatprep.mubr.bf16.mxu1 %v3586_v1 }
  0xd0   : > { %2248 = vmatmul.mubr.bf16.gmra.mrb[84].mxu0 %v3593_v2 }
  0xd1   : > { %3293 = vmatprep.mubr.msk.bf16.mxu0 %vm3640_vm0, %v3639_v0 }
  0xd6   : > { %2143 = vmatmul.mubr.bf16.gmra.mrb[88].mxu1 %v3589_v3  ;;  %v3625_v3 = vld [vmem:[%s3702_s8 + $0x300] ss:$52 sps:$4 sm:$0xff]  }
  0xd7   : > { %2288 = vmatprep.mubr.bf16.mxu1 %v3597_v4 }
  0xd8   : > { %3294 = vmatmul.mubr.bf16.vlgmr.msra.gmra.mrb[88].mxu0 %v3598_v5 }
  0xd9   : > { %3297 = vmatprep.mubr.msk.bf16.mxu0 %vm3640_vm0, %v3639_v0 }
  0xde   : > { %2289 = vmatmul.mubr.bf16.vlgmr.msra.gmra.mrb[92].mxu1 %v3595_v6 }
  0xdf   : > { %2296 = vmatprep.mubr.bf16.mxu1 %v3599_v7 }
  0xe0   : > { %3298 = vmatmul.mubr.bf16.gmra.mrb[92].mxu0 %v3602_v8  ;;  %v3627_v8 = vld [vmem:[%s3702_s8 + $0x36c] ss:$52 sps:$4 sm:$0xff]  }
  0xe1   : > { %3301 = vmatprep.mubr.msk.bf16.mxu0 %vm3640_vm0, %v3639_v0 }
  0xe6   : > { %2297 = vmatmul.mubr.bf16.gmra.mrb[96].mxu1 %v3601_v9 }
  0xe7   : > { %2304 = vmatprep.mubr.bf16.mxu1 %v3603_v10 }
  0xe8   : > { %3302 = vmatmul.mubr.bf16.gmra.mrb[96].mxu0 %v3606_v11 }
  0xe9   : > { %3305 = vmatprep.mubr.msk.bf16.mxu0 %vm3640_vm0, %v3639_v0 }
  0xee   : > { %2305 = vmatmul.mubr.bf16.gmra.mrb[100].mxu1 %v3605_v12  ;;  %v3630_v12 = vld [vmem:[%s3702_s8 + $0x370] ss:$52 sps:$4 sm:$0xff]  }
  0xef   : > { %2312 = vmatprep.mubr.bf16.mxu1 %v3607_v13 }
  0xf0   : > { %3306 = vmatmul.mubr.bf16.gmra.mrb[100].mxu0 %v3610_v14 }
  0xf1   : > { %3309 = vmatprep.mubr.msk.bf16.mxu0 %vm3640_vm0, %v3639_v0 }
  0xf6   : > { %2313 = vmatmul.mubr.bf16.gmra.mrb[104].mxu1 %v3609_v15 }
  0xf7   : > { %2320 = vmatprep.mubr.bf16.mxu1 %v3611_v16  ;;  %v3629_v16 = vld [vmem:[%s3702_s8 + $0x368] ss:$52 sps:$4 sm:$0xff]   ;;  %s2839_s8 = sshll.u32 %s4339_s13, 3 }
  0xf8   : > { %3310 = vmatmul.mubr.bf16.gmra.mrb[104].mxu0 %v3614_v17  ;;  %s4311_s11 = scalar_lea.vmem %s4337_s3, %s2839_s8 }
  0xf9   : > { %v2880_v18 = vpop.f32.mrb[0].mxu1  ;;  %v2856_v19 = vpop.f32.mrb[0].mxu0  ;;  %3313 = vmatprep.mubr.msk.bf16.mxu0 %vm3640_vm0, %v3639_v0 }
  0xfa   : > { %v2881_v20 = vpop.f32.mrb[1].mxu1  ;;  %v2857_v22 = vpop.f32.mrb[1].mxu0 }
  0xfb   : > { %v4114_v23 = vadd.f32 %v2881_v20, %v2880_v18  ;;  %v2883_v24 = vpop.f32.mrb[2].mxu1  ;;  %v4116_v25 = vadd.f32 %v2857_v22, %v2856_v19  ;;  %v2859_v27 = vpop.f32.mrb[2].mxu0 }
  0xfc   : > { %v2884_v28 = vpop.f32.mrb[3].mxu1  ;;  %v2860_v29 = vpop.f32.mrb[3].mxu0 }
  0xfd   : > { %v4120_v31 = vadd.f32 %v2884_v28, %v2883_v24  ;;  %v4122_v32 = vadd.f32 %v2860_v29, %v2859_v27 }
  0xfe   : > { %2321 = vmatmul.mubr.bf16.gmra.mrb[108].mxu1 %v3613_v21 }
  0xff   : > { %2328 = vmatprep.mubr.bf16.mxu1 %v3615_v26 }
 0x100   : > { %3314 = vmatmul.mubr.bf16.gmra.mrb[108].mxu0 %v3618_v30  ;;  %v4171_v30 = vld [vmem:[%s4336_s2] ss:$0 sm:$0xff] }
 0x101   : > { %v2886_v33 = vpop.f32.mrb[4].mxu1  ;;  %v2862_v34 = vpop.f32.mrb[4].mxu0  ;;  %3317 = vmatprep.mubr.msk.bf16.mxu0 %vm3640_vm0, %v3639_v0 }
 0x102   : > { %v2887_v35 = vpop.f32.mrb[5].mxu1  ;;  %v2863_v37 = vpop.f32.mrb[5].mxu0 }
 0x103   : > { %v4127_v38 = vadd.f32 %v2887_v35, %v2886_v33  ;;  %v2889_v39 = vpop.f32.mrb[6].mxu1  ;;  %v4129_v40 = vadd.f32 %v2863_v37, %v2862_v34  ;;  %v2865_v42 = vpop.f32.mrb[6].mxu0  ;;  %v1766_v34 = vadd.f32 %v4116_v25, %v4171_v30 }
 0x104   : > { %v2890_v43 = vpop.f32.mrb[7].mxu1  ;;  %v2866_v44 = vpop.f32.mrb[7].mxu0 }
 0x105   : > { %v4133_v46 = vadd.f32 %v2890_v43, %v2889_v39  ;;  %v4135_v47 = vadd.f32 %v2866_v44, %v2865_v42  ;;  %v1769_v42 = vadd.f32 %v4122_v32, %v4171_v30 }
 0x106   : > { %2329 = vmatmul.mubr.bf16.gmra.mrb[112].mxu1 %v3617_v36 }
 0x107   : > { %2336 = vmatprep.mubr.bf16.mxu1 %v3619_v41 }
 0x108   : > { %3318 = vmatmul.mubr.bf16.gmra.mrb[112].mxu0 %v3622_v45 }
 0x109   : > { %v2892_v48 = vpop.f32.mrb[8].mxu1  ;;  %v2868_v49 = vpop.f32.mrb[8].mxu0  ;;  %3321 = vmatprep.mubr.msk.bf16.mxu0 %vm3640_vm0, %v3639_v0 }
 0x10a   : > { %v2893_v50 = vpop.f32.mrb[9].mxu1  ;;  %v2869_v52 = vpop.f32.mrb[9].mxu0 }
 0x10b   : > { %v4140_v53 = vadd.f32 %v2893_v50, %v2892_v48  ;;  %v2895_v54 = vpop.f32.mrb[10].mxu1  ;;  %v4142_v55 = vadd.f32 %v2869_v52, %v2868_v49  ;;  %v2871_v57 = vpop.f32.mrb[10].mxu0 }
 0x10c   : > { %v2896_v58 = vpop.f32.mrb[11].mxu1  ;;  %v2872_v59 = vpop.f32.mrb[11].mxu0 }
 0x10d   : > { %v4146_v61 = vadd.f32 %v2896_v58, %v2895_v54  ;;  %v4148_v62 = vadd.f32 %v2872_v59, %v2871_v57  ;;  %v1774_v57 = vadd.f32 %v4129_v40, %v4171_v30 }
 0x10e   : > { %2337 = vmatmul.mubr.bf16.gmra.mrb[116].mxu1 %v3621_v51 }
 0x10f   : > { %2344 = vmatprep.mubr.bf16.mxu1 %v3623_v56 }
 0x110   : > { %3322 = vmatmul.mubr.bf16.gmra.mrb[116].mxu0 %v3626_v60 }
 0x111   : > { %v2898_v63 = vpop.f32.mrb[12].mxu1  ;;  %v2874_v1 = vpop.f32.mrb[12].mxu0  ;;  %3325 = vmatprep.mubr.msk.bf16.mxu0 %vm3640_vm0, %v3639_v0 }
 0x112   : > { %v2899_v2 = vpop.f32.mrb[13].mxu1  ;;  %v2875_v4 = vpop.f32.mrb[13].mxu0 }
 0x113   : > { %v4153_v5 = vadd.f32 %v2899_v2, %v2898_v63  ;;  %v2901_v6 = vpop.f32.mrb[14].mxu1  ;;  %v4155_v7 = vadd.f32 %v2875_v4, %v2874_v1  ;;  %v2877_v9 = vpop.f32.mrb[14].mxu0  ;;  %v1777_v1 = vadd.f32 %v4135_v47, %v4171_v30 }
 0x114   : > { %v2902_v10 = vpop.f32.mrb[15].mxu1  ;;  %v2878_v11 = vpop.f32.mrb[15].mxu0 }
 0x115   : > { %v4159_v13 = vadd.f32 %v2902_v10, %v2901_v6  ;;  %v4161_v14 = vadd.f32 %v2878_v11, %v2877_v9 }
 0x116   : > { %2345 = vmatmul.mubr.bf16.gmra.mrb[120].mxu1 %v3625_v3 }
 0x117   : > { %2352 = vmatprep.mubr.bf16.mxu1 %v3627_v8 }
 0x118   : > { %3326 = vmatmul.mubr.bf16.gmra.mrb[120].mxu0 %v3630_v12 }
 0x119   : > { %v2904_v0 = vpop.f32.mrb[16].mxu1 }
 0x11a   : > { %v2905_v15 = vpop.f32.mrb[17].mxu1  ;;  %v2996_v17 = vpop.f32.mrb[16].mxu0 }
 0x11b   : > { %v4164_v18 = vadd.f32 %v2905_v15, %v2904_v0  ;;  %v2907_v19 = vpop.f32.mrb[18].mxu1  ;;  %v2997_v20 = vpop.f32.mrb[17].mxu0  ;;  %v1782_v15 = vadd.f32 %v4142_v55, %v4171_v30 }
 0x11c   : > { %v2908_v21 = vpop.f32.mrb[19].mxu1  ;;  %v2998_v22 = vadd.f32 %v2997_v20, %v2996_v17  ;;  %v2999_v24 = vpop.f32.mrb[18].mxu0 }
 0x11d   : > { %v4166_v26 = vadd.f32 %v2908_v21, %v2907_v19  ;;  %v3000_v27 = vpop.f32.mrb[19].mxu0  ;;  %v1785_v21 = vadd.f32 %v4148_v62, %v4171_v30 }
 0x11e   : > { %2353 = vmatmul.mubr.bf16.gmra.mrb[124].mxu1 %v3629_v16  ;;  %v3001_v28 = vadd.f32 %v3000_v27, %v2999_v24 }
 0x121   : > { %v2926_v29 = vpop.f32.mrb[20].mxu1 }
 0x122   : > { %v2927_v33 = vpop.f32.mrb[21].mxu1 }
 0x123   : > { %v2928_v35 = vadd.f32 %v2927_v33, %v2926_v29  ;;  %v2929_v36 = vpop.f32.mrb[22].mxu1  ;;  %v3002_v37 = vpop.f32.mrb[20].mxu0 }
 0x124   : > { %v2930_v39 = vpop.f32.mrb[23].mxu1  ;;  %v3003_v41 = vpop.f32.mrb[21].mxu0 }
 0x125   : > { %v1871_v43 = vadd.f32 %v2928_v35, %v1766_v34  ;;  %v2931_v44 = vadd.f32 %v2930_v39, %v2929_v36  ;;  %v3004_v45 = vadd.f32 %v3003_v41, %v3002_v37  ;;  %v3005_v48 = vpop.f32.mrb[22].mxu0  ;;  %v1790_v39 = vadd.f32 %v4155_v7, %v4171_v30 }
 0x126   : > { %v3006_v49 = vpop.f32.mrb[23].mxu0 }
 0x127   : > { %v1874_v50 = vadd.f32 %v2931_v44, %v1769_v42  ;;  %v4177_v51 = vadd.f32 %v2998_v22, %v1871_v43  ;;  %v3007_v52 = vadd.f32 %v3006_v49, %v3005_v48 }
 0x129   : > { %v4179_v54 = vadd.f32 %v3001_v28, %v1874_v50  ;;  %v2932_v25 = vpop.f32.mrb[24].mxu1 }
 0x12a   : > { %v2933_v56 = vpop.f32.mrb[25].mxu1 }
 0x12b   : > { %v2934_v58 = vadd.f32 %v2933_v56, %v2932_v25  ;;  %v2935_v59 = vpop.f32.mrb[26].mxu1  ;;  %v3008_v60 = vpop.f32.mrb[24].mxu0 }
 0x12c   : > { %v2936_v32 = vpop.f32.mrb[27].mxu1  ;;  %v3009_v63 = vpop.f32.mrb[25].mxu0 }
 0x12d   : > { %v1879_v2 = vadd.f32 %v2934_v58, %v1774_v57  ;;  %v2937_v3 = vadd.f32 %v2936_v32, %v2935_v59  ;;  %v3010_v4 = vadd.f32 %v3009_v63, %v3008_v60  ;;  %v3011_v6 = vpop.f32.mrb[26].mxu0  ;;  %v1798_v32 = vadd.f32 %v4114_v23, %v4171_v30 }
 0x12e   : > { %v3012_v8 = vpop.f32.mrb[27].mxu0 }
 0x12f   : > { %v1882_v9 = vadd.f32 %v2937_v3, %v1777_v1  ;;  %v4185_v10 = vadd.f32 %v3004_v45, %v1879_v2  ;;  %v3013_v11 = vadd.f32 %v3012_v8, %v3011_v6  ;;  %v1793_v45 = vadd.f32 %v4161_v14, %v4171_v30 }
 0x131   : > { %v4187_v12 = vadd.f32 %v3007_v52, %v1882_v9  ;;  %v2938_v40 = vpop.f32.mrb[28].mxu1 }
 0x132   : > { %v2939_v0 = vpop.f32.mrb[29].mxu1 }
 0x133   : > { %v2940_v16 = vadd.f32 %v2939_v0, %v2938_v40  ;;  %v2941_v17 = vpop.f32.mrb[30].mxu1  ;;  %v3014_v19 = vpop.f32.mrb[28].mxu0 }
 0x134   : > { %v2942_v47 = vpop.f32.mrb[31].mxu1  ;;  %v3015_v20 = vpop.f32.mrb[29].mxu0 }
 0x135   : > { %v1887_v22 = vadd.f32 %v2940_v16, %v1782_v15  ;;  %v2943_v24 = vadd.f32 %v2942_v47, %v2941_v17  ;;  %v3016_v27 = vadd.f32 %v3015_v20, %v3014_v19  ;;  %v3017_v28 = vpop.f32.mrb[30].mxu0  ;;  %v1806_v47 = vadd.f32 %v4127_v38, %v4171_v30 }
 0x136   : > { %v3018_v29 = vpop.f32.mrb[31].mxu0 }
 0x137   : > { %v1890_v33 = vadd.f32 %v2943_v24, %v1785_v21  ;;  %v4193_v34 = vadd.f32 %v3010_v4, %v1887_v22  ;;  %v3019_v35 = vadd.f32 %v3018_v29, %v3017_v28  ;;  %v1801_v4 = vadd.f32 %v4120_v31, %v4171_v30 }
 0x139   : > { %v4195_v36 = vadd.f32 %v3013_v11, %v1890_v33  ;;  %v2944_v55 = vpop.f32.mrb[32].mxu1 }
 0x13a   : > { %v2945_v37 = vpop.f32.mrb[33].mxu1 }
 0x13b   : > { %v2946_v41 = vadd.f32 %v2945_v37, %v2944_v55  ;;  %v2947_v42 = vpop.f32.mrb[34].mxu1  ;;  %v3020_v43 = vpop.f32.mrb[32].mxu0 }
 0x13c   : > { %v2948_v62 = vpop.f32.mrb[35].mxu1  ;;  %v3021_v44 = vpop.f32.mrb[33].mxu0 }
 0x13d   : > { %v1895_v48 = vadd.f32 %v2946_v41, %v1790_v39  ;;  %v2949_v49 = vadd.f32 %v2948_v62, %v2947_v42  ;;  %v3022_v50 = vadd.f32 %v3021_v44, %v3020_v43  ;;  %v3023_v52 = vpop.f32.mrb[34].mxu0  ;;  %v1814_v62 = vadd.f32 %v4140_v53, %v4171_v30 }
 0x13e   : > { %v3024_v25 = vpop.f32.mrb[35].mxu0 }
 0x13f   : > { %v1898_v56 = vadd.f32 %v2949_v49, %v1793_v45  ;;  %v4201_v57 = vadd.f32 %v3016_v27, %v1895_v48  ;;  %v3025_v58 = vadd.f32 %v3024_v25, %v3023_v52  ;;  %v1809_v27 = vadd.f32 %v4133_v46, %v4171_v30 }
 0x141   : > { %v4203_v59 = vadd.f32 %v3019_v35, %v1898_v56  ;;  %v2950_v7 = vpop.f32.mrb[36].mxu1 }
 0x142   : > { %v2951_v60 = vpop.f32.mrb[37].mxu1 }
 0x143   : > { %v2952_v63 = vadd.f32 %v2951_v60, %v2950_v7  ;;  %v2953_v1 = vpop.f32.mrb[38].mxu1  ;;  %v3026_v2 = vpop.f32.mrb[36].mxu0 }
 0x144   : > { %v2954_v14 = vpop.f32.mrb[39].mxu1  ;;  %v3027_v3 = vpop.f32.mrb[37].mxu0 }
 0x145   : > { %v1903_v6 = vadd.f32 %v2952_v63, %v1798_v32  ;;  %v2955_v8 = vadd.f32 %v2954_v14, %v2953_v1  ;;  %v3028_v9 = vadd.f32 %v3027_v3, %v3026_v2  ;;  %v3029_v11 = vpop.f32.mrb[38].mxu0  ;;  %v1822_v14 = vadd.f32 %v4153_v5, %v4171_v30 }
 0x146   : > { %v3030_v40 = vpop.f32.mrb[39].mxu0 }
 0x147   : > { %v1906_v0 = vadd.f32 %v2955_v8, %v1801_v4  ;;  %v4209_v15 = vadd.f32 %v3022_v50, %v1903_v6  ;;  %v3031_v16 = vadd.f32 %v3030_v40, %v3029_v11  ;;  %v1817_v50 = vadd.f32 %v4146_v61, %v4171_v30 }
 0x149   : > { %v4211_v17 = vadd.f32 %v3025_v58, %v1906_v0  ;;  %v2956_v23 = vpop.f32.mrb[40].mxu1 }
 0x14a   : > { %v2957_v19 = vpop.f32.mrb[41].mxu1 }
 0x14b   : > { %v2958_v20 = vadd.f32 %v2957_v19, %v2956_v23  ;;  %v2959_v21 = vpop.f32.mrb[42].mxu1  ;;  %v3032_v22 = vpop.f32.mrb[40].mxu0 }
 0x14c   : > { %v2960_v31 = vpop.f32.mrb[43].mxu1  ;;  %v3033_v24 = vpop.f32.mrb[41].mxu0 }
 0x14d   : > { %v1911_v28 = vadd.f32 %v2958_v20, %v1806_v47  ;;  %v2961_v29 = vadd.f32 %v2960_v31, %v2959_v21  ;;  %v3034_v33 = vadd.f32 %v3033_v24, %v3032_v22  ;;  %v3035_v35 = vpop.f32.mrb[42].mxu0  ;;  %v1830_v31 = vadd.f32 %v4164_v18, %v4171_v30 }
 0x14e   : > { %v3036_v55 = vpop.f32.mrb[43].mxu0 }
 0x14f   : > { %v1914_v37 = vadd.f32 %v2961_v29, %v1809_v27  ;;  %v4217_v39 = vadd.f32 %v3028_v9, %v1911_v28  ;;  %v3037_v41 = vadd.f32 %v3036_v55, %v3035_v35  ;;  %v1825_v9 = vadd.f32 %v4159_v13, %v4171_v30 }
 0x151   : > { %v4219_v42 = vadd.f32 %v3031_v16, %v1914_v37  ;;  %v2962_v38 = vpop.f32.mrb[44].mxu1 }
 0x152   : > { %v2963_v43 = vpop.f32.mrb[45].mxu1 }
 0x153   : > { %v2964_v44 = vadd.f32 %v2963_v43, %v2962_v38  ;;  %v2965_v45 = vpop.f32.mrb[46].mxu1  ;;  %v3038_v48 = vpop.f32.mrb[44].mxu0 }
 0x154   : > { %v2966_v46 = vpop.f32.mrb[47].mxu1  ;;  %v3039_v49 = vpop.f32.mrb[45].mxu0 }
 0x155   : > { %v1919_v52 = vadd.f32 %v2964_v44, %v1814_v62  ;;  %v2967_v25 = vadd.f32 %v2966_v46, %v2965_v45  ;;  %v3040_v56 = vadd.f32 %v3039_v49, %v3038_v48  ;;  %v3041_v58 = vpop.f32.mrb[46].mxu0 }
 0x156   : > { %v3042_v7 = vpop.f32.mrb[47].mxu0 }
 0x157   : > { %v1922_v60 = vadd.f32 %v2967_v25, %v1817_v50  ;;  %v4225_v32 = vadd.f32 %v3034_v33, %v1919_v52  ;;  %v3043_v63 = vadd.f32 %v3042_v7, %v3041_v58  ;;  %v1833_v33 = vadd.f32 %v4166_v26, %v4171_v30 }
 0x159   : > { %v4227_v1 = vadd.f32 %v3037_v41, %v1922_v60  ;;  %v2968_v53 = vpop.f32.mrb[48].mxu1 }
 0x15a   : > { %v2969_v2 = vpop.f32.mrb[49].mxu1 }
 0x15b   : > { %v2970_v3 = vadd.f32 %v2969_v2, %v2968_v53  ;;  %v2971_v4 = vpop.f32.mrb[50].mxu1  ;;  %v3044_v6 = vpop.f32.mrb[48].mxu0 }
 0x15c   : > { %v2972_v61 = vpop.f32.mrb[51].mxu1  ;;  %v3045_v8 = vpop.f32.mrb[49].mxu0 }
 0x15d   : > { %v1927_v11 = vadd.f32 %v2970_v3, %v1822_v14  ;;  %v2973_v40 = vadd.f32 %v2972_v61, %v2971_v4  ;;  %v3046_v0 = vadd.f32 %v3045_v8, %v3044_v6  ;;  %v3047_v16 = vpop.f32.mrb[50].mxu0 }
 0x15e   : > { %v3048_v23 = vpop.f32.mrb[51].mxu0 }
 0x15f   : > { %v1930_v19 = vadd.f32 %v2973_v40, %v1825_v9  ;;  %v4233_v47 = vadd.f32 %v3040_v56, %v1927_v11  ;;  %v3049_v20 = vadd.f32 %v3048_v23, %v3047_v16 }
 0x161   : > { %v4235_v21 = vadd.f32 %v3043_v63, %v1930_v19  ;;  %v2974_v5 = vpop.f32.mrb[52].mxu1 }
 0x162   : > { %v2975_v22 = vpop.f32.mrb[53].mxu1 }
 0x163   : > { %v2976_v24 = vadd.f32 %v2975_v22, %v2974_v5  ;;  %v2977_v27 = vpop.f32.mrb[54].mxu1  ;;  %v3136_v28 = vpop.f32.mrb[52].mxu0 }
 0x164   : > { %v2978_v13 = vpop.f32.mrb[55].mxu1  ;;  %v3137_v29 = vpop.f32.mrb[53].mxu0 }
 0x165   : > { %v1935_v35 = vadd.f32 %v2976_v24, %v1830_v31  ;;  %v2979_v55 = vadd.f32 %v2978_v13, %v2977_v27  ;;  %v3138_v37 = vadd.f32 %v3137_v29, %v3136_v28  ;;  %v3139_v41 = vpop.f32.mrb[54].mxu0 }
 0x166   : > { %v3140_v38 = vpop.f32.mrb[55].mxu0 }
 0x167   : > { %v1938_v43 = vadd.f32 %v2979_v55, %v1833_v33  ;;  %v4241_v62 = vadd.f32 %v3046_v0, %v1935_v35  ;;  %v3141_v44 = vadd.f32 %v3140_v38, %v3139_v41 }
 0x169   : > { %v4243_v45 = vadd.f32 %v3049_v20, %v1938_v43  ;;  %v3066_v18 = vpop.f32.mrb[56].mxu1 }
 0x16a   : > { %v3067_v48 = vpop.f32.mrb[57].mxu1 }
 0x16b   : > { %v3068_v46 = vadd.f32 %v3067_v48, %v3066_v18  ;;  %v3069_v49 = vpop.f32.mrb[58].mxu1  ;;  %v3142_v50 = vpop.f32.mrb[56].mxu0 }
 0x16c   : > { %v3070_v52 = vpop.f32.mrb[59].mxu1  ;;  %v3143_v25 = vpop.f32.mrb[57].mxu0 }
 0x16d   : > { %v2081_v26 = vadd.f32 %v3068_v46, %v4177_v51  ;;  %v3071_v30 = vadd.f32 %v3070_v52, %v3069_v49  ;;  %v3144_v56 = vadd.f32 %v3143_v25, %v3142_v50  ;;  %v3145_v58 = vpop.f32.mrb[58].mxu0 }
 0x16e   : > { %v3146_v7 = vpop.f32.mrb[59].mxu0 }
 0x16f   : > { %v2084_v60 = vadd.f32 %v3071_v30, %v4179_v54  ;;  %v4247_v63 = vadd.f32 %v3138_v37, %v2081_v26  ;;  %v3147_v53 = vadd.f32 %v3146_v7, %v3145_v58 }
 0x171   : > { %v4249_v2 = vadd.f32 %v3141_v44, %v2084_v60  ;;  %v3072_v14 = vpop.f32.mrb[60].mxu1 }
 0x172   : > { %v3073_v3 = vpop.f32.mrb[61].mxu1 }
 0x173   : > { %v3074_v4 = vadd.f32 %v3073_v3, %v3072_v14  ;;  %v3075_v6 = vpop.f32.mrb[62].mxu1  ;;  %v3148_v61 = vpop.f32.mrb[60].mxu0 }
 0x174   : > { %v3076_v8 = vpop.f32.mrb[63].mxu1  ;;  %v3149_v9 = vpop.f32.mrb[61].mxu0 }
 0x175   : > { %v2089_v51 = vadd.f32 %v3074_v4, %v4185_v10  ;;  %v3077_v11 = vadd.f32 %v3076_v8, %v3075_v6  ;;  %v3150_v40 = vadd.f32 %v3149_v9, %v3148_v61  ;;  %v3151_v0 = vpop.f32.mrb[62].mxu0 }
 0x176   : > { %v3152_v16 = vpop.f32.mrb[63].mxu0 }
 0x177   : > { %v2092_v54 = vadd.f32 %v3077_v11, %v4187_v12  ;;  %v4253_v23 = vadd.f32 %v3144_v56, %v2089_v51  ;;  %v3153_v19 = vadd.f32 %v3152_v16, %v3151_v0 }
 0x179   : > { %v4255_v20 = vadd.f32 %v3147_v53, %v2092_v54  ;;  %v3078_v5 = vpop.f32.mrb[64].mxu1 }
 0x17a   : > { %v3079_v22 = vpop.f32.mrb[65].mxu1 }
 0x17b   : > { %v3080_v31 = vadd.f32 %v3079_v22, %v3078_v5  ;;  %v3081_v24 = vpop.f32.mrb[66].mxu1  ;;  %v3154_v27 = vpop.f32.mrb[64].mxu0 }
 0x17c   : > { %v3082_v28 = vpop.f32.mrb[67].mxu1  ;;  %v3155_v13 = vpop.f32.mrb[65].mxu0 }
 0x17d   : > { %v2097_v10 = vadd.f32 %v3080_v31, %v4193_v34  ;;  %v3083_v29 = vadd.f32 %v3082_v28, %v3081_v24  ;;  %v3156_v33 = vadd.f32 %v3155_v13, %v3154_v27  ;;  %v3157_v35 = vpop.f32.mrb[66].mxu0 }
 0x17e   : > { %v3158_v55 = vpop.f32.mrb[67].mxu0 }
 0x17f   : > { %v2100_v12 = vadd.f32 %v3083_v29, %v4195_v36  ;;  %v4259_v37 = vadd.f32 %v3150_v40, %v2097_v10  ;;  %v3159_v41 = vadd.f32 %v3158_v55, %v3157_v35 }
 0x181   : > { %v4261_v38 = vadd.f32 %v3153_v19, %v2100_v12  ;;  %v3084_v43 = vpop.f32.mrb[68].mxu1 }
 0x182   : > { %v3085_v44 = vpop.f32.mrb[69].mxu1 }
 0x183   : > { %v3086_v18 = vadd.f32 %v3085_v44, %v3084_v43  ;;  %v3087_v48 = vpop.f32.mrb[70].mxu1  ;;  %v3160_v46 = vpop.f32.mrb[68].mxu0 }
 0x184   : > { %v3088_v49 = vpop.f32.mrb[71].mxu1  ;;  %v3161_v50 = vpop.f32.mrb[69].mxu0 }
 0x185   : > { %v2105_v34 = vadd.f32 %v3086_v18, %v4201_v57  ;;  %v3089_v52 = vadd.f32 %v3088_v49, %v3087_v48  ;;  %v3162_v25 = vadd.f32 %v3161_v50, %v3160_v46  ;;  %v3163_v26 = vpop.f32.mrb[70].mxu0 }
 0x186   : > { %v3164_v30 = vpop.f32.mrb[71].mxu0 }
 0x187   : > { %v2108_v36 = vadd.f32 %v3089_v52, %v4203_v59  ;;  %v4265_v56 = vadd.f32 %v3156_v33, %v2105_v34  ;;  %v3165_v58 = vadd.f32 %v3164_v30, %v3163_v26 }
 0x189   : > { %v4267_v7 = vadd.f32 %v3159_v41, %v2108_v36  ;;  %v3090_v60 = vpop.f32.mrb[72].mxu1 }
 0x18a   : > { %v3091_v53 = vpop.f32.mrb[73].mxu1 }
 0x18b   : > { %v3092_v14 = vadd.f32 %v3091_v53, %v3090_v60  ;;  %v3093_v3 = vpop.f32.mrb[74].mxu1  ;;  %v3166_v4 = vpop.f32.mrb[72].mxu0 }
 0x18c   : > { %v3094_v6 = vpop.f32.mrb[75].mxu1  ;;  %v3167_v61 = vpop.f32.mrb[73].mxu0 }
 0x18d   : > { %v2113_v57 = vadd.f32 %v3092_v14, %v4209_v15  ;;  %v3095_v8 = vadd.f32 %v3094_v6, %v3093_v3  ;;  %v3168_v9 = vadd.f32 %v3167_v61, %v3166_v4  ;;  %v3169_v51 = vpop.f32.mrb[74].mxu0 }
 0x18e   : > { %v3170_v11 = vpop.f32.mrb[75].mxu0 }
 0x18f   : > { %v2116_v59 = vadd.f32 %v3095_v8, %v4211_v17  ;;  %v4271_v40 = vadd.f32 %v3162_v25, %v2113_v57  ;;  %v3171_v0 = vadd.f32 %v3170_v11, %v3169_v51 }
 0x191   : > { %v4273_v16 = vadd.f32 %v3165_v58, %v2116_v59  ;;  %v3096_v54 = vpop.f32.mrb[76].mxu1 }
 0x192   : > { %v3097_v19 = vpop.f32.mrb[77].mxu1 }
 0x193   : > { %v3098_v5 = vadd.f32 %v3097_v19, %v3096_v54  ;;  %v3099_v22 = vpop.f32.mrb[78].mxu1  ;;  %v3172_v31 = vpop.f32.mrb[76].mxu0 }
 0x194   : > { %v3100_v24 = vpop.f32.mrb[79].mxu1  ;;  %v3173_v27 = vpop.f32.mrb[77].mxu0 }
 0x195   : > { %v2121_v15 = vadd.f32 %v3098_v5, %v4217_v39  ;;  %v3101_v28 = vadd.f32 %v3100_v24, %v3099_v22  ;;  %v3174_v13 = vadd.f32 %v3173_v27, %v3172_v31  ;;  %v3175_v10 = vpop.f32.mrb[78].mxu0 }
 0x196   : > { %v3176_v29 = vpop.f32.mrb[79].mxu0 }
 0x197   : > { %v2124_v17 = vadd.f32 %v3101_v28, %v4219_v42  ;;  %v4277_v33 = vadd.f32 %v3168_v9, %v2121_v15  ;;  %v3177_v35 = vadd.f32 %v3176_v29, %v3175_v10 }
 0x199   : > { %v4279_v55 = vadd.f32 %v3171_v0, %v2124_v17  ;;  %v3102_v12 = vpop.f32.mrb[80].mxu1 }
 0x19a   : > { %v3103_v41 = vpop.f32.mrb[81].mxu1 }
 0x19b   : > { %v3104_v43 = vadd.f32 %v3103_v41, %v3102_v12  ;;  %v3105_v44 = vpop.f32.mrb[82].mxu1  ;;  %v3178_v18 = vpop.f32.mrb[80].mxu0 }
 0x19c   : > { %v3106_v48 = vpop.f32.mrb[83].mxu1  ;;  %v3179_v46 = vpop.f32.mrb[81].mxu0 }
 0x19d   : > { %v2129_v39 = vadd.f32 %v3104_v43, %v4225_v32  ;;  %v3107_v49 = vadd.f32 %v3106_v48, %v3105_v44  ;;  %v3180_v50 = vadd.f32 %v3179_v46, %v3178_v18  ;;  %v3181_v34 = vpop.f32.mrb[82].mxu0 }
 0x19e   : > { %v3182_v52 = vpop.f32.mrb[83].mxu0 }
 0x19f   : > { %v2132_v42 = vadd.f32 %v3107_v49, %v4227_v1  ;;  %v4283_v25 = vadd.f32 %v3174_v13, %v2129_v39  ;;  %v3183_v26 = vadd.f32 %v3182_v52, %v3181_v34 }
 0x1a1   : > { %v4285_v30 = vadd.f32 %v3177_v35, %v2132_v42  ;;  %v3108_v36 = vpop.f32.mrb[84].mxu1 }
 0x1a2   : > { %v3109_v58 = vpop.f32.mrb[85].mxu1 }
 0x1a3   : > { %v3110_v60 = vadd.f32 %v3109_v58, %v3108_v36  ;;  %v3111_v53 = vpop.f32.mrb[86].mxu1  ;;  %v3184_v14 = vpop.f32.mrb[84].mxu0 }
 0x1a4   : > { %v3112_v3 = vpop.f32.mrb[87].mxu1  ;;  %v3185_v4 = vpop.f32.mrb[85].mxu0 }
 0x1a5   : > { %v2137_v32 = vadd.f32 %v3110_v60, %v4233_v47  ;;  %v3113_v6 = vadd.f32 %v3112_v3, %v3111_v53  ;;  %v3186_v61 = vadd.f32 %v3185_v4, %v3184_v14  ;;  %v3187_v57 = vpop.f32.mrb[86].mxu0 }
 0x1a6   : > { %v3188_v8 = vpop.f32.mrb[87].mxu0 }
 0x1a7   : > { %v2140_v1 = vadd.f32 %v3113_v6, %v4235_v21  ;;  %v4289_v9 = vadd.f32 %v3180_v50, %v2137_v32  ;;  %v3189_v51 = vadd.f32 %v3188_v8, %v3187_v57 }
 0x1a9   : > { %v4291_v11 = vadd.f32 %v3183_v26, %v2140_v1  ;;  %v3114_v59 = vpop.f32.mrb[88].mxu1 }
 0x1aa   : > { %v3115_v0 = vpop.f32.mrb[89].mxu1 }
 0x1ab   : > { %v3116_v54 = vadd.f32 %v3115_v0, %v3114_v59  ;;  %v3117_v19 = vpop.f32.mrb[90].mxu1  ;;  %v2395_v5 = vpop.f32.mrb[88].mxu0 }
 0x1ac   : > { %v3118_v22 = vpop.f32.mrb[91].mxu1  ;;  %v3295_v31 = vpop.f32.mrb[89].mxu0 }
 0x1ad   : > { %v2145_v47 = vadd.f32 %v3116_v54, %v4241_v62  ;;  %v3119_v24 = vadd.f32 %v3118_v22, %v3117_v19  ;;  %v2398_v27 = vpop.f32.mrb[90].mxu0 }
 0x1ae   : > { %v3296_v15 = vpop.f32.mrb[91].mxu0 }
 0x1af   : > { %v2148_v28 = vadd.f32 %v3119_v24, %v4243_v45  ;;  %v4295_v21 = vadd.f32 %v3186_v61, %v2145_v47 }
 0x1b1   : > { %v4297_v13 = vadd.f32 %v3189_v51, %v2148_v28  ;;  %v3206_v10 = vpop.f32.mrb[92].mxu1 }
 0x1b2   : > { %v3207_v29 = vpop.f32.mrb[93].mxu1 }
 0x1b3   : > { %v3208_v17 = vadd.f32 %v3207_v29, %v3206_v10  ;;  %v3209_v35 = vpop.f32.mrb[94].mxu1  ;;  %v2403_v12 = vpop.f32.mrb[92].mxu0 }
 0x1b4   : > { %v3210_v41 = vpop.f32.mrb[95].mxu1  ;;  %v3299_v43 = vpop.f32.mrb[93].mxu0 }
 0x1b5   : > { %v3211_v44 = vadd.f32 %v3210_v41, %v3209_v35  ;;  %v2291_v18 = vadd.f32 %v3208_v17, %v4247_v63  ;;  %v2406_v62 = vpop.f32.mrb[94].mxu0 }
 0x1b6   : > { %v3300_v48 = vpop.f32.mrb[95].mxu0 }
 0x1b7   : > { %v2396_v46 = vadd.f32 %v2395_v5, %v2291_v18  ;;  %v2294_v39 = vadd.f32 %v3211_v44, %v4249_v2 }
 0x1b9   : > { %v2466_v45 = vmax.f32 %v2396_v46, 0.0  ;;  %v2399_v49 = vadd.f32 %v2398_v27, %v2294_v39  ;;  %v3212_v50 = vpop.f32.mrb[96].mxu1 }
 0x1ba   : > { %v3213_v34 = vpop.f32.mrb[97].mxu1 }
 0x1bb   : > { %v2485_v52 = vrot.slane %v2466_v45, 1  ;;  %v3214_v42 = vadd.f32 %v3213_v34, %v3212_v50  ;;  %v3215_v26 = vpop.f32.mrb[98].mxu1  ;;  %v2411_v36 = vpop.f32.mrb[96].mxu0  ;;  %v2467_v14 = vmax.f32 %v2399_v49, 0.0 }
 0x1bc   : > { %v3216_v58 = vpop.f32.mrb[99].mxu1  ;;  %v3303_v60 = vpop.f32.mrb[97].mxu0 }
 0x1bd   : > { %v2487_v53 = vmax.f32 %v2466_v45, %v2485_v52  ;;  %v3217_v3 = vadd.f32 %v3216_v58, %v3215_v26  ;;  %v2299_v63 = vadd.f32 %v3214_v42, %v4253_v23  ;;  %v2414_v4 = vpop.f32.mrb[98].mxu0 }
 0x1be   : > { %v3304_v32 = vpop.f32.mrb[99].mxu0 }
 0x1bf   : > { %v2488_v6 = vmax.f32 %v2487_v53, %v2467_v14  ;;  %v2404_v61 = vadd.f32 %v2403_v12, %v2299_v63  ;;  %v2302_v2 = vadd.f32 %v3217_v3, %v4255_v20 }
 0x1c1   : > { %v2468_v57 = vmax.f32 %v2404_v61, 0.0  ;;  %v2407_v8 = vadd.f32 %v2406_v62, %v2302_v2  ;;  %v3218_v1 = vpop.f32.mrb[100].mxu1 }
 0x1c2   : > { %v3219_v51 = vpop.f32.mrb[101].mxu1 }
 0x1c3   : > { %v2490_v59 = vrot.slane %v2468_v57, 1  ;;  %v3220_v0 = vadd.f32 %v3219_v51, %v3218_v1  ;;  %v3221_v54 = vpop.f32.mrb[102].mxu1  ;;  %v2419_v19 = vpop.f32.mrb[100].mxu0  ;;  %v2469_v47 = vmax.f32 %v2407_v8, 0.0 }
 0x1c4   : > { %v3222_v5 = vpop.f32.mrb[103].mxu1  ;;  %v3307_v22 = vpop.f32.mrb[101].mxu0 }
 0x1c5   : > { %v2492_v31 = vmax.f32 %v2468_v57, %v2490_v59  ;;  %v3223_v24 = vadd.f32 %v3222_v5, %v3221_v54  ;;  %v2307_v23 = vadd.f32 %v3220_v0, %v4259_v37  ;;  %v2422_v27 = vpop.f32.mrb[102].mxu0 }
 0x1c6   : > { %v3308_v15 = vpop.f32.mrb[103].mxu0 }
 0x1c7   : > { %v2493_v28 = vmax.f32 %v2492_v31, %v2469_v47  ;;  %v2412_v10 = vadd.f32 %v2411_v36, %v2307_v23  ;;  %v2310_v20 = vadd.f32 %v3223_v24, %v4261_v38 }
 0x1c9   : > { %v2499_v29 = vmax.f32 %v2488_v6, %v2493_v28  ;;  %v2470_v17 = vmax.f32 %v2412_v10, 0.0  ;;  %v2415_v35 = vadd.f32 %v2414_v4, %v2310_v20  ;;  %v3224_v12 = vpop.f32.mrb[104].mxu1 }
 0x1ca   : > { %v3225_v41 = vpop.f32.mrb[105].mxu1 }
 0x1cb   : > { %v2495_v43 = vrot.slane %v2470_v17, 1  ;;  %v3226_v44 = vadd.f32 %v3225_v41, %v3224_v12  ;;  %v3227_v18 = vpop.f32.mrb[106].mxu1  ;;  %v2427_v62 = vpop.f32.mrb[104].mxu0  ;;  %v2471_v37 = vmax.f32 %v2415_v35, 0.0 }
 0x1cc   : > { %v3228_v48 = vpop.f32.mrb[107].mxu1  ;;  %v3311_v46 = vpop.f32.mrb[105].mxu0 }
 0x1cd   : > { %v2497_v39 = vmax.f32 %v2470_v17, %v2495_v43  ;;  %v3229_v45 = vadd.f32 %v3228_v48, %v3227_v18  ;;  %v2315_v49 = vadd.f32 %v3226_v44, %v4265_v56  ;;  %v2430_v50 = vpop.f32.mrb[106].mxu0 }
 0x1ce   : > { %v3312_v34 = vpop.f32.mrb[107].mxu0 }
 0x1cf   : > { %v2498_v38 = vmax.f32 %v2497_v39, %v2471_v37  ;;  %v2420_v52 = vadd.f32 %v2419_v19, %v2315_v49  ;;  %v2318_v42 = vadd.f32 %v3229_v45, %v4267_v7 }
 0x1d1   : > { %v2500_v26 = vmax.f32 %v2499_v29, %v2498_v38  ;;  %v2472_v36 = vmax.f32 %v2420_v52, 0.0  ;;  %v2423_v58 = vadd.f32 %v2422_v27, %v2318_v42  ;;  %v3230_v60 = vpop.f32.mrb[108].mxu1 }
 0x1d2   : > { %v3231_v53 = vpop.f32.mrb[109].mxu1 }
 0x1d3   : > { %v2501_v56 = vpack.c.bf16 %v2500_v26, %v2500_v26  ;;  %v2505_v14 = vrot.slane %v2472_v36, 1  ;;  %v3232_v3 = vadd.f32 %v3231_v53, %v3230_v60  ;;  %v3233_v63 = vpop.f32.mrb[110].mxu1  ;;  %v2435_v4 = vpop.f32.mrb[108].mxu0  ;;  %v2473_v61 = vmax.f32 %v2423_v58, 0.0 }
 0x1d4   : > { %v3234_v32 = vpop.f32.mrb[111].mxu1  ;;  %v3315_v6 = vpop.f32.mrb[109].mxu0 }
 0x1d5   : > { %2503 = vst.msk [vmem:[%s4311_s11] sm:$0x3] %vm2502_vm1, %v2501_v56  ;;  %v2507_v7 = vmax.f32 %v2472_v36, %v2505_v14  ;;  %v3235_v2 = vadd.f32 %v3234_v32, %v3233_v63  ;;  %v2323_v57 = vadd.f32 %v3232_v3, %v4271_v40  ;;  %v2438_v8 = vpop.f32.mrb[110].mxu0 }
 0x1d6   : > { %v3316_v1 = vpop.f32.mrb[111].mxu0 }
 0x1d7   : > { %v2508_v51 = vmax.f32 %v2507_v7, %v2473_v61  ;;  %v2428_v59 = vadd.f32 %v2427_v62, %v2323_v57  ;;  %v2326_v0 = vadd.f32 %v3235_v2, %v4273_v16 }
 0x1d9   : > { %v2514_v54 = vmax.f32 %v2498_v38, %v2508_v51  ;;  %v2474_v19 = vmax.f32 %v2428_v59, 0.0  ;;  %v2431_v5 = vadd.f32 %v2430_v50, %v2326_v0  ;;  %v3236_v22 = vpop.f32.mrb[112].mxu1 }
 0x1da   : > { %v3237_v31 = vpop.f32.mrb[113].mxu1 }
 0x1db   : > { %v2510_v47 = vrot.slane %v2474_v19, 1  ;;  %v3238_v24 = vadd.f32 %v3237_v31, %v3236_v22  ;;  %v3239_v23 = vpop.f32.mrb[114].mxu1  ;;  %v2443_v27 = vpop.f32.mrb[112].mxu0  ;;  %v2475_v20 = vmax.f32 %v2431_v5, 0.0 }
 0x1dc   : > { %v3240_v15 = vpop.f32.mrb[115].mxu1  ;;  %v3319_v28 = vpop.f32.mrb[113].mxu0 }
 0x1dd   : > { %v2512_v10 = vmax.f32 %v2474_v19, %v2510_v47  ;;  %v3241_v40 = vadd.f32 %v3240_v15, %v3239_v23  ;;  %v2331_v29 = vadd.f32 %v3238_v24, %v4277_v33  ;;  %v2446_v17 = vpop.f32.mrb[114].mxu0 }
 0x1de   : > { %v3320_v35 = vpop.f32.mrb[115].mxu0 }
 0x1df   : > { %v2513_v16 = vmax.f32 %v2512_v10, %v2475_v20  ;;  %v2436_v12 = vadd.f32 %v2435_v4, %v2331_v29  ;;  %v2334_v41 = vadd.f32 %v3241_v40, %v4279_v55 }
 0x1e1   : > { %v2515_v43 = vmax.f32 %v2514_v54, %v2513_v16  ;;  %v2476_v44 = vmax.f32 %v2436_v12, 0.0  ;;  %v2439_v18 = vadd.f32 %v2438_v8, %v2334_v41  ;;  %v3242_v62 = vpop.f32.mrb[116].mxu1 }
 0x1e2   : > { %v3243_v48 = vpop.f32.mrb[117].mxu1 }
 0x1e3   : > { %v2516_v46 = vpack.c.bf16 %v2515_v43, %v2515_v43  ;;  %v2520_v39 = vrot.slane %v2476_v44, 1  ;;  %v3244_v37 = vadd.f32 %v3243_v48, %v3242_v62  ;;  %v3245_v45 = vpop.f32.mrb[118].mxu1  ;;  %v2451_v49 = vpop.f32.mrb[116].mxu0  ;;  %v2477_v38 = vmax.f32 %v2439_v18, 0.0 }
 0x1e4   : > { %v3246_v50 = vpop.f32.mrb[119].mxu1  ;;  %v3323_v34 = vpop.f32.mrb[117].mxu0 }
 0x1e5   : > { %2834 = vst.msk [vmem:[%s4311_s11 + $0x2] sm:$0x3] %vm2502_vm1, %v2516_v46  ;;  %v2522_v33 = vmax.f32 %v2476_v44, %v2520_v39  ;;  %v3247_v52 = vadd.f32 %v3246_v50, %v3245_v45  ;;  %v2339_v42 = vadd.f32 %v3244_v37, %v4283_v25  ;;  %v2454_v55 = vpop.f32.mrb[118].mxu0 }
 0x1e6   : > { %v3324_v26 = vpop.f32.mrb[119].mxu0 }
 0x1e7   : > { %v2523_v36 = vmax.f32 %v2522_v33, %v2477_v38  ;;  %v2444_v58 = vadd.f32 %v2443_v27, %v2339_v42  ;;  %v2342_v60 = vadd.f32 %v3247_v52, %v4285_v30 }
 0x1e9   : > { %v2529_v53 = vmax.f32 %v2513_v16, %v2523_v36  ;;  %v2478_v56 = vmax.f32 %v2444_v58, 0.0  ;;  %v2447_v14 = vadd.f32 %v2446_v17, %v2342_v60  ;;  %v3248_v3 = vpop.f32.mrb[120].mxu1 }
 0x1ea   : > { %v3249_v63 = vpop.f32.mrb[121].mxu1 }
 0x1eb   : > { %v2525_v4 = vrot.slane %v2478_v56, 1  ;;  %v3250_v32 = vadd.f32 %v3249_v63, %v3248_v3  ;;  %v3251_v6 = vpop.f32.mrb[122].mxu1  ;;  %v2459_v7 = vpop.f32.mrb[120].mxu0  ;;  %v2479_v8 = vmax.f32 %v2447_v14, 0.0 }
 0x1ec   : > { %v3252_v61 = vpop.f32.mrb[123].mxu1  ;;  %v3327_v2 = vpop.f32.mrb[121].mxu0 }
 0x1ed   : > { %v2527_v57 = vmax.f32 %v2478_v56, %v2525_v4  ;;  %v3253_v25 = vadd.f32 %v3252_v61, %v3251_v6  ;;  %v2347_v1 = vadd.f32 %v3250_v32, %v4289_v9  ;;  %v2462_v51 = vpop.f32.mrb[122].mxu0 }
 0x1ee   : > { %v3328_v59 = vpop.f32.mrb[123].mxu0 }
 0x1ef   : > { %v2528_v30 = vmax.f32 %v2527_v57, %v2479_v8  ;;  %v2452_v0 = vadd.f32 %v2451_v49, %v2347_v1  ;;  %v2350_v54 = vadd.f32 %v3253_v25, %v4291_v11 }
 0x1f1   : > { %v2530_v19 = vmax.f32 %v2529_v53, %v2528_v30  ;;  %v2480_v5 = vmax.f32 %v2452_v0, 0.0  ;;  %v2455_v22 = vadd.f32 %v2454_v55, %v2350_v54  ;;  %v3254_v31 = vpop.f32.mrb[124].mxu1 }
 0x1f2   : > { %v3255_v47 = vpop.f32.mrb[125].mxu1 }
 0x1f3   : > { %v2531_v24 = vpack.c.bf16 %v2530_v19, %v2530_v19  ;;  %v2535_v23 = vrot.slane %v2480_v5, 1  ;;  %v3256_v27 = vadd.f32 %v3255_v47, %v3254_v31  ;;  %v3257_v15 = vpop.f32.mrb[126].mxu1  ;;  %v2481_v10 = vmax.f32 %v2455_v22, 0.0 }
 0x1f4   : > { %v3258_v28 = vpop.f32.mrb[127].mxu1 }
 0x1f5   : > { %2835 = vst.msk [vmem:[%s4311_s11 + $0x4] sm:$0x3] %vm2502_vm1, %v2531_v24  ;;  %v2537_v9 = vmax.f32 %v2480_v5, %v2535_v23  ;;  %v3259_v20 = vadd.f32 %v3258_v28, %v3257_v15  ;;  %v2355_v40 = vadd.f32 %v3256_v27, %v4295_v21 }
 0x1f7   : > { %v2538_v29 = vmax.f32 %v2537_v9, %v2481_v10  ;;  %v2460_v11 = vadd.f32 %v2459_v7, %v2355_v40  ;;  %v2358_v17 = vadd.f32 %v3259_v20, %v4297_v13 }
 0x1f9   : > { %v2544_v35 = vmax.f32 %v2528_v30, %v2538_v29  ;;  %v2482_v16 = vmax.f32 %v2460_v11, 0.0  ;;  %v2463_v12 = vadd.f32 %v2462_v51, %v2358_v17 }
 0x1fb   : > { %v2540_v41 = vrot.slane %v2482_v16, 1  ;;  %v2483_v44 = vmax.f32 %v2463_v12, 0.0 }
 0x1fd   : > { %v2542_v43 = vmax.f32 %v2482_v16, %v2540_v41 }
 0x1ff   : > { %v2543_v18 = vmax.f32 %v2542_v43, %v2483_v44 }
 0x201   : > { %v2545_v62 = vmax.f32 %v2544_v35, %v2543_v18 }
 0x203   : > { %v2546_v48 = vpack.c.bf16 %v2545_v62, %v2545_v62 }
 0x205   : > { %2836 = vst.msk [vmem:[%s4311_s11 + $0x6] sm:$0x3] %vm2502_vm1, %v2546_v48 }
 0x206 PF: > { %s13_s12 = sadd.s32 1, %s3637_s12  }
 0x207   : > { %p10_p4 = scmp.ge.s32.totalorder %s13_s12, 4  }
 0x209   :  { %12 = sbr.rel (!%p10_p4) target bundleno = 1 (0x1), region = 65 }

</bundles_post_ra>
